<compile_context>
chip_gen: v7x
topology: tpu7x:2x2x1
jax: 0.10.0
libtpu: 0.0.40
codegen_flags: <defaults>
</compile_context>

<pallas_src>
import functools

import jax
import jax.numpy as jnp
from jax.experimental import pallas as pl
from jax.experimental.pallas import tpu as pltpu


def _round_up(x, m):
    return ((x + m - 1) // m) * m


def _siren_kernel(x_ref, w_ref, b_ref, o_ref, *, apply_sin):
    # x_ref: (tm, in_f)  w_ref: (in_f, out_fp)  b_ref: (1, out_fp)  o_ref: (tm, out_fp)
    # w0 is already folded into w_ref / b_ref by prepare_siren_params().
    y = jnp.dot(x_ref[...], w_ref[...], preferred_element_type=jnp.float32)
    y = y + b_ref[...]                      # (1, out_fp) broadcast over rows
    if apply_sin:                           # resolved at trace time
        y = jnp.sin(y)                      # keep in f32; cast only on store
    o_ref[...] = y.astype(o_ref.dtype)


def prepare_siren_params(weight, bias, *, w0=30.0, is_last=False):
    """One-time parameter prep (call OUTSIDE the hot path, reuse the result).

    weight: [out_f, in_f] (PyTorch nn.Linear layout), bias: [out_f].
    Returns (w_t, b2, out_f): w_t is [in_f, out_fp] with w0 folded in,
    b2 is [1, out_fp] with w0 folded in, out_fp = round_up(out_f, 128).
    """
    out_f, in_f = weight.shape
    w_t = jnp.asarray(weight, jnp.float32).T          # [in_f, out_f] for the MXU
    b = jnp.asarray(bias, jnp.float32)
    if not is_last:
        w_t = w_t * jnp.float32(w0)
        b = b * jnp.float32(w0)
    out_fp = _round_up(out_f, 128)                    # lane-dense stores
    if out_fp != out_f:
        w_t = jnp.pad(w_t, ((0, 0), (0, out_fp - out_f)))
        b = jnp.pad(b, (0, out_fp - out_f))
    return w_t, b.reshape(1, out_fp), out_f


def siren_layer_apply(x, w_t, b2, out_f, *, is_last=False, tm=1024, out_dtype=None):
    """Apply one SIREN layer. x: [N, in_f]; (w_t, b2, out_f) from prepare_siren_params.

    Memory-bound kernel: on v6e/v7x pass x (and out_dtype) as bfloat16 for ~2x;
    the matmul accumulation and sin() stay in f32 regardless.
    tm is the row tile -- sweep 512..2048 for large N (keep n//tm >= ~8 on v7x).
    """
    n, in_f = x.shape
    in_f_w, out_fp = w_t.shape
    assert in_f == in_f_w, "x feature dim must match weight"
    out_dtype = x.dtype if out_dtype is None else out_dtype

    # Clamp the row tile to the problem size; ragged tail handled by Pallas.
    tm_eff = int(min(tm, _round_up(n, 8)))
    grid = (pl.cdiv(n, tm_eff),)

    # Derive a VMEM budget from the actual footprint: double-buffered x/out
    # blocks + (double-buffered) resident weight & bias + headroom.
    x_b = jnp.dtype(x.dtype).itemsize
    o_b = jnp.dtype(out_dtype).itemsize
    need = (2 * (tm_eff * in_f * x_b + tm_eff * out_fp * o_b)
            + 2 * (in_f * out_fp + out_fp) * 4
            + (4 << 20))
    vmem_limit = int(max(need, 32 << 20))

    kernel = functools.partial(_siren_kernel, apply_sin=not is_last)

    out = pl.pallas_call(
        kernel,
        out_shape=jax.ShapeDtypeStruct((n, out_fp), out_dtype),
        grid_spec=pltpu.PrefetchScalarGridSpec(
            num_scalar_prefetch=0,
            grid=grid,
            in_specs=[
                pl.BlockSpec((tm_eff, in_f), lambda i: (i, 0)),    # row tile of x
                pl.BlockSpec((in_f, out_fp), lambda i: (0, 0)),    # full (w0-folded) weight
                pl.BlockSpec((1, out_fp), lambda i: (0, 0)),       # full (w0-folded) bias
            ],
            out_specs=pl.BlockSpec((tm_eff, out_fp), lambda i: (i, 0)),
        ),
        compiler_params=pltpu.CompilerParams(
            dimension_semantics=("parallel",),
            vmem_limit_bytes=vmem_limit,
        ),
    )(x, w_t, b2)

    if out_fp != out_f:
        out = out[:, :out_f]               # drop lane padding
    return out


def siren_layer(x, weight, bias, *, w0=30.0, is_last=False, tm=1024, out_dtype=None):
    """Convenience wrapper matching the torch module's forward exactly.
    (For repeated calls, run prepare_siren_params once and use siren_layer_apply.)"""
    w_t, b2, out_f = prepare_siren_params(weight, bias, w0=w0, is_last=is_last)
    return siren_layer_apply(x, w_t, b2, out_f, is_last=is_last, tm=tm, out_dtype=out_dtype)


def init_siren_params(key, in_f, out_f, *, w0=30.0, is_first=False):
    """Deterministic SIREN init matching the PyTorch module."""
    kw, kb = jax.random.split(key)
    b = 1.0 / in_f if is_first else float(jnp.sqrt(6.0 / in_f)) / w0
    weight = jax.random.uniform(kw, (out_f, in_f), jnp.float32, minval=-b, maxval=b)
    # nn.Linear default bias init: U(-1/sqrt(in_f), 1/sqrt(in_f))
    bb = 1.0 / float(jnp.sqrt(jnp.float32(in_f)))
    bias = jax.random.uniform(kb, (out_f,), jnp.float32, minval=-bb, maxval=bb)
    return weight, bias


if __name__ == "__main__":
    key = jax.random.PRNGKey(0)
    k_x1, k_p1, k_x2, k_p2 = jax.random.split(key, 4)
    W0 = 30.0

    # --- Demo 1: hidden SIREN layer (sin activation), 128-lane-aligned out_f ---
    N1, IN1, OUT1 = 256, 64, 128
    x1 = jax.random.normal(k_x1, (N1, IN1), jnp.float32)
    w1, b1 = init_siren_params(k_p1, IN1, OUT1, w0=W0, is_first=True)
    w1_t, b1_2, out1_f = prepare_siren_params(w1, b1, w0=W0, is_last=False)
    out1 = siren_layer_apply(x1, w1_t, b1_2, out1_f, is_last=False)
    out1 = jax.block_until_ready(out1)
    ref1 = jnp.sin(W0 * (x1 @ w1.T + b1))
    assert out1.shape == (N1, OUT1)
    assert jnp.allclose(out1, ref1, atol=1e-4, rtol=1e-4)

    # --- Demo 2: last layer (no sin), ragged row count and out_f < 128
    #     (exercises tail masking + lane padding / slice-back) ---
    N2, IN2, OUT2 = 200, 128, 64
    x2 = jax.random.normal(k_x2, (N2, IN2), jnp.float32)
    w2, b2v = init_siren_params(k_p2, IN2, OUT2, w0=W0, is_first=False)
    out2 = siren_layer(x2, w2, b2v, w0=W0, is_last=True)
    out2 = jax.block_until_ready(out2)
    ref2 = x2 @ w2.T + b2v
    assert out2.shape == (N2, OUT2)
    assert jnp.allclose(out2, ref2, atol=1e-4, rtol=1e-4)

    print("KERNEL_OK")
</pallas_src>

<mosaic_0001>
module attributes {stable_mosaic.version = 11 : i64} {
  func.func @_siren_kernel(%arg0: i32, %arg1: memref<256x64xf32, #tpu.memory_space<vmem>>, %arg2: memref<64x128xf32, #tpu.memory_space<vmem>>, %arg3: memref<1x128xf32, #tpu.memory_space<vmem>>, %arg4: memref<256x128xf32, #tpu.memory_space<vmem>>) attributes {dimension_semantics = [#tpu.dimension_semantics<parallel>], iteration_bounds = array<i64: 1>, scalar_prefetch = 0 : i64, scratch_operands = 0 : i64, tpu.core_type = #tpu.core_type<tc>, window_params = [{transform_indices = @transform_0, window_bounds = array<i64: 256, 64>}, {pipeline_mode = #tpu.pipeline_mode<synchronous>, transform_indices = @transform_1, window_bounds = array<i64: 64, 128>}, {pipeline_mode = #tpu.pipeline_mode<synchronous>, transform_indices = @transform_2, window_bounds = array<i64: 1, 128>}, {transform_indices = @transform_3, window_bounds = array<i64: 256, 128>}]} {
    %c0 = arith.constant 0 : index
    %c0_0 = arith.constant 0 : index
    %0 = vector.load %arg1[%c0, %c0_0] : memref<256x64xf32, #tpu.memory_space<vmem>>, vector<256x64xf32>
    %c0_1 = arith.constant 0 : index
    %c0_2 = arith.constant 0 : index
    %1 = vector.load %arg2[%c0_1, %c0_2] : memref<64x128xf32, #tpu.memory_space<vmem>>, vector<64x128xf32>
    %cst = arith.constant dense<0.000000e+00> : vector<256x128xf32>
    %2 = tpu.matmul %0, %1, %cst {dimension_numbers = #tpu.dot_dimension_numbers<[1], [0], [0], [1], [0, 0, 1, 1], [], []>} : vector<256x64xf32>, vector<64x128xf32>, vector<256x128xf32> -> vector<256x128xf32>
    %c0_3 = arith.constant 0 : index
    %c0_4 = arith.constant 0 : index
    %3 = vector.load %arg3[%c0_3, %c0_4] : memref<1x128xf32, #tpu.memory_space<vmem>>, vector<1x128xf32>
    %4 = vector.broadcast %3 : vector<1x128xf32> to vector<256x128xf32>
    %5 = arith.addf %2, %4 : vector<256x128xf32>
    %6 = math.sin %5 : vector<256x128xf32>
    %c0_5 = arith.constant 0 : index
    %c0_6 = arith.constant 0 : index
    %7 = vector.load %arg4[%c0_5, %c0_6] : memref<256x128xf32, #tpu.memory_space<vmem>>, vector<256x128xf32>
    tpu.vector_store %arg4[%c0_5, %c0_6], %6 {strides = array<i32>} : memref<256x128xf32, #tpu.memory_space<vmem>>, vector<256x128xf32>,
    return
  }
  func.func @transform_0(%arg0: i32) -> (i32, i32) {
    %c0_i32 = arith.constant 0 : i32
    %c0_i32_0 = arith.constant 0 : i32
    return %arg0, %c0_i32 : i32, i32
  }
  func.func @transform_1(%arg0: i32) -> (i32, i32) {
    %c0_i32 = arith.constant 0 : i32
    %c0_i32_0 = arith.constant 0 : i32
    %c0_i32_1 = arith.constant 0 : i32
    return %c0_i32, %c0_i32_0 : i32, i32
  }
  func.func @transform_2(%arg0: i32) -> (i32, i32) {
    %c0_i32 = arith.constant 0 : i32
    %c0_i32_0 = arith.constant 0 : i32
    %c0_i32_1 = arith.constant 0 : i32
    return %c0_i32, %c0_i32_0 : i32, i32
  }
  func.func @transform_3(%arg0: i32) -> (i32, i32) {
    %c0_i32 = arith.constant 0 : i32
    %c0_i32_0 = arith.constant 0 : i32
    return %arg0, %c0_i32 : i32, i32
  }
}

</mosaic_0001>

<bundles_post_ra>
// kernel: tpu_custom_call.1
= control target key start
LH: loop header
LB: loop body
LE: loop exit
PB: predicated region body
PF: predicated region fallthrough
CT: control target
= control target key end

     0   :  { %vm62_vm0 = vcmask 523264   ;;  %s7171_s0 = inlined_call_operand.vmem [shape: f32[256,64], index: 0, kind: input, shape index: {}]   ;;  %s7172_s1 = inlined_call_operand.vmem [shape: f32[64,128], index: 1, kind: input, shape index: {}]   ;;  %s7173_s2 = inlined_call_operand.vmem [shape: f32[1,128], index: 2, kind: input, shape index: {}]   ;;  %s7174_s3 = inlined_call_operand.hbm [shape: f32[256,128], index: 3, kind: output, shape index: {}]  }
   0x1   :  { %v47_v0 = vld [vmem:[%s7172_s1] sm:$0xff]  ;;  %v48_v1 = vld [vmem:[%s7172_s1 + $0x8] sm:$0xff]  ;;  %v49_v2 = vld [vmem:[%s7172_s1 + $0x10] sm:$0xff] }
   0x2   :  { %v4025_v3 = vpack.c.bf16 %v48_v1, %v47_v0  ;;  %v50_v4 = vld [vmem:[%s7172_s1 + $0x18] sm:$0xff]  ;;  %v51_v6 = vld [vmem:[%s7172_s1 + $0x20] sm:$0xff]  ;;  %v52_v7 = vld [vmem:[%s7172_s1 + $0x28] sm:$0xff] }
   0x3   :  { %v4029_v5 = vpack.c.bf16 %v50_v4, %v49_v2  ;;  %v15_v8 = vld [vmem:[%s7171_s0] sm:$0xff]  ;;  %v4033_v10 = vpack.c.bf16 %v52_v7, %v51_v6  ;;  %v53_v11 = vld [vmem:[%s7172_s1 + $0x30] sm:$0xff]  ;;  %v54_v12 = vld [vmem:[%s7172_s1 + $0x38] sm:$0xff] }
   0x4   :  { %4026 = vmatprep.subr.bf16.mxu0 %v4025_v3  ;;  %4041 = vmatprep.subr.bf16.mxu1 %v4025_v3  ;;  %v31_v9 = vld [vmem:[%s7171_s0 + $0x80] sm:$0xff]  ;;  %v4037_v13 = vpack.c.bf16 %v54_v12, %v53_v11 }
   0x5   :  { %4028 = vmatpush3.bf16.msra.mxu0 %v4025_v3  ;;  %4045 = vmatpush3.bf16.msra.mxu1 %v4025_v3 }
   0x6   :  { %4030 = vmatprep.subr.bf16.mxu0 %v4029_v5  ;;  %4042 = vmatprep.subr.bf16.mxu1 %v4029_v5 }
   0x7   :  { %3977 = vmatprep.mubr.msk.f32.mxu0 %vm62_vm0, %v15_v8  ;;  %4001 = vmatprep.mubr.msk.f32.mxu1 %vm62_vm0, %v31_v9 }
   0x9   :  { %4032 = vmatpush3.bf16.msra.mxu0 %v4029_v5  ;;  %4046 = vmatpush3.bf16.msra.mxu1 %v4029_v5 }
   0xa   :  { %4034 = vmatprep.subr.bf16.mxu0 %v4033_v10  ;;  %4043 = vmatprep.subr.bf16.mxu1 %v4033_v10 }
   0xd   :  { %4036 = vmatpush3.bf16.msra.mxu0 %v4033_v10  ;;  %4047 = vmatpush3.bf16.msra.mxu1 %v4033_v10 }
   0xe   :  { %4038 = vmatprep.subr.bf16.mxu0 %v4037_v13  ;;  %4044 = vmatprep.subr.bf16.mxu1 %v4037_v13 }
   0xf   :  { %8 = vsyncpa [#allocation3], 0  ;;  %v16_v14 = vld [vmem:[%s7171_s0 + $0x8] sm:$0xff]  ;;  %v17_v16 = vld [vmem:[%s7171_s0 + $0x10] sm:$0xff] }
  0x10   :  { %v32_v15 = vld [vmem:[%s7171_s0 + $0x88] sm:$0xff]  ;;  %v33_v17 = vld [vmem:[%s7171_s0 + $0x90] sm:$0xff]  ;;  %v18_v18 = vld [vmem:[%s7171_s0 + $0x18] sm:$0xff] }
  0x11   :  { %4040 = vmatpush3.bf16.msra.mxu0 %v4037_v13  ;;  %4048 = vmatpush3.bf16.msra.mxu1 %v4037_v13  ;;  %v34_v19 = vld [vmem:[%s7171_s0 + $0x98] sm:$0xff]  ;;  %v19_v20 = vld [vmem:[%s7171_s0 + $0x20] sm:$0xff]  ;;  %v20_v22 = vld [vmem:[%s7171_s0 + $0x28] sm:$0xff] }
  0x12   :  { %v35_v21 = vld [vmem:[%s7171_s0 + $0xa0] sm:$0xff]  ;;  %v36_v23 = vld [vmem:[%s7171_s0 + $0xa8] sm:$0xff]  ;;  %v21_v24 = vld [vmem:[%s7171_s0 + $0x30] sm:$0xff] }
  0x13   :  { %v37_v25 = vld [vmem:[%s7171_s0 + $0xb0] sm:$0xff]  ;;  %v22_v26 = vld [vmem:[%s7171_s0 + $0x38] sm:$0xff]  ;;  %v23_v28 = vld [vmem:[%s7171_s0 + $0x40] sm:$0xff] }
  0x14   :  { %3978 = vmatmul.mubr.msk.f32.vlgmr.msra.gmra.mrb[0].mxu0 %vm62_vm0, %v16_v14  ;;  %4002 = vmatmul.mubr.msk.f32.vlgmr.msra.gmra.mrb[0].mxu1 %vm62_vm0, %v32_v15  ;;  %v38_v27 = vld [vmem:[%s7171_s0 + $0xb8] sm:$0xff]  ;;  %v39_v29 = vld [vmem:[%s7171_s0 + $0xc0] sm:$0xff]  ;;  %v24_v30 = vld [vmem:[%s7171_s0 + $0x48] sm:$0xff] }
  0x15   :  { %3980 = vmatprep.mubr.msk.f32.mxu0 %vm62_vm0, %v17_v16  ;;  %4004 = vmatprep.mubr.msk.f32.mxu1 %vm62_vm0, %v33_v17  ;;  %v40_v31 = vld [vmem:[%s7171_s0 + $0xc8] sm:$0xff]  ;;  %v25_v32 = vld [vmem:[%s7171_s0 + $0x50] sm:$0xff]  ;;  %v26_v34 = vld [vmem:[%s7171_s0 + $0x58] sm:$0xff] }
  0x16   :  { %v41_v33 = vld [vmem:[%s7171_s0 + $0xd0] sm:$0xff]  ;;  %v42_v35 = vld [vmem:[%s7171_s0 + $0xd8] sm:$0xff]  ;;  %v27_v36 = vld [vmem:[%s7171_s0 + $0x60] sm:$0xff] }
  0x17   :  { %v43_v37 = vld [vmem:[%s7171_s0 + $0xe0] sm:$0xff]  ;;  %v28_v38 = vld [vmem:[%s7171_s0 + $0x68] sm:$0xff]  ;;  %v29_v40 = vld [vmem:[%s7171_s0 + $0x70] sm:$0xff] }
  0x18   :  { %3981 = vmatmul.mubr.msk.f32.gmra.mrb[2].mxu0 %vm62_vm0, %v18_v18  ;;  %4005 = vmatmul.mubr.msk.f32.gmra.mrb[2].mxu1 %vm62_vm0, %v34_v19  ;;  %v44_v39 = vld [vmem:[%s7171_s0 + $0xe8] sm:$0xff]  ;;  %v45_v41 = vld [vmem:[%s7171_s0 + $0xf0] sm:$0xff]  ;;  %v30_v42 = vld [vmem:[%s7171_s0 + $0x78] sm:$0xff] }
  0x19   :  { %3983 = vmatprep.mubr.msk.f32.mxu0 %vm62_vm0, %v19_v20  ;;  %4007 = vmatprep.mubr.msk.f32.mxu1 %vm62_vm0, %v35_v21  ;;  %v46_v43 = vld [vmem:[%s7171_s0 + $0xf8] sm:$0xff]  ;;  %v4527_v44 = vld [vmem:[%s7173_s2] ss:$0 sm:$0xff]  ;;  %v4343_v21 = vmov 683565275  }
  0x1c   :  { %3984 = vmatmul.mubr.msk.f32.gmra.mrb[4].mxu0 %vm62_vm0, %v20_v22  ;;  %4008 = vmatmul.mubr.msk.f32.gmra.mrb[4].mxu1 %vm62_vm0, %v36_v23 }
  0x1d   :  { %3986 = vmatprep.mubr.msk.f32.mxu0 %vm62_vm0, %v21_v24  ;;  %4010 = vmatprep.mubr.msk.f32.mxu1 %vm62_vm0, %v37_v25  ;;  %v4344_v25 = vmov 2475754826  }
  0x20   :  { %3987 = vmatmul.mubr.msk.f32.gmra.mrb[6].mxu0 %vm62_vm0, %v22_v26  ;;  %4011 = vmatmul.mubr.msk.f32.gmra.mrb[6].mxu1 %vm62_vm0, %v38_v27  ;;  %v4345_v27 = vmov 2131351028  }
  0x21   :  { %3989 = vmatprep.mubr.msk.f32.mxu0 %vm62_vm0, %v23_v28  ;;  %4013 = vmatprep.mubr.msk.f32.mxu1 %vm62_vm0, %v39_v29  ;;  %v4346_v29 = vmov 2102212464  }
  0x24   :  { %3990 = vmatmul.mubr.msk.f32.gmra.mrb[8].mxu0 %vm62_vm0, %v24_v30  ;;  %4014 = vmatmul.mubr.msk.f32.gmra.mrb[8].mxu1 %vm62_vm0, %v40_v31  ;;  %v4347_v31 = vmov 920167782  }
  0x25   :  { %3992 = vmatprep.mubr.msk.f32.mxu0 %vm62_vm0, %v25_v32  ;;  %4016 = vmatprep.mubr.msk.f32.mxu1 %vm62_vm0, %v41_v33 }
  0x28   :  { %3993 = vmatmul.mubr.msk.f32.gmra.mrb[10].mxu0 %vm62_vm0, %v26_v34  ;;  %4017 = vmatmul.mubr.msk.f32.gmra.mrb[10].mxu1 %vm62_vm0, %v42_v35 }
  0x29   :  { %3995 = vmatprep.mubr.msk.f32.mxu0 %vm62_vm0, %v27_v36  ;;  %4019 = vmatprep.mubr.msk.f32.mxu1 %vm62_vm0, %v43_v37 }
  0x2c   :  { %3996 = vmatmul.mubr.msk.f32.gmra.mrb[12].mxu0 %vm62_vm0, %v28_v38  ;;  %4020 = vmatmul.mubr.msk.f32.gmra.mrb[12].mxu1 %vm62_vm0, %v44_v39  ;;  %v4348_v38 = vmov 1326507024  }
  0x2d   :  { %3998 = vmatprep.mubr.msk.f32.mxu0 %vm62_vm0, %v29_v40  ;;  %4022 = vmatprep.mubr.msk.f32.mxu1 %vm62_vm0, %v45_v41 }
  0x30   :  { %3999 = vmatmul.mubr.msk.f32.gmra.mrb[14].mxu0 %vm62_vm0, %v30_v42  ;;  %4023 = vmatmul.mubr.msk.f32.gmra.mrb[14].mxu1 %vm62_vm0, %v46_v43 }
  0xe7   :  { %v3979_v45 = vpop.f32.mrb[0].mxu0  ;;  %v4003_v46 = vpop.f32.mrb[0].mxu1 }
  0xe8   :  { %v4530_v47 = vadd.f32 %v3979_v45, %v4527_v44  ;;  %v4533_v48 = vadd.f32 %v4003_v46, %v4527_v44  ;;  %v225_v49 = vpop.f32.mrb[1].mxu0  ;;  %v305_v50 = vpop.f32.mrb[1].mxu1 }
  0xe9   :  { %v4536_v51 = vadd.f32 %v4527_v44, %v225_v49  ;;  %v4554_v5 = vadd.f32 %v4527_v44, %v305_v50 }
  0xea   :  { %v488_v52 = vand.u32 2147483647, %v4530_v47  ;;  %v491_v53 = vand.u32 2139095040, %v4530_v47  ;;  %v2152_v54 = vand.u32 2147483647, %v4533_v48  ;;  %v2155_v55 = vand.u32 2139095040, %v4533_v48 }
  0xeb   :  { %v4542_v56 = vpop.f32.mrb[2].mxu0  ;;  %v4544_v57 = vpop.f32.mrb[2].mxu1  ;;  %v387_v62 = vand.u32 2139095040, %v4536_v51  ;;  %v384_v8 = vand.u32 2147483647, %v4536_v51  ;;  %v2051_v19 = vand.u32 2139095040, %v4554_v5 }
  0xec   :  { %v492_v58 = vshrl.u32 %v491_v53, 23  ;;  %v495_v59 = vand.u32 8388607, %v488_v52  ;;  %v2156_v60 = vshrl.u32 %v2155_v55, 23  ;;  %v2159_v61 = vand.u32 8388607, %v2152_v54 }
  0xed   :  { %v4551_v0 = vpop.f32.mrb[3].mxu0  ;;  %v388_v2 = vshrl.u32 %v387_v62, 23  ;;  %v4557_v10 = vpop.f32.mrb[3].mxu1  ;;  %v4565_v17 = vand.u32 8388607, %v384_v8  ;;  %vm490_vm14 = vcmp.lt.s32.totalorder %v4530_v47, 0 }
  0xee   :  { %v3797_v63 = vadd.s32 4294967169, %v492_v58  ;;  %v3861_v1 = vadd.s32 4294967169, %v2156_v60  ;;  %v496_v3 = vor.u32 8388608, %v495_v59  ;;  %v2160_v6 = vor.u32 8388608, %v2159_v61 }
  0xef   :  { %v3793_v9 = vadd.s32 4294967169, %v388_v2  ;;  %vm4657_vm15 = vcmp.le.f32.partialorder %v488_v52, 0.7853982 }
  0xf0   :  { %v498_v4 = vadd.s32 1, %v3797_v63  ;;  %v2162_v7 = vadd.s32 1, %v3861_v1  ;;  %v4559_v14 = vshll.u32 %v496_v3, 8  ;;  %v4561_v16 = vshll.u32 %v2160_v6, 8 }
  0xf1   :  { %v4567_v18 = vadd.s32 1, %v3793_v9 }
  0xf2   :  { %vm499_vm1 = vcmp.gt.s32.totalorder %v498_v4, 0  ;;  %vm2163_vm2 = vcmp.gt.s32.totalorder %v2162_v7, 0 }
  0xf3   :  { %v500_v11 = vsel %vm499_vm1, %v498_v4, 0  ;;  %v2164_v15 = vsel %vm2163_vm2, %v2162_v7, 0  ;;  %vm395_vm7 = vcmp.gt.s32.totalorder %v4567_v18, 0 }
  0xf4   :  { %v501_v12 = vshrl.u32 %v500_v11, 5  ;;  %v502_v13 = vand.u32 31, %v500_v11  ;;  %v4571_v23 = vshrl.u32 %v2164_v15, 5  ;;  %v2166_v24 = vand.u32 31, %v2164_v15 }
  0xf6   :  { %v503_v20 = vsub.s32 32, %v502_v13  ;;  %v505_v22 = vshll.u32 %v4343_v21, %v502_v13  ;;  %v508_v26 = vshll.u32 %v4344_v25, %v502_v13  ;;  %v511_v28 = vshll.u32 %v4345_v27, %v502_v13 }
  0xf7   :  { %v514_v30 = vshll.u32 %v4346_v29, %v502_v13  ;;  %v517_v32 = vshll.u32 %v4347_v31, %v502_v13  ;;  %vm520_vm3 = vcmp.lt.s32.totalorder %v501_v12, 1  ;;  %vm521_vm4 = vcmp.lt.s32.totalorder %v501_v12, 2 }
  0xf8   :  { %v506_v33 = vshrl.u32 %v4344_v25, %v503_v20  ;;  %v509_v34 = vshrl.u32 %v4345_v27, %v503_v20  ;;  %v512_v35 = vshrl.u32 %v4346_v29, %v503_v20  ;;  %v504_v36 = vshrl.u32 %v4343_v21, %v503_v20 }
  0xf9   :  { %v515_v37 = vshrl.u32 %v4347_v31, %v503_v20  ;;  %v518_v39 = vshrl.u32 %v4348_v38, %v503_v20  ;;  %v2167_v43 = vsub.s32 32, %v2166_v24  ;;  %vm522_vm5 = vcmp.lt.s32.totalorder %v501_v12, 3 }
  0xfa   :  { %v507_v40 = vor.u32 %v506_v33, %v505_v22  ;;  %v510_v41 = vor.u32 %v509_v34, %v508_v26  ;;  %v513_v42 = vor.u32 %v512_v35, %v511_v28  ;;  %vm523_vm6 = vcmp.lt.s32.totalorder %v501_v12, 4 }
  0xfb   :  { %v516_v45 = vor.u32 %v515_v37, %v514_v30  ;;  %v519_v46 = vor.u32 %v518_v39, %v517_v32  ;;  %v2169_v61 = vshll.u32 %v4343_v21, %v2166_v24  ;;  %v2170_v1 = vshrl.u32 %v4344_v25, %v2167_v43 }
  0xfc   :  { %v524_v49 = vsel %vm520_vm3, %v504_v36, %v507_v40  ;;  %v525_v50 = vsel %vm523_vm6, %v513_v42, 2102212464  ;;  %v528_v53 = vsel %vm520_vm3, %v507_v40, %v510_v41  ;;  %v532_v55 = vsel %vm520_vm3, %v510_v41, %v513_v42 }
  0xfd   :  { %v526_v58 = vsel %vm522_vm5, %v510_v41, %v525_v50  ;;  %v529_v59 = vsel %vm523_vm6, %v516_v45, 920167782  ;;  %v533_v60 = vsel %vm523_vm6, %v519_v46, 1326507024  ;;  %v2172_v2 = vshll.u32 %v4344_v25, %v2166_v24 }
  0xfe   :  { %v530_v62 = vsel %vm522_vm5, %v513_v42, %v529_v59  ;;  %v534_v63 = vsel %vm522_vm5, %v516_v45, %v533_v60  ;;  %v527_v3 = vsel %vm521_vm4, %v524_v49, %v526_v58  ;;  %v2173_v7 = vshrl.u32 %v4345_v27, %v2167_v43 }
  0xff   :  { %v531_v4 = vsel %vm521_vm4, %v528_v53, %v530_v62  ;;  %v535_v6 = vsel %vm521_vm4, %v532_v55, %v534_v63  ;;  %v2171_v20 = vor.u32 %v2170_v1, %v2169_v61  ;;  %v2175_v26 = vshll.u32 %v4345_v27, %v2166_v24 }
 0x100   :  { %v4595_v9 = vmul.u32.u64.low %v4559_v14, %v535_v6  ;;  %v4596_v11 = vmul.u32.u64.high %v4559_v14, %v535_v6, %v4595_v9  ;;  %v4599_v13 = vmul.u32.u64.low %v4559_v14, %v531_v4  ;;  %v4600_v15 = vmul.u32.u64.high %v4559_v14, %v531_v4, %v4599_v13 }
 0x101   :  { %v2174_v22 = vor.u32 %v2173_v7, %v2172_v2  ;;  %v2176_v28 = vshrl.u32 %v4346_v29, %v2167_v43  ;;  %v2168_v30 = vshrl.u32 %v4343_v21, %v2167_v43  ;;  %v2178_v12 = vshll.u32 %v4346_v29, %v2166_v24 }
 0x102   :  { %v2179_v32 = vshrl.u32 %v4347_v31, %v2167_v43  ;;  %v2182_v33 = vshrl.u32 %v4348_v38, %v2167_v43  ;;  %v543_v34 = vmul.u32 %v4559_v14, %v527_v3  ;;  %v2181_v36 = vshll.u32 %v4347_v31, %v2166_v24 }
 0x103   :  { %v2177_v35 = vor.u32 %v2176_v28, %v2175_v26  ;;  %vm2184_vm8 = vcmp.lt.s32.totalorder %v4571_v23, 1  ;;  %vm545_vm9 = vc.u32 %v4596_v11, %v4599_v13  ;;  %v546_v37 = vadd.s32 1, %v4600_v15  ;;  %v4640_v26 = vpop.f32.mrb[4].mxu0 }
 0x104   :  { %v2180_v39 = vor.u32 %v2179_v32, %v2178_v12  ;;  %vm2185_vm10 = vcmp.lt.s32.totalorder %v4571_v23, 2  ;;  %v2183_v40 = vor.u32 %v2182_v33, %v2181_v36  ;;  %vm2186_vm11 = vcmp.lt.s32.totalorder %v4571_v23, 3 }
 0x105   :  { %vm2187_vm12 = vcmp.lt.s32.totalorder %v4571_v23, 4  ;;  %v2192_v41 = vsel %vm2184_vm8, %v2171_v20, %v2174_v22  ;;  %v547_v14 = vsel %vm545_vm9, %v546_v37, %v4600_v15  ;;  %v2196_v24 = vsel %vm2184_vm8, %v2174_v22, %v2177_v35 }
 0x106   :  { %v2189_v42 = vsel %vm2187_vm12, %v2177_v35, 2102212464  ;;  %v2193_v43 = vsel %vm2187_vm12, %v2180_v39, 920167782  ;;  %v548_v45 = vadd.s32 %v547_v14, %v543_v34  ;;  %v2188_v46 = vsel %vm2184_vm8, %v2168_v30, %v2171_v20 }
 0x107   :  { %v2194_v49 = vsel %vm2186_vm11, %v2177_v35, %v2193_v43  ;;  %v2197_v50 = vsel %vm2187_vm12, %v2183_v40, 1326507024  ;;  %v2190_v53 = vsel %vm2186_vm11, %v2174_v22, %v2189_v42  ;;  %v396_v59 = vsel %vm395_vm7, %v4567_v18, 0 }
 0x108   :  { %v2195_v55 = vsel %vm2185_vm10, %v2192_v41, %v2194_v49  ;;  %v2198_v58 = vsel %vm2186_vm11, %v2180_v39, %v2197_v50  ;;  %v549_v60 = vadd.s32 536870912, %v548_v45  ;;  %v2048_v3 = vand.u32 2147483647, %v4554_v5 }
 0x109   :  { %v2199_v61 = vsel %vm2185_vm10, %v2196_v24, %v2198_v58  ;;  %v4625_v62 = vmul.u32.u64.low %v4561_v16, %v2195_v55  ;;  %v4626_v63 = vmul.u32.u64.high %v4561_v16, %v2195_v55, %v4625_v62  ;;  %v2191_v6 = vsel %vm2185_vm10, %v2188_v46, %v2190_v53 }
 0x10a   :  { %v4630_v1 = vmul.u32.u64.low %v4561_v16, %v2199_v61  ;;  %v4631_v2 = vmul.u32.u64.high %v4561_v16, %v2199_v61, %v4630_v1  ;;  %v550_v4 = vshrl.u32 %v549_v60, 30  ;;  %v392_v18 = vor.u32 8388608, %v4565_v17 }
 0x10b   :  { %v398_v7 = vand.u32 31, %v396_v59  ;;  %v2210_v15 = vadd.s32 1, %v4626_v63  ;;  %v2052_v22 = vshrl.u32 %v2051_v19, 23  ;;  %v2207_v28 = vmul.u32 %v4561_v16, %v2191_v6 }
 0x10c   :  { %v551_v9 = vshll.u32 %v550_v4, 30  ;;  %vm2209_vm13 = vc.u32 %v4631_v2, %v4625_v62  ;;  %v4647_v23 = vand.u32 8388607, %v2048_v3  ;;  %v4653_v12 = vshll.u32 %v392_v18, 8 }
 0x10d   :  { %v399_v20 = vsub.s32 32, %v398_v7  ;;  %v2211_v30 = vsel %vm2209_vm13, %v2210_v15, %v4626_v63  ;;  %v544_v16 = vadd.s32 %v4599_v13, %v4596_v11  ;;  %v4662_v33 = vshrl.u32 %v396_v59, 5 }
 0x10e   :  { %v4650_v17 = vsub.s32 %v548_v45, %v551_v9  ;;  %v2212_v32 = vadd.s32 %v2211_v30, %v2207_v28  ;;  %v3857_v39 = vadd.s32 4294967169, %v2052_v22  ;;  %v574_v40 = vsub.s32 4, %v550_v4 }
 0x10f   :  { %v402_v34 = vshrl.u32 %v4344_v25, %v399_v20  ;;  %v405_v36 = vshrl.u32 %v4345_v27, %v399_v20  ;;  %v408_v37 = vshrl.u32 %v4346_v29, %v399_v20  ;;  %v401_v52 = vshll.u32 %v4343_v21, %v398_v7 }
 0x110   :  { %v554_v35 = vsub.s32 0, %v4650_v17  ;;  %v2213_v41 = vadd.s32 536870912, %v2212_v32  ;;  %v2056_v14 = vor.u32 8388608, %v4647_v23  ;;  %v404_v13 = vshll.u32 %v4344_v25, %v398_v7 }
 0x111   :  { %v407_v42 = vshll.u32 %v4345_v27, %v398_v7  ;;  %v411_v43 = vshrl.u32 %v4347_v31, %v399_v20  ;;  %v403_v45 = vor.u32 %v402_v34, %v401_v52  ;;  %v410_v46 = vshll.u32 %v4346_v29, %v398_v7 }
 0x112   :  { %v3798_v11 = vmin.u32 %v554_v35, %v4650_v17  ;;  %v2214_v24 = vshrl.u32 %v2213_v41, 30  ;;  %v414_v49 = vshrl.u32 %v4348_v38, %v399_v20  ;;  %v406_v53 = vor.u32 %v405_v36, %v404_v13 }
 0x113   :  { %v409_v55 = vor.u32 %v408_v37, %v407_v42  ;;  %v413_v58 = vshll.u32 %v4347_v31, %v398_v7  ;;  %v575_v59 = vsel %vm490_vm14, %v574_v40, %v550_v4  ;;  %v412_v61 = vor.u32 %v411_v43, %v410_v46 }
 0x114   :  { %v556_v50 = vclz %v3798_v11  ;;  %v2215_v60 = vshll.u32 %v2214_v24, 30  ;;  %vm416_vm0 = vcmp.lt.s32.totalorder %v4662_v33, 1  ;;  %vm417_vm1 = vcmp.lt.s32.totalorder %v4662_v33, 2 }
 0x115   :  { %v415_v1 = vor.u32 %v414_v49, %v413_v58  ;;  %vm419_vm2 = vcmp.lt.s32.totalorder %v4662_v33, 4  ;;  %vm2154_vm3 = vcmp.lt.s32.totalorder %v4533_v48, 0  ;;  %v400_v18 = vshrl.u32 %v4343_v21, %v399_v20 }
 0x116   :  { %v3799_v63 = vadd.s32 4294967294, %v556_v50  ;;  %v4683_v6 = vsub.s32 %v2212_v32, %v2215_v60  ;;  %vm418_vm4 = vcmp.lt.s32.totalorder %v4662_v33, 3  ;;  %v425_v4 = vsel %vm419_vm2, %v412_v61, 920167782 }
 0x117   :  { %v577_v7 = vsel %vm4657_vm15, 0, %v575_v59  ;;  %v424_v9 = vsel %vm416_vm0, %v403_v45, %v406_v53  ;;  %v426_v15 = vsel %vm418_vm4, %v409_v55, %v425_v4  ;;  %v2238_v30 = vsub.s32 4, %v2214_v24 }
 0x118   :  { %vm3800_vm5 = vcmp.lt.s32.totalorder %v3799_v63, 0  ;;  %v2218_v28 = vsub.s32 0, %v4683_v6  ;;  %v428_v20 = vsel %vm416_vm0, %v406_v53, %v409_v55  ;;  %vm4700_vm6 = vcmp.le.f32.partialorder %v2152_v54, 0.7853982 }
 0x119   :  { %v559_v22 = vsel %vm3800_vm5, 0, %v3799_v63  ;;  %v421_v36 = vsel %vm419_vm2, %v409_v55, 2102212464  ;;  %v429_v37 = vsel %vm419_vm2, %v415_v1, 1326507024  ;;  %v427_v52 = vsel %vm417_vm1, %v424_v9, %v426_v15  ;;  %v4720_v55 = vpop.f32.mrb[4].mxu1 }
 0x11a   :  { %v560_v32 = vsub.s32 32, %v559_v22  ;;  %v564_v34 = vsub.s32 4294967266, %v559_v22  ;;  %v561_v40 = vshll.u32 %v4650_v17, %v559_v22  ;;  %v3862_v41 = vmin.u32 %v2218_v28, %v4683_v6 }
 0x11b   :  { %v430_v11 = vsel %vm418_vm4, %v412_v61, %v429_v37  ;;  %v2058_v43 = vadd.s32 1, %v3857_v39  ;;  %v581_v46 = vadd.s32 3, %v577_v7  ;;  %v420_v50 = vsel %vm416_vm0, %v400_v18, %v403_v45 }
 0x11c   :  { %v562_v54 = vshrl.u32 %v544_v16, %v560_v32  ;;  %v565_v13 = vadd.s32 127, %v564_v34  ;;  %v431_v42 = vsel %vm417_vm1, %v428_v20, %v430_v11  ;;  %v2220_v49 = vclz %v3862_v41 }
 0x11d   :  { %v422_v17 = vsel %vm418_vm4, %v406_v53, %v421_v36  ;;  %v4723_v60 = vmul.u32.u64.low %v4653_v12, %v431_v42  ;;  %v4724_v16 = vmul.u32.u64.high %v4653_v12, %v431_v42, %v4723_v60  ;;  %vm2059_vm7 = vcmp.gt.s32.totalorder %v2058_v43, 0 }
 0x11e   :  { %v563_v58 = vor.u32 %v562_v54, %v561_v40  ;;  %v566_v59 = vshll.u32 %v565_v13, 23  ;;  %v3863_v61 = vadd.s32 4294967294, %v2220_v49  ;;  %v2208_v45 = vadd.s32 %v4625_v62, %v4631_v2 }
 0x11f   :  { %v4727_v63 = vmul.u32.u64.low %v4653_v12, %v427_v52  ;;  %v4728_v39 = vmul.u32.u64.high %v4653_v12, %v427_v52, %v4727_v63  ;;  %v2239_v53 = vsel %vm2154_vm3, %v2238_v30, %v2214_v24  ;;  %v2060_v18 = vsel %vm2059_vm7, %v2058_v43, 0 }
 0x120   :  { %v567_v1 = vor.u32 4788187, %v566_v59  ;;  %v4735_v4 = vand.u32 3, %v581_v46  ;;  %vm3864_vm8 = vcmp.lt.s32.totalorder %v3863_v61, 0  ;;  %v423_v7 = vsel %vm417_vm1, %v420_v50, %v422_v17 }
 0x121   :  { %v2062_v9 = vand.u32 31, %v2060_v18  ;;  %v570_v22 = vcvt.s32.f32 %v563_v58  ;;  %v2223_v28 = vsel %vm3864_vm8, 0, %v3863_v61  ;;  %vm441_vm9 = vc.u32 %v4724_v16, %v4727_v63 }
 0x122   :  { %v568_v15 = vand.u32 2147483647, %v567_v1  ;;  %v2224_v20 = vsub.s32 32, %v2223_v28  ;;  %v2228_v32 = vsub.s32 4294967266, %v2223_v28  ;;  %v2241_v62 = vsel %vm4700_vm6, 0, %v2239_v53 }
 0x123   :  { %v442_v2 = vadd.s32 1, %v4728_v39  ;;  %v439_v30 = vmul.u32 %v4653_v12, %v423_v7  ;;  %v4745_v34 = vshrl.u32 %v2060_v18, 5  ;;  %v2063_v33 = vsub.s32 32, %v2062_v9 }
 0x124   :  { %v571_v24 = vmul.f32 %v570_v22, %v568_v15  ;;  %v2225_v36 = vshll.u32 %v4683_v6, %v2223_v28  ;;  %v2226_v37 = vshrl.u32 %v2208_v45, %v2224_v20  ;;  %v2229_v40 = vadd.s32 127, %v2228_v32 }
 0x125   :  { %v443_v41 = vsel %vm441_vm9, %v442_v2, %v4728_v39  ;;  %v2065_v54 = vshll.u32 %v4343_v21, %v2062_v9  ;;  %v2066_v13 = vshrl.u32 %v4344_v25, %v2063_v33  ;;  %v2068_v46 = vshll.u32 %v4344_v25, %v2062_v9 }
 0x126   :  { %v572_v52 = vxor.u32 2147483648, %v571_v24  ;;  %v444_v11 = vadd.s32 %v443_v41, %v439_v30  ;;  %v2227_v42 = vor.u32 %v2226_v37, %v2225_v36  ;;  %v2230_v43 = vshll.u32 %v2229_v40, 23 }
 0x127   :  { %v2069_v12 = vshrl.u32 %v4345_v27, %v2063_v33  ;;  %v2071_v50 = vshll.u32 %v4345_v27, %v2062_v9  ;;  %v2072_v17 = vshrl.u32 %v4346_v29, %v2063_v33  ;;  %v2067_v60 = vor.u32 %v2066_v13, %v2065_v54 }
 0x128   :  { %v573_v49 = vsel %vm490_vm14, %v572_v52, %v571_v24  ;;  %v445_v6 = vadd.s32 536870912, %v444_v11  ;;  %v2231_v59 = vor.u32 4788187, %v2230_v43  ;;  %v2074_v61 = vshll.u32 %v4346_v29, %v2062_v9 }
 0x129   :  { %v576_v58 = vsel %vm4657_vm15, %v4530_v47, %v573_v49  ;;  %v2234_v39 = vcvt.s32.f32 %v2227_v42  ;;  %v2075_v45 = vshrl.u32 %v4347_v31, %v2063_v33  ;;  %v2070_v18 = vor.u32 %v2069_v12, %v2068_v46 }
 0x12a   :  { %4186 = vcosq.f32 %v576_v58  ;;  %v4761_v1 = vshrl.u32 %v445_v6, 30  ;;  %v2232_v53 = vand.u32 2147483647, %v2231_v59  ;;  %v2078_v7 = vshrl.u32 %v4348_v38, %v2063_v33 }
 0x12b   :  { %4188 = vsinq.f32 %v576_v58  ;;  %v2076_v22 = vor.u32 %v2075_v45, %v2074_v61  ;;  %v2073_v28 = vor.u32 %v2072_v17, %v2071_v50  ;;  %v2077_v20 = vshll.u32 %v4347_v31, %v2062_v9 }
 0x12c   :  { %v447_v15 = vshll.u32 %v4761_v1, 30  ;;  %v2235_v19 = vmul.f32 %v2234_v39, %v2232_v53  ;;  %v2245_v32 = vadd.s32 3, %v2241_v62  ;;  %vm2080_vm10 = vcmp.lt.s32.totalorder %v4745_v34, 1 }
 0x12d   :  { %v4772_v24 = vshll.u32 %v2056_v14, 8  ;;  %vm584_vm11 = vcmp.eq.s32.totalorder %v4735_v4, 0  ;;  %v2079_v36 = vor.u32 %v2078_v7, %v2077_v20  ;;  %vm2083_vm12 = vcmp.lt.s32.totalorder %v4745_v34, 4 }
 0x12e   :  { %v4767_v2 = vsub.s32 %v444_v11, %v447_v15  ;;  %v2236_v30 = vxor.u32 2147483648, %v2235_v19  ;;  %v2088_v37 = vsel %vm2080_vm10, %v2067_v60, %v2070_v18  ;;  %vm583_vm13 = vcmp.lt.s32.totalorder %v4735_v4, 2 }
 0x12f   :  { %v2064_v62 = vshrl.u32 %v4343_v21, %v2063_v33  ;;  %vm2082_vm14 = vcmp.lt.s32.totalorder %v4745_v34, 3  ;;  %v2089_v23 = vsel %vm2083_vm12, %v2076_v22, 920167782  ;;  %vm580_vm15 = vweird.f32 %v4530_v47 }
 0x130   :  { %v450_v9 = vsub.s32 0, %v4767_v2  ;;  %v2237_v14 = vsel %vm2154_vm3, %v2236_v30, %v2235_v19  ;;  %vm386_vm0 = vcmp.lt.s32.totalorder %v4536_v51, 0  ;;  %vm2081_vm1 = vcmp.lt.s32.totalorder %v4745_v34, 2 }
 0x131   :  { %v2085_v40 = vsel %vm2083_vm12, %v2073_v28, 2102212464  ;;  %v2090_v33 = vsel %vm2082_vm14, %v2073_v28, %v2089_v23  ;;  %v2240_v41 = vsel %vm4700_vm6, %v4533_v48, %v2237_v14  ;;  %v2092_v54 = vsel %vm2080_vm10, %v2070_v18, %v2073_v28  ;;  %v4848_v14 = vpop.f32.mrb[5].mxu0 }
 0x132   :  { %v3794_v52 = vmin.u32 %v450_v9, %v4767_v2  ;;  %v2091_v11 = vsel %vm2081_vm1, %v2088_v37, %v2090_v33  ;;  %4190 = vcosq.f32 %v2240_v41  ;;  %v2093_v13 = vsel %vm2083_vm12, %v2079_v36, 1326507024 }
 0x133   :  { %v4804_v42 = vmul.u32.u64.low %v4772_v24, %v2091_v11  ;;  %v4805_v43 = vmul.u32.u64.high %v4772_v24, %v2091_v11, %v4804_v42  ;;  %vm587_vm2 = vcmp.eq.s32.totalorder %v4735_v4, 2  ;;  %4192 = vsinq.f32 %v2240_v41 }
 0x134   :  { %v4187_v46 = vpop.eup %4186  ;;  %v452_v35 = vclz %v3794_v52  ;;  %v470_v12 = vsub.s32 4, %v4761_v1  ;;  %v2084_v50 = vsel %vm2080_vm10, %v2064_v62, %v2067_v60  ;;  %v2086_v17 = vsel %vm2082_vm14, %v2070_v18, %v2085_v40 }
 0x135   :  { %v4189_v49 = vpop.eup %4188  ;;  %v588_v6 = vxor.u32 2147483648, %v4187_v46  ;;  %v2094_v58 = vsel %vm2082_vm14, %v2076_v22, %v2093_v13  ;;  %v4820_v45 = vadd.f32 %v4542_v56, %v4527_v44  ;;  %v2246_v7 = vand.u32 3, %v2245_v32 }
 0x136   :  { %v585_v59 = vxor.u32 2147483648, %v4189_v49  ;;  %v3795_v61 = vadd.s32 4294967294, %v452_v35  ;;  %v2095_v39 = vsel %vm2081_vm1, %v2092_v54, %v2094_v58  ;;  %v2087_v22 = vsel %vm2081_vm1, %v2084_v50, %v2086_v17 }
 0x137   :  { %v589_v53 = vsel %vm587_vm2, %v588_v6, %v4189_v49  ;;  %v4823_v15 = vmul.u32.u64.low %v4772_v24, %v2095_v39  ;;  %v4824_v60 = vmul.u32.u64.high %v4772_v24, %v2095_v39, %v4823_v15  ;;  %v2106_v19 = vadd.s32 1, %v4805_v43 }
 0x138   :  { %v586_v18 = vsel %vm584_vm11, %v4187_v46, %v585_v59  ;;  %vm3796_vm3 = vcmp.lt.s32.totalorder %v3795_v61, 0  ;;  %v440_v56 = vadd.s32 %v4727_v63, %v4724_v16  ;;  %v699_v32 = vand.u32 2139095040, %v4820_v45 }
 0x139   :  { %v590_v28 = vsel %vm583_vm13, %v586_v18, %v589_v53  ;;  %v455_v20 = vsel %vm3796_vm3, 0, %v3795_v61  ;;  %vm2244_vm4 = vweird.f32 %v4533_v48  ;;  %v471_v34 = vsel %vm386_vm0, %v470_v12, %v4761_v1 }
 0x13a   :  { %v591_v30 = vsel %vm580_vm15, nan, %v590_v28  ;;  %v456_v36 = vsub.s32 32, %v455_v20  ;;  %v460_v37 = vsub.s32 4294967266, %v455_v20  ;;  %v2103_v4 = vmul.u32 %v4772_v24, %v2087_v22 }
 0x13b   :  { %3713 = vst [vmem:[#allocation2 + $0x8] sm:$0xff] %v591_v30  ;;  %vm2105_vm5 = vc.u32 %v4824_v60, %v4804_v42  ;;  %v696_v16 = vand.u32 2147483647, %v4820_v45  ;;  %v700_v63 = vshrl.u32 %v699_v32, 23  ;;  %v457_v47 = vshll.u32 %v4767_v2, %v455_v20 }
 0x13c   :  { %v458_v9 = vshrl.u32 %v440_v56, %v456_v36  ;;  %v461_v62 = vadd.s32 127, %v460_v37  ;;  %v2107_v23 = vsel %vm2105_vm5, %v2106_v19, %v4805_v43  ;;  %v4191_v40 = vpop.eup %4190  ;;  %vm2251_vm6 = vcmp.eq.s32.totalorder %v2246_v7, 2 }
 0x13d   :  { %vm4852_vm7 = vcmp.le.f32.partialorder %v384_v8, 0.7853982  ;;  %v2108_v24 = vadd.s32 %v2107_v23, %v2103_v4  ;;  %v3805_v33 = vadd.s32 4294967169, %v700_v63  ;;  %v4193_v41 = vpop.eup %4192  ;;  %v2252_v52 = vxor.u32 2147483648, %v4191_v40 }
 0x13e   :  { %v459_v11 = vor.u32 %v458_v9, %v457_v47  ;;  %v462_v2 = vshll.u32 %v461_v62, 23  ;;  %v473_v54 = vsel %vm4852_vm7, 0, %v471_v34  ;;  %v2249_v13 = vxor.u32 2147483648, %v4193_v41 }
 0x13f   :  { %v2109_v43 = vadd.s32 536870912, %v2108_v24  ;;  %v703_v46 = vand.u32 8388607, %v696_v16  ;;  %v706_v35 = vadd.s32 1, %v3805_v33  ;;  %vm2247_vm8 = vcmp.lt.s32.totalorder %v2246_v7, 2 }
 0x140   :  { %vm2248_vm9 = vcmp.eq.s32.totalorder %v2246_v7, 0  ;;  %v2253_v8 = vsel %vm2251_vm6, %v2252_v52, %v4193_v41  ;;  %v463_v12 = vor.u32 4788187, %v462_v2  ;;  %v477_v6 = vadd.s32 3, %v473_v54 }
 0x141   :  { %v2250_v49 = vsel %vm2248_vm9, %v4191_v40, %v2249_v13  ;;  %v4860_v50 = vshrl.u32 %v2109_v43, 30  ;;  %vm707_vm10 = vcmp.gt.s32.totalorder %v706_v35, 0  ;;  %v466_v59 = vcvt.s32.f32 %v459_v11 }
 0x142   :  { %v2254_v17 = vsel %vm2247_vm8, %v2250_v49, %v2253_v8  ;;  %v464_v58 = vand.u32 2147483647, %v463_v12  ;;  %v708_v61 = vsel %vm707_vm10, %v706_v35, 0  ;;  %v704_v15 = vor.u32 8388608, %v703_v46  ;;  %v4914_v8 = vpop.f32.mrb[5].mxu1 }
 0x143   :  { %v2255_v39 = vsel %vm2244_vm4, nan, %v2254_v17  ;;  %v2111_v53 = vshll.u32 %v4860_v50, 30  ;;  %v710_v7 = vand.u32 31, %v708_v61  ;;  %v4865_v22 = vand.u32 3, %v477_v6 }
 0x144   :  { %3729 = vst [vmem:[#allocation2 + $0x88] sm:$0xff] %v2255_v39  ;;  %v467_v18 = vmul.f32 %v466_v59, %v464_v58  ;;  %v2104_v56 = vadd.s32 %v4804_v42, %v4824_v60  ;;  %v4873_v32 = vadd.f32 %v4544_v57, %v4527_v44  ;;  %v4876_v30 = vshrl.u32 %v708_v61, 5 }
 0x145   :  { %v4867_v19 = vsub.s32 %v2108_v24, %v2111_v53  ;;  %v711_v20 = vsub.s32 32, %v710_v7  ;;  %v4878_v36 = vshll.u32 %v704_v15, 8  ;;  %v4882_v37 = vadd.f32 %v4527_v44, %v4551_v0 }
 0x146   :  { %v468_v28 = vxor.u32 2147483648, %v467_v18  ;;  %v713_v42 = vshll.u32 %v4343_v21, %v710_v7  ;;  %v716_v47 = vshll.u32 %v4344_v25, %v710_v7  ;;  %v2134_v0 = vsub.s32 4, %v4860_v50 }
 0x147   :  { %v2114_v48 = vsub.s32 0, %v4867_v19  ;;  %v714_v60 = vshrl.u32 %v4344_v25, %v711_v20  ;;  %v717_v57 = vshrl.u32 %v4345_v27, %v711_v20  ;;  %v720_v44 = vshrl.u32 %v4346_v29, %v711_v20 }
 0x148   :  { %v469_v34 = vsel %vm386_vm0, %v468_v28, %v467_v18  ;;  %v719_v9 = vshll.u32 %v4345_v27, %v710_v7  ;;  %v2363_v62 = vand.u32 2139095040, %v4873_v32  ;;  %v722_v1 = vshll.u32 %v4346_v29, %v710_v7 }
 0x149   :  { %v472_v4 = vsel %vm4852_vm7, %v4536_v51, %v469_v34  ;;  %v3858_v63 = vmin.u32 %v2114_v48, %v4867_v19  ;;  %v715_v40 = vor.u32 %v714_v60, %v713_v42  ;;  %v718_v24 = vor.u32 %v717_v57, %v716_v47 }
 0x14a   :  { %4194 = vcosq.f32 %v472_v4  ;;  %v721_v33 = vor.u32 %v720_v44, %v719_v9  ;;  %v723_v41 = vshrl.u32 %v4347_v31, %v711_v20  ;;  %vm728_vm11 = vcmp.lt.s32.totalorder %v4876_v30, 1 }
 0x14b   :  { %4196 = vsinq.f32 %v472_v4  ;;  %v2116_v23 = vclz %v3858_v63  ;;  %v725_v11 = vshll.u32 %v4347_v31, %v710_v7  ;;  %v726_v2 = vshrl.u32 %v4348_v38, %v711_v20 }
 0x14c   :  { %vm729_vm12 = vcmp.lt.s32.totalorder %v4876_v30, 2  ;;  %vm483_vm13 = vcmp.eq.s32.totalorder %v4865_v22, 2  ;;  %v712_v54 = vshrl.u32 %v4343_v21, %v711_v20  ;;  %v724_v13 = vor.u32 %v723_v41, %v722_v1 }
 0x14d   :  { %v3859_v52 = vadd.s32 4294967294, %v2116_v23  ;;  %vm730_vm14 = vcmp.lt.s32.totalorder %v4876_v30, 3  ;;  %vm731_vm15 = vcmp.lt.s32.totalorder %v4876_v30, 4  ;;  %vm480_vm0 = vcmp.eq.s32.totalorder %v4865_v22, 0 }
 0x14e   :  { %vm2050_vm1 = vcmp.lt.s32.totalorder %v4554_v5, 0  ;;  %v727_v43 = vor.u32 %v726_v2, %v725_v11  ;;  %v733_v46 = vsel %vm731_vm15, %v721_v33, 2102212464  ;;  %v736_v35 = vsel %vm728_vm11, %v715_v40, %v718_v24 }
 0x14f   :  { %vm3860_vm2 = vcmp.lt.s32.totalorder %v3859_v52, 0  ;;  %vm479_vm3 = vcmp.lt.s32.totalorder %v4865_v22, 2  ;;  %v732_v49 = vsel %vm728_vm11, %v712_v54, %v715_v40  ;;  %v737_v6 = vsel %vm731_vm15, %v724_v13, 920167782 }
 0x150   :  { %v2119_v12 = vsel %vm3860_vm2, 0, %v3859_v52  ;;  %v2364_v17 = vshrl.u32 %v2363_v62, 23  ;;  %vm476_vm4 = vweird.f32 %v4536_v51  ;;  %v738_v61 = vsel %vm730_vm14, %v721_v33, %v737_v6 }
 0x151   :  { %v2120_v58 = vsub.s32 32, %v2119_v12  ;;  %v2124_v59 = vsub.s32 4294967266, %v2119_v12  ;;  %v740_v39 = vsel %vm728_vm11, %v718_v24, %v721_v33  ;;  %vm4928_vm5 = vcmp.le.f32.partialorder %v2048_v3, 0.7853982 }
 0x152   :  { %v734_v15 = vsel %vm730_vm14, %v718_v24, %v733_v46  ;;  %v739_v18 = vsel %vm729_vm12, %v736_v35, %v738_v61  ;;  %v741_v7 = vsel %vm731_vm15, %v727_v43, 1326507024  ;;  %v3869_v28 = vadd.s32 4294967169, %v2364_v17 }
 0x153   :  { %v2121_v20 = vshll.u32 %v4867_v19, %v2119_v12  ;;  %v2122_v48 = vshrl.u32 %v2104_v56, %v2120_v58  ;;  %v2125_v34 = vadd.s32 127, %v2124_v59  ;;  %v742_v3 = vsel %vm730_vm14, %v724_v13, %v741_v7 }
 0x154   :  { %v4195_v42 = vpop.eup %4194  ;;  %v743_v60 = vsel %vm729_vm12, %v740_v39, %v742_v3  ;;  %v4944_v57 = vmul.u32.u64.low %v4878_v36, %v739_v18  ;;  %v4945_v4 = vmul.u32.u64.high %v4878_v36, %v739_v18, %v4944_v57  ;;  %v2370_v63 = vadd.s32 1, %v3869_v28 }
 0x155   :  { %v4197_v47 = vpop.eup %4196  ;;  %v484_v44 = vxor.u32 2147483648, %v4195_v42  ;;  %v2123_v9 = vor.u32 %v2122_v48, %v2121_v20  ;;  %v2126_v62 = vshll.u32 %v2125_v34, 23  ;;  %v2360_v19 = vand.u32 2147483647, %v4873_v32 }
 0x156   :  { %v481_v56 = vxor.u32 2147483648, %v4197_v47  ;;  %v4950_v23 = vmul.u32.u64.low %v4878_v36, %v743_v60  ;;  %v4951_v40 = vmul.u32.u64.high %v4878_v36, %v743_v60, %v4950_v23  ;;  %vm2371_vm6 = vcmp.gt.s32.totalorder %v2370_v63, 0 }
 0x157   :  { %v485_v24 = vsel %vm483_vm13, %v484_v44, %v4197_v47  ;;  %v2127_v33 = vor.u32 4788187, %v2126_v62  ;;  %v735_v1 = vsel %vm729_vm12, %v732_v49, %v734_v15  ;;  %v2372_v41 = vsel %vm2371_vm6, %v2370_v63, 0 }
 0x158   :  { %v482_v52 = vsel %vm480_vm0, %v4195_v42, %v481_v56  ;;  %v2135_v11 = vsel %vm2050_vm1, %v2134_v0, %v4860_v50  ;;  %v754_v2 = vadd.s32 1, %v4945_v4  ;;  %v2374_v54 = vand.u32 31, %v2372_v41 }
 0x159   :  { %v486_v13 = vsel %vm479_vm3, %v482_v52, %v485_v24  ;;  %v2128_v43 = vand.u32 2147483647, %v2127_v33  ;;  %v2130_v46 = vcvt.s32.f32 %v2123_v9  ;;  %v2367_v30 = vand.u32 8388607, %v2360_v19 }
 0x15a   :  { %v487_v35 = vsel %vm476_vm4, nan, %v486_v13  ;;  %v751_v12 = vmul.u32 %v4878_v36, %v735_v1  ;;  %vm753_vm7 = vc.u32 %v4951_v40, %v4944_v57  ;;  %v2375_v50 = vsub.s32 32, %v2374_v54 }
 0x15b   :  { %3712 = vst [vmem:[#allocation2] sm:$0xff] %v487_v35  ;;  %v2131_v0 = vmul.f32 %v2130_v46, %v2128_v43  ;;  %v2137_v22 = vsel %vm4928_vm5, 0, %v2135_v11  ;;  %v755_v49 = vsel %vm753_vm7, %v754_v2, %v4945_v4  ;;  %v2373_v6 = vshrl.u32 %v2372_v41, 5 }
 0x15c   :  { %v756_v17 = vadd.s32 %v755_v49, %v751_v12  ;;  %v2377_v58 = vshll.u32 %v4343_v21, %v2374_v54  ;;  %v2378_v51 = vshrl.u32 %v4344_v25, %v2375_v50  ;;  %v2381_v59 = vshrl.u32 %v4345_v27, %v2375_v50 }
 0x15d   :  { %v2132_v36 = vxor.u32 2147483648, %v2131_v0  ;;  %v2380_v61 = vshll.u32 %v4344_v25, %v2374_v54  ;;  %v2383_v39 = vshll.u32 %v4345_v27, %v2374_v54  ;;  %v2384_v15 = vshrl.u32 %v4346_v29, %v2375_v50 }
 0x15e   :  { %v757_v18 = vadd.s32 536870912, %v756_v17  ;;  %v2379_v7 = vor.u32 %v2378_v51, %v2377_v58  ;;  %v2386_v28 = vshll.u32 %v4346_v29, %v2374_v54  ;;  %v2387_v20 = vshrl.u32 %v4347_v31, %v2375_v50 }
 0x15f   :  { %v2133_v48 = vsel %vm2050_vm1, %v2132_v36, %v2131_v0  ;;  %v2382_v34 = vor.u32 %v2381_v59, %v2380_v61  ;;  %v2385_v3 = vor.u32 %v2384_v15, %v2383_v39  ;;  %v2390_v42 = vshrl.u32 %v4348_v38, %v2375_v50 }
 0x160   :  { %v2136_v60 = vsel %vm4928_vm5, %v4554_v5, %v2133_v48  ;;  %v758_v4 = vshrl.u32 %v757_v18, 30  ;;  %v2388_v63 = vor.u32 %v2387_v20, %v2386_v28  ;;  %v2389_v47 = vshll.u32 %v4347_v31, %v2374_v54 }
 0x161   :  { %4198 = vcosq.f32 %v2136_v60  ;;  %v2141_v44 = vadd.s32 3, %v2137_v22  ;;  %v2368_v9 = vor.u32 8388608, %v2367_v30  ;;  %vm2392_vm8 = vcmp.lt.s32.totalorder %v2373_v6, 1 }
 0x162   :  { %4200 = vsinq.f32 %v2136_v60  ;;  %v759_v62 = vshll.u32 %v758_v4, 30  ;;  %v2391_v56 = vor.u32 %v2390_v42, %v2389_v47  ;;  %vm2395_vm9 = vcmp.lt.s32.totalorder %v2373_v6, 4 }
 0x163   :  { %v2376_v23 = vshrl.u32 %v4343_v21, %v2375_v50  ;;  %vm2394_vm10 = vcmp.lt.s32.totalorder %v2373_v6, 3  ;;  %v2400_v24 = vsel %vm2392_vm8, %v2379_v7, %v2382_v34  ;;  %v2401_v53 = vsel %vm2395_vm9, %v2388_v63, 920167782 }
 0x164   :  { %v4995_v33 = vsub.s32 %v756_v17, %v759_v62  ;;  %vm2393_vm11 = vcmp.lt.s32.totalorder %v2373_v6, 2  ;;  %v2397_v1 = vsel %vm2395_vm9, %v2385_v3, 2102212464  ;;  %v2402_v41 = vsel %vm2394_vm10, %v2385_v3, %v2401_v53 }
 0x165   :  { %v782_v52 = vsub.s32 4, %v758_v4  ;;  %v2403_v11 = vsel %vm2393_vm11, %v2400_v24, %v2402_v41  ;;  %v2404_v2 = vsel %vm2392_vm8, %v2382_v34, %v2385_v3  ;;  %v2408_v54 = vshll.u32 %v2368_v9, 8 }
 0x166   :  { %v2142_v13 = vand.u32 3, %v2141_v44  ;;  %v762_v43 = vsub.s32 0, %v4995_v33  ;;  %v2396_v46 = vsel %vm2392_vm8, %v2376_v23, %v2379_v7  ;;  %v2405_v30 = vsel %vm2395_vm9, %v2391_v56, 1326507024 }
 0x167   :  { %v2398_v35 = vsel %vm2394_vm10, %v2382_v34, %v2397_v1  ;;  %v2406_v12 = vsel %vm2394_vm10, %v2388_v63, %v2405_v30  ;;  %v5006_v50 = vmul.u32.u64.low %v2408_v54, %v2403_v11  ;;  %v5007_v0 = vmul.u32.u64.high %v2408_v54, %v2403_v11, %v5006_v50  ;;  %v5040_v11 = vpop.f32.mrb[6].mxu0 }
 0x168   :  { %vm2140_vm12 = vweird.f32 %v4554_v5  ;;  %vm698_vm13 = vcmp.lt.s32.totalorder %v4820_v45, 0  ;;  %v3806_v22 = vmin.u32 %v762_v43, %v4995_v33  ;;  %v2407_v49 = vsel %vm2393_vm11, %v2404_v2, %v2406_v12 }
 0x169   :  { %v783_v17 = vsel %vm698_vm13, %v782_v52, %v758_v4  ;;  %v5015_v58 = vmul.u32.u64.low %v2408_v54, %v2407_v49  ;;  %v5016_v51 = vmul.u32.u64.high %v2408_v54, %v2407_v49, %v5015_v58  ;;  %v595_v59 = vand.u32 2139095040, %v4882_v37 }
 0x16a   :  { %vm5021_vm14 = vcmp.le.f32.partialorder %v696_v16, 0.7853982  ;;  %v764_v61 = vclz %v3806_v22  ;;  %v2399_v39 = vsel %vm2393_vm11, %v2396_v46, %v2398_v35  ;;  %v592_v15 = vand.u32 2147483647, %v4882_v37 }
 0x16b   :  { %v4199_v18 = vpop.eup %4198  ;;  %vm2143_vm15 = vcmp.lt.s32.totalorder %v2142_v13, 2  ;;  %vm2144_vm0 = vcmp.eq.s32.totalorder %v2142_v13, 0  ;;  %v2418_v7 = vadd.s32 1, %v5007_v0  ;;  %v596_v28 = vshrl.u32 %v595_v59, 23 }
 0x16c   :  { %v4201_v20 = vpop.eup %4200  ;;  %vm2147_vm1 = vcmp.eq.s32.totalorder %v2142_v13, 2  ;;  %v2148_v48 = vxor.u32 2147483648, %v4199_v18  ;;  %v3807_v34 = vadd.s32 4294967294, %v764_v61  ;;  %v785_v16 = vsel %vm5021_vm14, 0, %v783_v17 }
 0x16d   :  { %v2145_v3 = vxor.u32 2147483648, %v4201_v20  ;;  %v2415_v42 = vmul.u32 %v2408_v54, %v2399_v39  ;;  %vm2417_vm2 = vc.u32 %v5016_v51, %v5006_v50  ;;  %v3801_v6 = vadd.s32 4294967169, %v596_v28 }
 0x16e   :  { %v2149_v60 = vsel %vm2147_vm1, %v2148_v48, %v4201_v20  ;;  %vm3808_vm3 = vcmp.lt.s32.totalorder %v3807_v34, 0  ;;  %v2419_v4 = vsel %vm2417_vm2, %v2418_v7, %v5007_v0  ;;  %v599_v63 = vand.u32 8388607, %v592_v15 }
 0x16f   :  { %v2146_v47 = vsel %vm2144_vm0, %v4199_v18, %v2145_v3  ;;  %v767_v44 = vsel %vm3808_vm3, 0, %v3807_v34  ;;  %v2420_v9 = vadd.s32 %v2419_v4, %v2415_v42  ;;  %v602_v62 = vadd.s32 1, %v3801_v6 }
 0x170   :  { %v2150_v56 = vsel %vm2143_vm15, %v2146_v47, %v2149_v60  ;;  %v752_v23 = vadd.s32 %v4944_v57, %v4951_v40  ;;  %v768_v24 = vsub.s32 32, %v767_v44  ;;  %v772_v53 = vsub.s32 4294967266, %v767_v44 }
 0x171   :  { %v2151_v1 = vsel %vm2140_vm12, nan, %v2150_v56  ;;  %v789_v41 = vadd.s32 3, %v785_v16  ;;  %v2421_v52 = vadd.s32 536870912, %v2420_v9  ;;  %vm603_vm4 = vcmp.gt.s32.totalorder %v602_v62, 0 }
 0x172   :  { %3728 = vst [vmem:[#allocation2 + $0x80] sm:$0xff] %v2151_v1  ;;  %v769_v2 = vshll.u32 %v4995_v33, %v767_v44  ;;  %v770_v54 = vshrl.u32 %v752_v23, %v768_v24  ;;  %v773_v43 = vadd.s32 127, %v772_v53  ;;  %v604_v13 = vsel %vm603_vm4, %v602_v62, 0  ;;  %v5050_v33 = vld [vmem:[%s7173_s2] ss:$0 sm:$0xff] }
 0x173   :  { %v2422_v46 = vshrl.u32 %v2421_v52, 30  ;;  %v600_v30 = vor.u32 8388608, %v599_v63  ;;  %v606_v35 = vand.u32 31, %v604_v13  ;;  %v5043_v12 = vand.u32 3, %v789_v41 }
 0x174   :  { %v771_v57 = vor.u32 %v770_v54, %v769_v2  ;;  %v774_v40 = vshll.u32 %v773_v43, 23  ;;  %vm2362_vm5 = vcmp.lt.s32.totalorder %v4873_v32, 0  ;;  %v2416_v49 = vadd.s32 %v5006_v50, %v5016_v51 }
 0x175   :  { %v2423_v5 = vshll.u32 %v2422_v46, 30  ;;  %v607_v0 = vsub.s32 32, %v606_v35  ;;  %v5054_v17 = vadd.f32 %v5050_v33, %v4557_v10  ;;  %v5058_v58 = vadd.f32 %v5050_v33, %v4640_v26 }
 0x176   :  { %v775_v22 = vor.u32 4788187, %v774_v40  ;;  %v605_v61 = vshrl.u32 %v604_v13, 5  ;;  %v5063_v18 = vshll.u32 %v600_v30, 8  ;;  %v778_v51 = vcvt.s32.f32 %v771_v57 }
 0x177   :  { %v5060_v59 = vsub.s32 %v2420_v9, %v2423_v5  ;;  %v610_v39 = vshrl.u32 %v4344_v25, %v607_v0  ;;  %v613_v7 = vshrl.u32 %v4345_v27, %v607_v0  ;;  %v616_v28 = vshrl.u32 %v4346_v29, %v607_v0 }
 0x178   :  { %v776_v50 = vand.u32 2147483647, %v775_v22  ;;  %v2446_v20 = vsub.s32 4, %v2422_v46  ;;  %v609_v48 = vshll.u32 %v4343_v21, %v606_v35  ;;  %v612_v26 = vshll.u32 %v4344_v25, %v606_v35 }
 0x179   :  { %v2426_v10 = vsub.s32 0, %v5060_v59  ;;  %v615_v16 = vshll.u32 %v4345_v27, %v606_v35  ;;  %v618_v3 = vshll.u32 %v4346_v29, %v606_v35  ;;  %v619_v42 = vshrl.u32 %v4347_v31, %v607_v0 }
 0x17a   :  { %v779_v34 = vmul.f32 %v778_v51, %v776_v50  ;;  %v611_v60 = vor.u32 %v610_v39, %v609_v48  ;;  %v614_v4 = vor.u32 %v613_v7, %v612_v26  ;;  %v622_v63 = vshrl.u32 %v4348_v38, %v607_v0 }
 0x17b   :  { %v3870_v6 = vmin.u32 %v2426_v10, %v5060_v59  ;;  %v617_v44 = vor.u32 %v616_v28, %v615_v16  ;;  %v620_v9 = vor.u32 %v619_v42, %v618_v3  ;;  %v621_v62 = vshll.u32 %v4347_v31, %v606_v35  ;;  %v5088_v35 = vpop.f32.mrb[6].mxu1 }
 0x17c   :  { %v780_v47 = vxor.u32 2147483648, %v779_v34  ;;  %v2447_v23 = vsel %vm2362_vm5, %v2446_v20, %v2422_v46  ;;  %v608_v24 = vshrl.u32 %v4343_v21, %v607_v0  ;;  %v2259_v53 = vand.u32 2139095040, %v5054_v17 }
 0x17d   :  { %v2428_v56 = vclz %v3870_v6  ;;  %v623_v41 = vor.u32 %v622_v63, %v621_v62  ;;  %vm624_vm6 = vcmp.lt.s32.totalorder %v605_v61, 1  ;;  %vm625_vm7 = vcmp.lt.s32.totalorder %v605_v61, 2 }
 0x17e   :  { %v781_v1 = vsel %vm698_vm13, %v780_v47, %v779_v34  ;;  %vm626_vm8 = vcmp.lt.s32.totalorder %v605_v61, 3  ;;  %vm627_vm9 = vcmp.lt.s32.totalorder %v605_v61, 4  ;;  %v632_v43 = vsel %vm624_vm6, %v611_v60, %v614_v4 }
 0x17f   :  { %v784_v52 = vsel %vm5021_vm14, %v4820_v45, %v781_v1  ;;  %v3871_v2 = vadd.s32 4294967294, %v2428_v56  ;;  %v629_v54 = vsel %vm627_vm9, %v617_v44, 2102212464  ;;  %v633_v13 = vsel %vm627_vm9, %v620_v9, 920167782 }
 0x180   :  { %4202 = vcosq.f32 %v784_v52  ;;  %v628_v46 = vsel %vm624_vm6, %v608_v24, %v611_v60  ;;  %v634_v30 = vsel %vm626_vm8, %v617_v44, %v633_v13  ;;  %v636_v40 = vsel %vm624_vm6, %v614_v4, %v617_v44 }
 0x181   :  { %4204 = vsinq.f32 %v784_v52  ;;  %vm3872_vm10 = vcmp.lt.s32.totalorder %v3871_v2, 0  ;;  %v635_v36 = vsel %vm625_vm7, %v632_v43, %v634_v30  ;;  %v637_v5 = vsel %vm627_vm9, %v623_v41, 1326507024 }
 0x182   :  { %v2431_v57 = vsel %vm3872_vm10, 0, %v3871_v2  ;;  %v630_v39 = vsel %vm626_vm8, %v614_v4, %v629_v54  ;;  %v638_v50 = vsel %vm626_vm8, %v620_v9, %v637_v5  ;;  %vm5107_vm11 = vcmp.le.f32.partialorder %v2360_v19, 0.7853982 }
 0x183   :  { %v2432_v0 = vsub.s32 32, %v2431_v57  ;;  %v2436_v22 = vsub.s32 4294967266, %v2431_v57  ;;  %v2433_v51 = vshll.u32 %v5060_v59, %v2431_v57  ;;  %v639_v7 = vsel %vm625_vm7, %v636_v40, %v638_v50 }
 0x184   :  { %v5097_v28 = vmul.u32.u64.low %v5063_v18, %v635_v36  ;;  %v5098_v10 = vmul.u32.u64.high %v5063_v18, %v635_v36, %v5097_v28  ;;  %v5102_v26 = vmul.u32.u64.low %v5063_v18, %v639_v7  ;;  %v5103_v34 = vmul.u32.u64.high %v5063_v18, %v639_v7, %v5102_v26 }
 0x185   :  { %v2434_v20 = vshrl.u32 %v2416_v49, %v2432_v0  ;;  %v2437_v48 = vadd.s32 127, %v2436_v22  ;;  %v631_v59 = vsel %vm625_vm7, %v628_v46, %v630_v39  ;;  %v2260_v3 = vshrl.u32 %v2259_v53, 23 }
 0x186   :  { %v2449_v60 = vsel %vm5107_vm11, 0, %v2447_v23  ;;  %v650_v49 = vadd.s32 1, %v5098_v10  ;;  %v2256_v4 = vand.u32 2147483647, %v5054_v17  ;;  %v907_v47 = vand.u32 2139095040, %v5058_v58 }
 0x187   :  { %v2435_v42 = vor.u32 %v2434_v20, %v2433_v51  ;;  %v2438_v6 = vshll.u32 %v2437_v48, 23  ;;  %v3865_v63 = vadd.s32 4294967169, %v2260_v3  ;;  %vm792_vm12 = vcmp.eq.s32.totalorder %v5043_v12, 0 }
 0x188   :  { %v647_v44 = vmul.u32 %v5063_v18, %v631_v59  ;;  %vm649_vm13 = vc.u32 %v5103_v34, %v5097_v28  ;;  %vm795_vm14 = vcmp.eq.s32.totalorder %v5043_v12, 2  ;;  %v2453_v9 = vadd.s32 3, %v2449_v60 }
 0x189   :  { %v2439_v19 = vor.u32 4788187, %v2438_v6  ;;  %v651_v62 = vsel %vm649_vm13, %v650_v49, %v5098_v10  ;;  %v2266_v56 = vadd.s32 1, %v3865_v63  ;;  %v2442_v1 = vcvt.s32.f32 %v2435_v42 }
 0x18a   :  { %v4203_v61 = vpop.eup %4202  ;;  %v652_v41 = vadd.s32 %v651_v62, %v647_v44  ;;  %v2263_v2 = vand.u32 8388607, %v2256_v4  ;;  %v908_v18 = vshrl.u32 %v907_v47, 23  ;;  %vm788_vm0 = vweird.f32 %v4820_v45 }
 0x18b   :  { %v4205_v23 = vpop.eup %4204  ;;  %v796_v24 = vxor.u32 2147483648, %v4203_v61  ;;  %v2440_v53 = vand.u32 2147483647, %v2439_v19  ;;  %vm2267_vm15 = vcmp.gt.s32.totalorder %v2266_v56, 0  ;;  %vm791_vm1 = vcmp.lt.s32.totalorder %v5043_v12, 2 }
 0x18c   :  { %v793_v52 = vxor.u32 2147483648, %v4205_v23  ;;  %v653_v13 = vadd.s32 536870912, %v652_v41  ;;  %v2268_v46 = vsel %vm2267_vm15, %v2266_v56, 0  ;;  %v5129_v5 = vand.u32 3, %v2453_v9 }
 0x18d   :  { %v797_v54 = vsel %vm795_vm14, %v796_v24, %v4205_v23  ;;  %v2443_v43 = vmul.f32 %v2442_v1, %v2440_v53  ;;  %v2270_v57 = vand.u32 31, %v2268_v46  ;;  %v2264_v39 = vor.u32 8388608, %v2263_v2 }
 0x18e   :  { %v794_v30 = vsel %vm792_vm12, %v4203_v61, %v793_v52  ;;  %v5131_v0 = vshrl.u32 %v653_v13, 30  ;;  %v904_v51 = vand.u32 2147483647, %v5058_v58  ;;  %v3813_v10 = vadd.s32 4294967169, %v908_v18 }
 0x18f   :  { %v798_v36 = vsel %vm791_vm1, %v794_v30, %v797_v54  ;;  %v2444_v40 = vxor.u32 2147483648, %v2443_v43  ;;  %v2271_v50 = vsub.s32 32, %v2270_v57  ;;  %v2273_v12 = vshll.u32 %v4343_v21, %v2270_v57 }
 0x190   :  { %v799_v22 = vsel %vm788_vm0, nan, %v798_v36  ;;  %v655_v7 = vshll.u32 %v5131_v0, 30  ;;  %v2276_v26 = vshll.u32 %v4344_v25, %v2270_v57  ;;  %v2279_v42 = vshll.u32 %v4345_v27, %v2270_v57 }
 0x191   :  { %3715 = vst [vmem:[#allocation2 + $0x18] sm:$0xff] %v799_v22  ;;  %v2445_v45 = vsel %vm2362_vm5, %v2444_v40, %v2443_v43  ;;  %v2274_v48 = vshrl.u32 %v4344_v25, %v2271_v50  ;;  %v2277_v59 = vshrl.u32 %v4345_v27, %v2271_v50  ;;  %v2280_v6 = vshrl.u32 %v4346_v29, %v2271_v50 }
 0x192   :  { %v2448_v20 = vsel %vm5107_vm11, %v4873_v32, %v2445_v45  ;;  %v5144_v3 = vsub.s32 %v652_v41, %v655_v7  ;;  %v648_v60 = vadd.s32 %v5097_v28, %v5103_v34  ;;  %v2269_v49 = vshrl.u32 %v2268_v46, 5 }
 0x193   :  { %4206 = vcosq.f32 %v2448_v20  ;;  %v5150_v16 = vshll.u32 %v2264_v39, 8  ;;  %v2275_v47 = vor.u32 %v2274_v48, %v2273_v12  ;;  %v2278_v19 = vor.u32 %v2277_v59, %v2276_v26  ;;  %v5180_v59 = vpop.f32.mrb[7].mxu0 }
 0x194   :  { %4208 = vsinq.f32 %v2448_v20  ;;  %v658_v63 = vsub.s32 0, %v5144_v3  ;;  %v2281_v44 = vor.u32 %v2280_v6, %v2279_v42  ;;  %v2282_v61 = vshll.u32 %v4346_v29, %v2270_v57 }
 0x195   :  { %v2283_v9 = vshrl.u32 %v4347_v31, %v2271_v50  ;;  %v2285_v62 = vshll.u32 %v4347_v31, %v2270_v57  ;;  %v2286_v56 = vshrl.u32 %v4348_v38, %v2271_v50  ;;  %vm2459_vm2 = vcmp.eq.s32.totalorder %v5129_v5, 2 }
 0x196   :  { %v3802_v28 = vmin.u32 %v658_v63, %v5144_v3  ;;  %v678_v34 = vsub.s32 4, %v5131_v0  ;;  %v5162_v23 = vand.u32 8388607, %v904_v51  ;;  %v914_v24 = vadd.s32 1, %v3813_v10 }
 0x197   :  { %vm2456_vm3 = vcmp.eq.s32.totalorder %v5129_v5, 0  ;;  %v2272_v53 = vshrl.u32 %v4343_v21, %v2271_v50  ;;  %v2284_v1 = vor.u32 %v2283_v9, %v2282_v61  ;;  %v2287_v41 = vor.u32 %v2286_v56, %v2285_v62 }
 0x198   :  { %vm2288_vm4 = vcmp.lt.s32.totalorder %v2269_v49, 1  ;;  %vm2455_vm5 = vcmp.lt.s32.totalorder %v5129_v5, 2  ;;  %vm594_vm6 = vcmp.lt.s32.totalorder %v4882_v37, 0  ;;  %v660_v52 = vclz %v3802_v28 }
 0x199   :  { %vm2289_vm7 = vcmp.lt.s32.totalorder %v2269_v49, 2  ;;  %vm2290_vm8 = vcmp.lt.s32.totalorder %v2269_v49, 3  ;;  %vm2291_vm9 = vcmp.lt.s32.totalorder %v2269_v49, 4  ;;  %vm2452_vm10 = vweird.f32 %v4873_v32 }
 0x19a   :  { %v2293_v2 = vsel %vm2291_vm9, %v2281_v44, 2102212464  ;;  %v2296_v18 = vsel %vm2288_vm4, %v2275_v47, %v2278_v19  ;;  %v2297_v54 = vsel %vm2291_vm9, %v2284_v1, 920167782  ;;  %v2300_v43 = vsel %vm2288_vm4, %v2278_v19, %v2281_v44 }
 0x19b   :  { %v3803_v13 = vadd.s32 4294967294, %v660_v52  ;;  %v2292_v46 = vsel %vm2288_vm4, %v2272_v53, %v2275_v47  ;;  %v2298_v30 = vsel %vm2290_vm8, %v2281_v44, %v2297_v54  ;;  %v2301_v57 = vsel %vm2291_vm9, %v2287_v41, 1326507024 }
 0x19c   :  { %v2294_v36 = vsel %vm2290_vm8, %v2278_v19, %v2293_v2  ;;  %v2299_v40 = vsel %vm2289_vm7, %v2296_v18, %v2298_v30  ;;  %v2302_v22 = vsel %vm2290_vm8, %v2284_v1, %v2301_v57  ;;  %vm915_vm11 = vcmp.gt.s32.totalorder %v914_v24, 0 }
 0x19d   :  { %v4207_v39 = vpop.eup %4206  ;;  %vm3804_vm12 = vcmp.lt.s32.totalorder %v3803_v13, 0  ;;  %v2303_v50 = vsel %vm2289_vm7, %v2300_v43, %v2302_v22  ;;  %v5172_v45 = vmul.u32.u64.low %v5150_v16, %v2299_v40  ;;  %v5173_v7 = vmul.u32.u64.high %v5150_v16, %v2299_v40, %v5172_v45 }
 0x19e   :  { %v4209_v12 = vpop.eup %4208  ;;  %v2460_v10 = vxor.u32 2147483648, %v4207_v39  ;;  %v663_v20 = vsel %vm3804_vm12, 0, %v3803_v13  ;;  %v5177_v48 = vmul.u32.u64.low %v5150_v16, %v2303_v50  ;;  %v5178_v26 = vmul.u32.u64.high %v5150_v16, %v2303_v50, %v5177_v48 }
 0x19f   :  { %v2457_v42 = vxor.u32 2147483648, %v4209_v12  ;;  %v664_v6 = vsub.s32 32, %v663_v20  ;;  %v668_v63 = vsub.s32 4294967266, %v663_v20  ;;  %v2295_v47 = vsel %vm2289_vm7, %v2292_v46, %v2294_v36 }
 0x1a0   :  { %v2461_v19 = vsel %vm2459_vm2, %v2460_v10, %v4209_v12  ;;  %v665_v44 = vshll.u32 %v5144_v3, %v663_v20  ;;  %v912_v61 = vor.u32 8388608, %v5162_v23  ;;  %v916_v9 = vsel %vm915_vm11, %v914_v24, 0 }
 0x1a1   :  { %v2458_v62 = vsel %vm2456_vm3, %v4207_v39, %v2457_v42  ;;  %v666_v56 = vshrl.u32 %v648_v60, %v664_v6  ;;  %v669_v28 = vadd.s32 127, %v668_v63  ;;  %v2314_v53 = vadd.s32 1, %v5173_v7 }
 0x1a2   :  { %v2462_v49 = vsel %vm2455_vm5, %v2458_v62, %v2461_v19  ;;  %v679_v1 = vsel %vm594_vm6, %v678_v34, %v5131_v0  ;;  %v2311_v3 = vmul.u32 %v5150_v16, %v2295_v47  ;;  %vm2313_vm13 = vc.u32 %v5178_v26, %v5172_v45 }
 0x1a3   :  { %v2463_v23 = vsel %vm2452_vm10, nan, %v2462_v49  ;;  %v667_v24 = vor.u32 %v666_v56, %v665_v44  ;;  %v670_v60 = vshll.u32 %v669_v28, 23  ;;  %v2315_v41 = vsel %vm2313_vm13, %v2314_v53, %v5173_v7 }
 0x1a4   :  { %3731 = vst [vmem:[#allocation2 + $0x98] sm:$0xff] %v2463_v23  ;;  %vm5204_vm14 = vcmp.le.f32.partialorder %v592_v15, 0.7853982  ;;  %v2316_v0 = vadd.s32 %v2315_v41, %v2311_v3  ;;  %v918_v34 = vand.u32 31, %v916_v9  ;;  %v5210_v2 = vshll.u32 %v912_v61, 8 }
 0x1a5   :  { %v671_v16 = vor.u32 4788187, %v670_v60  ;;  %v681_v52 = vsel %vm5204_vm14, 0, %v679_v1  ;;  %v674_v32 = vcvt.s32.f32 %v667_v24  ;;  %v5212_v54 = vshrl.u32 %v916_v9, 5 }
 0x1a6   :  { %v2317_v18 = vadd.s32 536870912, %v2316_v0  ;;  %v919_v43 = vsub.s32 32, %v918_v34  ;;  %v921_v46 = vshll.u32 %v4343_v21, %v918_v34  ;;  %v924_v15 = vshll.u32 %v4344_v25, %v918_v34 }
 0x1a7   :  { %v672_v13 = vand.u32 2147483647, %v671_v16  ;;  %v927_v30 = vshll.u32 %v4345_v27, %v918_v34  ;;  %v930_v22 = vshll.u32 %v4346_v29, %v918_v34  ;;  %v685_v10 = vadd.s32 3, %v681_v52 }
 0x1a8   :  { %v2318_v57 = vshrl.u32 %v2317_v18, 30  ;;  %v922_v36 = vshrl.u32 %v4344_v25, %v919_v43  ;;  %v925_v40 = vshrl.u32 %v4345_v27, %v919_v43  ;;  %v928_v50 = vshrl.u32 %v4346_v29, %v919_v43 }
 0x1a9   :  { %v675_v39 = vmul.f32 %v674_v32, %v672_v13  ;;  %v931_v7 = vshrl.u32 %v4347_v31, %v919_v43  ;;  %v934_v12 = vshrl.u32 %v4348_v38, %v919_v43  ;;  %v933_v19 = vshll.u32 %v4347_v31, %v918_v34  ;;  %v5261_v32 = vpop.f32.mrb[7].mxu1 }
 0x1aa   :  { %v2319_v20 = vshll.u32 %v2318_v57, 30  ;;  %v923_v48 = vor.u32 %v922_v36, %v921_v46  ;;  %v926_v42 = vor.u32 %v925_v40, %v924_v15  ;;  %v929_v63 = vor.u32 %v928_v50, %v927_v30 }
 0x1ab   :  { %v676_v6 = vxor.u32 2147483648, %v675_v39  ;;  %v932_v47 = vor.u32 %v931_v7, %v930_v22  ;;  %vm936_vm15 = vcmp.lt.s32.totalorder %v5212_v54, 1  ;;  %vm939_vm0 = vcmp.lt.s32.totalorder %v5212_v54, 4 }
 0x1ac   :  { %v5224_v44 = vsub.s32 %v2316_v0, %v2319_v20  ;;  %v5230_v61 = vadd.f32 %v5050_v33, %v4720_v55  ;;  %v935_v62 = vor.u32 %v934_v12, %v933_v19  ;;  %v944_v56 = vsel %vm936_vm15, %v923_v48, %v926_v42 }
 0x1ad   :  { %v677_v9 = vsel %vm594_vm6, %v676_v6, %v675_v39  ;;  %v945_v28 = vsel %vm939_vm0, %v932_v47, 920167782  ;;  %vm937_vm1 = vcmp.lt.s32.totalorder %v5212_v54, 2  ;;  %vm938_vm2 = vcmp.lt.s32.totalorder %v5212_v54, 3 }
 0x1ae   :  { %v680_v53 = vsel %vm5204_vm14, %v4882_v37, %v677_v9  ;;  %v2322_v49 = vsub.s32 0, %v5224_v44  ;;  %v2342_v55 = vsub.s32 4, %v2318_v57  ;;  %v920_v1 = vshrl.u32 %v4343_v21, %v919_v43 }
 0x1af   :  { %4210 = vcosq.f32 %v680_v53  ;;  %v946_v3 = vsel %vm938_vm2, %v929_v63, %v945_v28  ;;  %v941_v24 = vsel %vm939_vm0, %v929_v63, 2102212464  ;;  %v948_v41 = vsel %vm936_vm15, %v926_v42, %v929_v63 }
 0x1b0   :  { %4212 = vsinq.f32 %v680_v53  ;;  %v3866_v23 = vmin.u32 %v2322_v49, %v5224_v44  ;;  %v947_v60 = vsel %vm937_vm1, %v944_v56, %v946_v3  ;;  %v949_v5 = vsel %vm939_vm0, %v935_v62, 1326507024 }
 0x1b1   :  { %v5257_v0 = vmul.u32.u64.low %v5210_v2, %v947_v60  ;;  %v5258_v34 = vmul.u32.u64.high %v5210_v2, %v947_v60, %v5257_v0  ;;  %v686_v16 = vand.u32 3, %v685_v10  ;;  %v940_v18 = vsel %vm936_vm15, %v920_v1, %v923_v48 }
 0x1b2   :  { %v2324_v52 = vclz %v3866_v23  ;;  %v942_v43 = vsel %vm938_vm2, %v926_v42, %v941_v24  ;;  %v950_v13 = vsel %vm938_vm2, %v932_v47, %v949_v5  ;;  %v2571_v46 = vand.u32 2139095040, %v5230_v61 }
 0x1b3   :  { %vm5272_vm3 = vcmp.le.f32.partialorder %v2256_v4, 0.7853982  ;;  %vm2258_vm4 = vcmp.lt.s32.totalorder %v5054_v17, 0  ;;  %v951_v36 = vsel %vm937_vm1, %v948_v41, %v950_v13  ;;  %v2568_v50 = vand.u32 2147483647, %v5230_v61 }
 0x1b4   :  { %v3867_v30 = vadd.s32 4294967294, %v2324_v52  ;;  %v2343_v40 = vsel %vm2258_vm4, %v2342_v55, %v2318_v57  ;;  %v5282_v22 = vmul.u32.u64.low %v5210_v2, %v951_v36  ;;  %v5283_v39 = vmul.u32.u64.high %v5210_v2, %v951_v36, %v5282_v22 }
 0x1b5   :  { %vm684_vm5 = vweird.f32 %v4882_v37  ;;  %v943_v4 = vsel %vm937_vm1, %v940_v18, %v942_v43  ;;  %v962_v7 = vadd.s32 1, %v5258_v34  ;;  %v2572_v12 = vshrl.u32 %v2571_v46, 23 }
 0x1b6   :  { %vm3868_vm6 = vcmp.lt.s32.totalorder %v3867_v30, 0  ;;  %vm687_vm7 = vcmp.lt.s32.totalorder %v686_v16, 2  ;;  %vm691_vm8 = vcmp.eq.s32.totalorder %v686_v16, 2  ;;  %v2312_v57 = vadd.s32 %v5172_v45, %v5178_v26 }
 0x1b7   :  { %v2327_v10 = vsel %vm3868_vm6, 0, %v3867_v30  ;;  %v2345_v42 = vsel %vm5272_vm3, 0, %v2343_v40  ;;  %v3877_v6 = vadd.s32 4294967169, %v2572_v12  ;;  %v959_v54 = vmul.u32 %v5210_v2, %v943_v4 }
 0x1b8   :  { %v2328_v20 = vsub.s32 32, %v2327_v10  ;;  %v2332_v48 = vsub.s32 4294967266, %v2327_v10  ;;  %v2329_v47 = vshll.u32 %v5224_v44, %v2327_v10  ;;  %vm961_vm9 = vc.u32 %v5283_v39, %v5257_v0 }
 0x1b9   :  { %v4211_v63 = vpop.eup %4210  ;;  %v2575_v19 = vand.u32 8388607, %v2568_v50  ;;  %v963_v56 = vsel %vm961_vm9, %v962_v7, %v5258_v34  ;;  %v2578_v49 = vadd.s32 1, %v3877_v6  ;;  %v5303_v44 = vadd.f32 %v5050_v33, %v4848_v14 }
 0x1ba   :  { %v4213_v9 = vpop.eup %4212  ;;  %v692_v45 = vxor.u32 2147483648, %v4211_v63  ;;  %v2330_v26 = vshrl.u32 %v2312_v57, %v2328_v20  ;;  %v2333_v62 = vadd.s32 127, %v2332_v48  ;;  %v964_v53 = vadd.s32 %v963_v56, %v959_v54 }
 0x1bb   :  { %v689_v28 = vxor.u32 2147483648, %v4213_v9  ;;  %vm688_vm10 = vcmp.eq.s32.totalorder %v686_v16, 0  ;;  %v2349_v23 = vadd.s32 3, %v2345_v42  ;;  %vm2579_vm11 = vcmp.gt.s32.totalorder %v2578_v49, 0 }
 0x1bc   :  { %v693_v2 = vsel %vm691_vm8, %v692_v45, %v4213_v9  ;;  %v2331_v55 = vor.u32 %v2330_v26, %v2329_v47  ;;  %v2334_v1 = vshll.u32 %v2333_v62, 23  ;;  %v965_v24 = vadd.s32 536870912, %v964_v53 }
 0x1bd   :  { %v690_v3 = vsel %vm688_vm10, %v4211_v63, %v689_v28  ;;  %v2576_v5 = vor.u32 8388608, %v2575_v19  ;;  %v2580_v34 = vsel %vm2579_vm11, %v2578_v49, 0  ;;  %v803_v43 = vand.u32 2139095040, %v5303_v44 }
 0x1be   :  { %v694_v60 = vsel %vm687_vm7, %v690_v3, %v693_v2  ;;  %v2335_v41 = vor.u32 4788187, %v2334_v1  ;;  %v966_v18 = vshrl.u32 %v965_v24, 30  ;;  %v2582_v14 = vand.u32 31, %v2580_v34 }
 0x1bf   :  { %v695_v52 = vsel %vm684_vm5, nan, %v694_v60  ;;  %v2338_v46 = vcvt.s32.f32 %v2331_v55  ;;  %vm906_vm12 = vcmp.lt.s32.totalorder %v5058_v58, 0  ;;  %v5311_v30 = vand.u32 3, %v2349_v23 }
 0x1c0   :  { %3714 = vst [vmem:[#allocation2 + $0x10] sm:$0xff] %v695_v52  ;;  %v2336_v13 = vand.u32 2147483647, %v2335_v41  ;;  %vm5315_vm13 = vcmp.le.f32.partialorder %v904_v51, 0.7853982  ;;  %v967_v36 = vshll.u32 %v966_v18, 30  ;;  %v960_v4 = vadd.s32 %v5257_v0, %v5283_v39 }
 0x1c1   :  { %v2583_v37 = vsub.s32 32, %v2582_v14  ;;  %v800_v40 = vand.u32 2147483647, %v5303_v44  ;;  %v990_v7 = vsub.s32 4, %v966_v18  ;;  %v5322_v12 = vshll.u32 %v2576_v5, 8 }
 0x1c2   :  { %v2339_v22 = vmul.f32 %v2338_v46, %v2336_v13  ;;  %v5324_v57 = vsub.s32 %v964_v53, %v967_v36  ;;  %v5326_v10 = vshrl.u32 %v2580_v34, 5  ;;  %v804_v20 = vshrl.u32 %v803_v43, 23 }
 0x1c3   :  { %v2586_v51 = vshrl.u32 %v4344_v25, %v2583_v37  ;;  %v2585_v42 = vshll.u32 %v4343_v21, %v2582_v14  ;;  %v2589_v6 = vshrl.u32 %v4345_v27, %v2583_v37  ;;  %v2592_v63 = vshrl.u32 %v4346_v29, %v2583_v37 }
 0x1c4   :  { %v2340_v48 = vxor.u32 2147483648, %v2339_v22  ;;  %v970_v47 = vsub.s32 0, %v5324_v57  ;;  %v2588_v0 = vshll.u32 %v4344_v25, %v2582_v14  ;;  %v2591_v39 = vshll.u32 %v4345_v27, %v2582_v14 }
 0x1c5   :  { %v2595_v54 = vshrl.u32 %v4347_v31, %v2583_v37  ;;  %v991_v9 = vsel %vm906_vm12, %v990_v7, %v966_v18  ;;  %v2587_v45 = vor.u32 %v2586_v51, %v2585_v42  ;;  %v2594_v26 = vshll.u32 %v4346_v29, %v2582_v14 }
 0x1c6   :  { %v2341_v19 = vsel %vm2258_vm4, %v2340_v48, %v2339_v22  ;;  %v3814_v56 = vmin.u32 %v970_v47, %v5324_v57  ;;  %v2590_v28 = vor.u32 %v2589_v6, %v2588_v0  ;;  %v2593_v53 = vor.u32 %v2592_v63, %v2591_v39 }
 0x1c7   :  { %v2344_v62 = vsel %vm5272_vm3, %v5054_v17, %v2341_v19  ;;  %v2596_v49 = vor.u32 %v2595_v54, %v2594_v26  ;;  %v2597_v2 = vshll.u32 %v4347_v31, %v2582_v14  ;;  %v2598_v55 = vshrl.u32 %v4348_v38, %v2583_v37  ;;  %v5380_v19 = vpop.f32.mrb[8].mxu0 }
 0x1c8   :  { %4214 = vcosq.f32 %v2344_v62  ;;  %v972_v1 = vclz %v3814_v56  ;;  %v3809_v3 = vadd.s32 4294967169, %v804_v20  ;;  %v5349_v23 = vand.u32 8388607, %v800_v40 }
 0x1c9   :  { %4216 = vsinq.f32 %v2344_v62  ;;  %v993_v15 = vsel %vm5315_vm13, 0, %v991_v9  ;;  %v2584_v24 = vshrl.u32 %v4343_v21, %v2583_v37  ;;  %v2599_v60 = vor.u32 %v2598_v55, %v2597_v2 }
 0x1ca   :  { %vm2600_vm14 = vcmp.lt.s32.totalorder %v5326_v10, 1  ;;  %v3815_v41 = vadd.s32 4294967294, %v972_v1  ;;  %vm2602_vm15 = vcmp.lt.s32.totalorder %v5326_v10, 3  ;;  %vm2603_vm0 = vcmp.lt.s32.totalorder %v5326_v10, 4 }
 0x1cb   :  { %v2608_v5 = vsel %vm2600_vm14, %v2587_v45, %v2590_v28  ;;  %v2605_v34 = vsel %vm2603_vm0, %v2593_v53, 2102212464  ;;  %v2609_v52 = vsel %vm2603_vm0, %v2596_v49, 920167782  ;;  %v2612_v18 = vsel %vm2600_vm14, %v2590_v28, %v2593_v53 }
 0x1cc   :  { %v2613_v14 = vsel %vm2603_vm0, %v2599_v60, 1326507024  ;;  %vm3816_vm1 = vcmp.lt.s32.totalorder %v3815_v41, 0  ;;  %vm2601_vm2 = vcmp.lt.s32.totalorder %v5326_v10, 2  ;;  %v2610_v43 = vsel %vm2602_vm15, %v2593_v53, %v2609_v52 }
 0x1cd   :  { %v2614_v13 = vsel %vm2602_vm15, %v2596_v49, %v2613_v14  ;;  %vm2351_vm3 = vcmp.lt.s32.totalorder %v5311_v30, 2  ;;  %v975_v46 = vsel %vm3816_vm1, 0, %v3815_v41  ;;  %v2604_v36 = vsel %vm2600_vm14, %v2584_v24, %v2587_v45 }
 0x1ce   :  { %v2611_v37 = vsel %vm2601_vm2, %v2608_v5, %v2610_v43  ;;  %v2615_v22 = vsel %vm2601_vm2, %v2612_v18, %v2614_v13  ;;  %vm2348_vm4 = vweird.f32 %v5054_v17  ;;  %v976_v7 = vsub.s32 32, %v975_v46 }
 0x1cf   :  { %v980_v51 = vsub.s32 4294967266, %v975_v46  ;;  %v2606_v20 = vsel %vm2602_vm15, %v2590_v28, %v2605_v34  ;;  %v810_v48 = vadd.s32 1, %v3809_v3  ;;  %v977_v0 = vshll.u32 %v5324_v57, %v975_v46 }
 0x1d0   :  { %v5371_v42 = vmul.u32.u64.low %v5322_v12, %v2615_v22  ;;  %v5372_v6 = vmul.u32.u64.high %v5322_v12, %v2615_v22, %v5371_v42  ;;  %v5375_v63 = vmul.u32.u64.low %v5322_v12, %v2611_v37  ;;  %v5376_v47 = vmul.u32.u64.high %v5322_v12, %v2611_v37, %v5375_v63 }
 0x1d1   :  { %v978_v39 = vshrl.u32 %v960_v4, %v976_v7  ;;  %v981_v54 = vadd.s32 127, %v980_v51  ;;  %vm811_vm5 = vcmp.gt.s32.totalorder %v810_v48, 0  ;;  %vm2352_vm6 = vcmp.eq.s32.totalorder %v5311_v30, 0 }
 0x1d2   :  { %v4215_v9 = vpop.eup %4214  ;;  %vm2355_vm7 = vcmp.eq.s32.totalorder %v5311_v30, 2  ;;  %v2607_v45 = vsel %vm2601_vm2, %v2604_v36, %v2606_v20  ;;  %v812_v26 = vsel %vm811_vm5, %v810_v48, 0  ;;  %v808_v57 = vor.u32 8388608, %v5349_v23 }
 0x1d3   :  { %v4217_v62 = vpop.eup %4216  ;;  %v2356_v56 = vxor.u32 2147483648, %v4215_v9  ;;  %v979_v28 = vor.u32 %v978_v39, %v977_v0  ;;  %v982_v53 = vshll.u32 %v981_v54, 23  ;;  %v997_v49 = vadd.s32 3, %v993_v15 }
 0x1d4   :  { %v2353_v4 = vxor.u32 2147483648, %v4217_v62  ;;  %vm2625_vm8 = vc.u32 %v5372_v6, %v5375_v63  ;;  %v2626_v2 = vadd.s32 1, %v5376_v47  ;;  %v2623_v3 = vmul.u32 %v5322_v12, %v2607_v45 }
 0x1d5   :  { %v2357_v55 = vsel %vm2355_vm7, %v2356_v56, %v4217_v62  ;;  %v983_v1 = vor.u32 4788187, %v982_v53  ;;  %v814_v10 = vand.u32 31, %v812_v26  ;;  %v986_v60 = vcvt.s32.f32 %v979_v28 }
 0x1d6   :  { %v2354_v24 = vsel %vm2352_vm6, %v4215_v9, %v2353_v4  ;;  %v2627_v41 = vsel %vm2625_vm8, %v2626_v2, %v5376_v47  ;;  %v5396_v23 = vadd.f32 %v5050_v33, %v4914_v8  ;;  %v5402_v18 = vand.u32 3, %v997_v49 }
 0x1d7   :  { %v2358_v15 = vsel %vm2351_vm3, %v2354_v24, %v2357_v55  ;;  %v984_v5 = vand.u32 2147483647, %v983_v1  ;;  %v2628_v34 = vadd.s32 %v2627_v41, %v2623_v3  ;;  %v815_v52 = vsub.s32 32, %v814_v10 }
 0x1d8   :  { %v2359_v12 = vsel %vm2348_vm4, nan, %v2358_v15  ;;  %v813_v14 = vshrl.u32 %v812_v26, 5  ;;  %v817_v43 = vshll.u32 %v4343_v21, %v814_v10  ;;  %v820_v36 = vshll.u32 %v4344_v25, %v814_v10 }
 0x1d9   :  { %3730 = vst [vmem:[#allocation2 + $0x90] sm:$0xff] %v2359_v12  ;;  %v987_v13 = vmul.f32 %v986_v60, %v984_v5  ;;  %v2629_v46 = vadd.s32 536870912, %v2628_v34  ;;  %v818_v8 = vshrl.u32 %v4344_v25, %v815_v52  ;;  %v821_v30 = vshrl.u32 %v4345_v27, %v815_v52 }
 0x1da   :  { %v823_v37 = vshll.u32 %v4345_v27, %v814_v10  ;;  %v824_v22 = vshrl.u32 %v4346_v29, %v815_v52  ;;  %v827_v17 = vshrl.u32 %v4347_v31, %v815_v52  ;;  %v826_v48 = vshll.u32 %v4346_v29, %v814_v10 }
 0x1db   :  { %v988_v7 = vxor.u32 2147483648, %v987_v13  ;;  %v2630_v51 = vshrl.u32 %v2629_v46, 30  ;;  %v819_v20 = vor.u32 %v818_v8, %v817_v43  ;;  %v822_v42 = vor.u32 %v821_v30, %v820_v36 }
 0x1dc   :  { %v825_v47 = vor.u32 %v824_v22, %v823_v37  ;;  %v829_v0 = vshll.u32 %v4347_v31, %v814_v10  ;;  %v830_v39 = vshrl.u32 %v4348_v38, %v815_v52  ;;  %v828_v45 = vor.u32 %v827_v17, %v826_v48 }
 0x1dd   :  { %v989_v54 = vsel %vm906_vm12, %v988_v7, %v987_v13  ;;  %v2631_v9 = vshll.u32 %v2630_v51, 30  ;;  %v5416_v26 = vshll.u32 %v808_v57, 8  ;;  %vm832_vm9 = vcmp.lt.s32.totalorder %v813_v14, 1 }
 0x1de   :  { %v992_v62 = vsel %vm5315_vm13, %v5058_v58, %v989_v54  ;;  %v831_v56 = vor.u32 %v830_v39, %v829_v0  ;;  %v2467_v28 = vand.u32 2139095040, %v5396_v23  ;;  %vm833_vm10 = vcmp.lt.s32.totalorder %v813_v14, 2 }
 0x1df   :  { %4218 = vcosq.f32 %v992_v62  ;;  %v5422_v53 = vsub.s32 %v2628_v34, %v2631_v9  ;;  %vm835_vm11 = vcmp.lt.s32.totalorder %v813_v14, 4  ;;  %v816_v4 = vshrl.u32 %v4343_v21, %v815_v52 }
 0x1e0   :  { %4220 = vsinq.f32 %v992_v62  ;;  %v837_v49 = vsel %vm835_vm11, %v825_v47, 2102212464  ;;  %v840_v57 = vsel %vm832_vm9, %v819_v20, %v822_v42  ;;  %v2654_v55 = vsub.s32 4, %v2630_v51 }
 0x1e1   :  { %v2634_v2 = vsub.s32 0, %v5422_v53  ;;  %vm834_vm12 = vcmp.lt.s32.totalorder %v813_v14, 3  ;;  %v841_v16 = vsel %vm835_vm11, %v828_v45, 920167782  ;;  %v836_v1 = vsel %vm832_vm9, %v816_v4, %v819_v20  ;;  %v5456_v14 = vpop.f32.mrb[8].mxu1 }
 0x1e2   :  { %v842_v3 = vsel %vm834_vm12, %v825_v47, %v841_v16  ;;  %v844_v10 = vsel %vm832_vm9, %v822_v42, %v825_v47  ;;  %v845_v24 = vsel %vm835_vm11, %v831_v56, 1326507024  ;;  %v838_v41 = vsel %vm834_vm12, %v822_v42, %v837_v49 }
 0x1e3   :  { %v3878_v60 = vmin.u32 %v2634_v2, %v5422_v53  ;;  %v843_v15 = vsel %vm833_vm10, %v840_v57, %v842_v3  ;;  %v846_v5 = vsel %vm834_vm12, %v828_v45, %v845_v24  ;;  %vm2570_vm13 = vcmp.lt.s32.totalorder %v5230_v61, 0 }
 0x1e4   :  { %v847_v34 = vsel %vm833_vm10, %v844_v10, %v846_v5  ;;  %v5434_v52 = vmul.u32.u64.low %v5416_v26, %v843_v15  ;;  %v5435_v12 = vmul.u32.u64.high %v5416_v26, %v843_v15, %v5434_v52  ;;  %v2655_v13 = vsel %vm2570_vm13, %v2654_v55, %v2630_v51 }
 0x1e5   :  { %v2636_v43 = vclz %v3878_v60  ;;  %v2464_v46 = vand.u32 2147483647, %v5396_v23  ;;  %v839_v8 = vsel %vm833_vm10, %v836_v1, %v838_v41  ;;  %v2468_v37 = vshrl.u32 %v2467_v28, 23 }
 0x1e6   :  { %v5442_v36 = vmul.u32.u64.low %v5416_v26, %v847_v34  ;;  %v5443_v30 = vmul.u32.u64.high %v5416_v26, %v847_v34, %v5442_v36  ;;  %vm999_vm14 = vcmp.lt.s32.totalorder %v5402_v18, 2  ;;  %vm5448_vm15 = vcmp.le.f32.partialorder %v2568_v50, 0.7853982 }
 0x1e7   :  { %v3879_v17 = vadd.s32 4294967294, %v2636_v43  ;;  %v5454_v7 = vadd.f32 %v5050_v33, %v5040_v11  ;;  %vm1000_vm0 = vcmp.eq.s32.totalorder %v5402_v18, 0  ;;  %vm1003_vm1 = vcmp.eq.s32.totalorder %v5402_v18, 2 }
 0x1e8   :  { %v858_v51 = vadd.s32 1, %v5435_v12  ;;  %v3873_v20 = vadd.s32 4294967169, %v2468_v37  ;;  %v2624_v50 = vadd.s32 %v5375_v63, %v5372_v6  ;;  %v2657_v42 = vsel %vm5448_vm15, 0, %v2655_v13 }
 0x1e9   :  { %v4219_v48 = vpop.eup %4218  ;;  %vm3880_vm2 = vcmp.lt.s32.totalorder %v3879_v17, 0  ;;  %v855_v11 = vmul.u32 %v5416_v26, %v839_v8  ;;  %vm857_vm3 = vc.u32 %v5443_v30, %v5434_v52  ;;  %v2471_v39 = vand.u32 8388607, %v2464_v46 }
 0x1ea   :  { %v4221_v33 = vpop.eup %4220  ;;  %v1004_v47 = vxor.u32 2147483648, %v4219_v48  ;;  %v2639_v0 = vsel %vm3880_vm2, 0, %v3879_v17  ;;  %v1115_v62 = vand.u32 2139095040, %v5454_v7  ;;  %v859_v26 = vsel %vm857_vm3, %v858_v51, %v5435_v12 }
 0x1eb   :  { %v1001_v54 = vxor.u32 2147483648, %v4221_v33  ;;  %v2640_v9 = vsub.s32 32, %v2639_v0  ;;  %v2644_v45 = vsub.s32 4294967266, %v2639_v0  ;;  %v2641_v63 = vshll.u32 %v5422_v53, %v2639_v0 }
 0x1ec   :  { %v1005_v6 = vsel %vm1003_vm1, %v1004_v47, %v4221_v33  ;;  %v2474_v56 = vadd.s32 1, %v3873_v20  ;;  %v860_v57 = vadd.s32 %v859_v26, %v855_v11  ;;  %vm996_vm4 = vweird.f32 %v5058_v58 }
 0x1ed   :  { %v1002_v28 = vsel %vm1000_vm0, %v4219_v48, %v1001_v54  ;;  %v2642_v4 = vshrl.u32 %v2624_v50, %v2640_v9  ;;  %v2645_v49 = vadd.s32 127, %v2644_v45  ;;  %v2661_v55 = vadd.s32 3, %v2657_v42 }
 0x1ee   :  { %v1006_v2 = vsel %vm999_vm14, %v1002_v28, %v1005_v6  ;;  %vm2475_vm5 = vcmp.gt.s32.totalorder %v2474_v56, 0  ;;  %v861_v53 = vadd.s32 536870912, %v860_v57  ;;  %v2472_v10 = vor.u32 8388608, %v2471_v39 }
 0x1ef   :  { %v1007_v16 = vsel %vm996_vm4, nan, %v1006_v2  ;;  %v2643_v1 = vor.u32 %v2642_v4, %v2641_v63  ;;  %v2646_v3 = vshll.u32 %v2645_v49, 23  ;;  %v2476_v24 = vsel %vm2475_vm5, %v2474_v56, 0 }
 0x1f0   :  { %3717 = vst [vmem:[#allocation2 + $0x28] sm:$0xff] %v1007_v16  ;;  %v862_v41 = vshrl.u32 %v861_v53, 30  ;;  %v1116_v15 = vshrl.u32 %v1115_v62, 23  ;;  %v2478_v5 = vand.u32 31, %v2476_v24  ;;  %v5479_v43 = vand.u32 3, %v2661_v55 }
 0x1f1   :  { %v2647_v60 = vor.u32 4788187, %v2646_v3  ;;  %v2650_v12 = vcvt.s32.f32 %v2643_v1  ;;  %vm802_vm6 = vcmp.lt.s32.totalorder %v5303_v44, 0  ;;  %v5483_v18 = vadd.s32 %v5434_v52, %v5443_v30 }
 0x1f2   :  { %v863_v58 = vshll.u32 %v862_v41, 30  ;;  %v2479_v13 = vsub.s32 32, %v2478_v5  ;;  %v5485_v8 = vshll.u32 %v2472_v10, 8  ;;  %v1112_v36 = vand.u32 2147483647, %v5454_v7 }
 0x1f3   :  { %v2648_v34 = vand.u32 2147483647, %v2647_v60  ;;  %v5490_v51 = vshrl.u32 %v2476_v24, 5  ;;  %v3821_v20 = vadd.s32 4294967169, %v1116_v15  ;;  %v886_v48 = vsub.s32 4, %v862_v41 }
 0x1f4   :  { %v5488_v17 = vsub.s32 %v860_v57, %v863_v58  ;;  %v2481_v50 = vshll.u32 %v4343_v21, %v2478_v5  ;;  %v2482_v42 = vshrl.u32 %v4344_v25, %v2479_v13  ;;  %v2485_v11 = vshrl.u32 %v4345_v27, %v2479_v13  ;;  %v5537_v58 = vpop.f32.mrb[9].mxu0 }
 0x1f5   :  { %v2651_v37 = vmul.f32 %v2650_v12, %v2648_v34  ;;  %vm5497_vm7 = vcmp.le.f32.partialorder %v800_v40, 0.7853982  ;;  %v2484_v47 = vshll.u32 %v4344_v25, %v2478_v5  ;;  %v2488_v0 = vshrl.u32 %v4346_v29, %v2479_v13 }
 0x1f6   :  { %v866_v33 = vsub.s32 0, %v5488_v17  ;;  %v2483_v39 = vor.u32 %v2482_v42, %v2481_v50  ;;  %v2487_v54 = vshll.u32 %v4345_v27, %v2478_v5  ;;  %v2490_v9 = vshll.u32 %v4346_v29, %v2478_v5 }
 0x1f7   :  { %v2652_v52 = vxor.u32 2147483648, %v2651_v37  ;;  %v2491_v45 = vshrl.u32 %v4347_v31, %v2479_v13  ;;  %v2486_v6 = vor.u32 %v2485_v11, %v2484_v47  ;;  %v2493_v63 = vshll.u32 %v4347_v31, %v2478_v5 }
 0x1f8   :  { %v3810_v40 = vmin.u32 %v866_v33, %v5488_v17  ;;  %v2489_v56 = vor.u32 %v2488_v0, %v2487_v54  ;;  %v2494_v4 = vshrl.u32 %v4348_v38, %v2479_v13  ;;  %vm2496_vm8 = vcmp.lt.s32.totalorder %v5490_v51, 1 }
 0x1f9   :  { %v2653_v62 = vsel %vm2570_vm13, %v2652_v52, %v2651_v37  ;;  %v2492_v28 = vor.u32 %v2491_v45, %v2490_v9  ;;  %v1122_v57 = vadd.s32 1, %v3821_v20  ;;  %v887_v2 = vsel %vm802_vm6, %v886_v48, %v862_v41 }
 0x1fa   :  { %v2656_v26 = vsel %vm5448_vm15, %v5230_v61, %v2653_v62  ;;  %v868_v49 = vclz %v3810_v40  ;;  %v2480_v55 = vshrl.u32 %v4343_v21, %v2479_v13  ;;  %v2495_v16 = vor.u32 %v2494_v4, %v2493_v63 }
 0x1fb   :  { %4222 = vcosq.f32 %v2656_v26  ;;  %vm2498_vm9 = vcmp.lt.s32.totalorder %v5490_v51, 3  ;;  %vm2499_vm10 = vcmp.lt.s32.totalorder %v5490_v51, 4  ;;  %v2504_v22 = vsel %vm2496_vm8, %v2483_v39, %v2486_v6 }
 0x1fc   :  { %4224 = vsinq.f32 %v2656_v26  ;;  %v3811_v1 = vadd.s32 4294967294, %v868_v49  ;;  %v2501_v3 = vsel %vm2499_vm10, %v2489_v56, 2102212464  ;;  %v2505_v53 = vsel %vm2499_vm10, %v2492_v28, 920167782 }
 0x1fd   :  { %v2508_v10 = vsel %vm2496_vm8, %v2486_v6, %v2489_v56  ;;  %v2509_v24 = vsel %vm2499_vm10, %v2495_v16, 1326507024  ;;  %vm2497_vm12 = vcmp.lt.s32.totalorder %v5490_v51, 2  ;;  %v2506_v60 = vsel %vm2498_vm9, %v2489_v56, %v2505_v53  ;;  %v5567_v51 = vld [vmem:[%s7173_s2] ss:$0 sm:$0xff] }
 0x1fe   :  { %vm3812_vm11 = vcmp.lt.s32.totalorder %v3811_v1, 0  ;;  %v2510_v41 = vsel %vm2498_vm9, %v2492_v28, %v2509_v24  ;;  %vm2664_vm13 = vcmp.eq.s32.totalorder %v5479_v43, 0  ;;  %v889_v5 = vsel %vm5497_vm7, 0, %v887_v2 }
 0x1ff   :  { %v871_v15 = vsel %vm3812_vm11, 0, %v3811_v1  ;;  %v2507_v34 = vsel %vm2497_vm12, %v2504_v22, %v2506_v60  ;;  %v2511_v12 = vsel %vm2497_vm12, %v2508_v10, %v2510_v41  ;;  %vm2663_vm14 = vcmp.lt.s32.totalorder %v5479_v43, 2 }
 0x200   :  { %v872_v13 = vsub.s32 32, %v871_v15  ;;  %v876_v37 = vsub.s32 4294967266, %v871_v15  ;;  %v2500_v20 = vsel %vm2496_vm8, %v2480_v55, %v2483_v39  ;;  %v2502_v48 = vsel %vm2498_vm9, %v2486_v6, %v2501_v3 }
 0x201   :  { %vm2660_vm15 = vweird.f32 %v5230_v61  ;;  %v5546_v50 = vmul.u32.u64.low %v5485_v8, %v2511_v12  ;;  %v5547_v42 = vmul.u32.u64.high %v5485_v8, %v2511_v12, %v5546_v50  ;;  %v873_v33 = vshll.u32 %v5488_v17, %v871_v15 }
 0x202   :  { %v5550_v11 = vmul.u32.u64.low %v5485_v8, %v2507_v34  ;;  %v5551_v52 = vmul.u32.u64.high %v5485_v8, %v2507_v34, %v5550_v11  ;;  %v874_v47 = vshrl.u32 %v5483_v18, %v872_v13  ;;  %v877_v0 = vadd.s32 127, %v876_v37 }
 0x203   :  { %vm1123_vm0 = vcmp.gt.s32.totalorder %v1122_v57, 0  ;;  %v893_v39 = vadd.s32 3, %v889_v5  ;;  %v2503_v54 = vsel %vm2497_vm12, %v2500_v20, %v2502_v48  ;;  %v1119_v9 = vand.u32 8388607, %v1112_v36 }
 0x204   :  { %v1124_v45 = vsel %vm1123_vm0, %v1122_v57, 0  ;;  %vm2667_vm1 = vcmp.eq.s32.totalorder %v5479_v43, 2  ;;  %v875_v40 = vor.u32 %v874_v47, %v873_v33  ;;  %v878_v6 = vshll.u32 %v877_v0, 23 }
 0x205   :  { %v4223_v62 = vpop.eup %4222  ;;  %v1126_v63 = vand.u32 31, %v1124_v45  ;;  %vm2521_vm2 = vc.u32 %v5547_v42, %v5550_v11  ;;  %v2522_v18 = vadd.s32 1, %v5551_v52  ;;  %v5571_v56 = vadd.f32 %v5567_v51, %v5088_v35 }
 0x206   :  { %v4225_v26 = vpop.eup %4224  ;;  %v2668_v17 = vxor.u32 2147483648, %v4223_v62  ;;  %v879_v4 = vor.u32 4788187, %v878_v6  ;;  %v2519_v49 = vmul.u32 %v5485_v8, %v2503_v54  ;;  %v5574_v55 = vand.u32 3, %v893_v39 }
 0x207   :  { %v2665_v28 = vxor.u32 2147483648, %v4225_v26  ;;  %v1127_v57 = vsub.s32 32, %v1126_v63  ;;  %v2523_v16 = vsel %vm2521_vm2, %v2522_v18, %v5551_v52  ;;  %v1120_v1 = vor.u32 8388608, %v1119_v9 }
 0x208   :  { %v2669_v2 = vsel %vm2667_vm1, %v2668_v17, %v4225_v26  ;;  %v880_v3 = vand.u32 2147483647, %v879_v4  ;;  %v882_v53 = vcvt.s32.f32 %v875_v40  ;;  %v2524_v10 = vadd.s32 %v2523_v16, %v2519_v49 }
 0x209   :  { %v2666_v22 = vsel %vm2664_vm13, %v4223_v62, %v2665_v28  ;;  %v1129_v24 = vshll.u32 %v4343_v21, %v1126_v63  ;;  %v1130_v8 = vshrl.u32 %v4344_v25, %v1127_v57  ;;  %v1133_v60 = vshrl.u32 %v4345_v27, %v1127_v57 }
 0x20a   :  { %v2670_v35 = vsel %vm2663_vm14, %v2666_v22, %v2669_v2  ;;  %v883_v15 = vmul.f32 %v882_v53, %v880_v3  ;;  %v2525_v5 = vadd.s32 536870912, %v2524_v10  ;;  %v1136_v34 = vshrl.u32 %v4346_v29, %v1127_v57 }
 0x20b   :  { %v2671_v41 = vsel %vm2660_vm15, nan, %v2670_v35  ;;  %v1125_v12 = vshrl.u32 %v1124_v45, 5  ;;  %v1132_v13 = vshll.u32 %v4344_v25, %v1126_v63  ;;  %v1135_v43 = vshll.u32 %v4345_v27, %v1126_v63 }
 0x20c   :  { %3733 = vst [vmem:[#allocation2 + $0xa8] sm:$0xff] %v2671_v41  ;;  %v1139_v37 = vshrl.u32 %v4347_v31, %v1127_v57  ;;  %v884_v20 = vxor.u32 2147483648, %v883_v15  ;;  %v2526_v48 = vshrl.u32 %v2525_v5, 30  ;;  %v1131_v50 = vor.u32 %v1130_v8, %v1129_v24 }
 0x20d   :  { %v1138_v52 = vshll.u32 %v4346_v29, %v1126_v63  ;;  %v1134_v33 = vor.u32 %v1133_v60, %v1132_v13  ;;  %v1137_v61 = vor.u32 %v1136_v34, %v1135_v43  ;;  %v1141_v47 = vshll.u32 %v4347_v31, %v1126_v63  ;;  %v5612_v60 = vpop.f32.mrb[9].mxu1 }
 0x20e   :  { %v1142_v0 = vshrl.u32 %v4348_v38, %v1127_v57  ;;  %v885_v39 = vsel %vm802_vm6, %v884_v20, %v883_v15  ;;  %v2527_v54 = vshll.u32 %v2526_v48, 30  ;;  %v5595_v45 = vshll.u32 %v1120_v1, 8 }
 0x20f   :  { %v1140_v9 = vor.u32 %v1139_v37, %v1138_v52  ;;  %v888_v62 = vsel %vm5497_vm7, %v5303_v44, %v885_v39  ;;  %v1128_v40 = vshrl.u32 %v4343_v21, %v1127_v57  ;;  %v2779_v26 = vand.u32 2139095040, %v5571_v56 }
 0x210   :  { %v1143_v6 = vor.u32 %v1142_v0, %v1141_v47  ;;  %4226 = vcosq.f32 %v888_v62  ;;  %v5602_v63 = vsub.s32 %v2524_v10, %v2527_v54  ;;  %vm1144_vm3 = vcmp.lt.s32.totalorder %v1125_v12, 1 }
 0x211   :  { %vm1147_vm4 = vcmp.lt.s32.totalorder %v1125_v12, 4  ;;  %4228 = vsinq.f32 %v888_v62  ;;  %vm1145_vm5 = vcmp.lt.s32.totalorder %v1125_v12, 2  ;;  %v1152_v18 = vsel %vm1144_vm3, %v1131_v50, %v1134_v33 }
 0x212   :  { %v1149_v17 = vsel %vm1147_vm4, %v1137_v61, 2102212464  ;;  %v2530_v28 = vsub.s32 0, %v5602_v63  ;;  %v2550_v4 = vsub.s32 4, %v2526_v48  ;;  %vm1146_vm6 = vcmp.lt.s32.totalorder %v1125_v12, 3 }
 0x213   :  { %v1153_v30 = vsel %vm1147_vm4, %v1140_v9, 920167782  ;;  %v1148_v49 = vsel %vm1144_vm3, %v1128_v40, %v1131_v50  ;;  %v1156_v57 = vsel %vm1144_vm3, %v1134_v33, %v1137_v61  ;;  %v1157_v16 = vsel %vm1147_vm4, %v1143_v6, 1326507024 }
 0x214   :  { %v1154_v2 = vsel %vm1146_vm6, %v1137_v61, %v1153_v30  ;;  %v3874_v1 = vmin.u32 %v2530_v28, %v5602_v63  ;;  %v1150_v22 = vsel %vm1146_vm6, %v1134_v33, %v1149_v17  ;;  %v1158_v53 = vsel %vm1146_vm6, %v1140_v9, %v1157_v16 }
 0x215   :  { %v1155_v3 = vsel %vm1145_vm5, %v1152_v18, %v1154_v2  ;;  %v1159_v10 = vsel %vm1145_vm5, %v1156_v57, %v1158_v53  ;;  %v2780_v8 = vshrl.u32 %v2779_v26, 23  ;;  %vm5616_vm7 = vcmp.le.f32.partialorder %v2464_v46, 0.7853982 }
 0x216   :  { %v5609_v35 = vmul.u32.u64.low %v5595_v45, %v1155_v3  ;;  %v5610_v24 = vmul.u32.u64.high %v5595_v45, %v1155_v3, %v5609_v35  ;;  %vm2466_vm8 = vcmp.lt.s32.totalorder %v5396_v23, 0  ;;  %v2532_v15 = vclz %v3874_v1 }
 0x217   :  { %vm892_vm9 = vweird.f32 %v5303_v44  ;;  %v2551_v5 = vsel %vm2466_vm8, %v2550_v4, %v2526_v48  ;;  %v5625_v34 = vmul.u32.u64.low %v5595_v45, %v1159_v10  ;;  %v5626_v13 = vmul.u32.u64.high %v5595_v45, %v1159_v10, %v5625_v34 }
 0x218   :  { %v3885_v43 = vadd.s32 4294967169, %v2780_v8  ;;  %v3875_v37 = vadd.s32 4294967294, %v2532_v15  ;;  %v1151_v20 = vsel %vm1145_vm5, %v1148_v49, %v1150_v22  ;;  %v2776_v46 = vand.u32 2147483647, %v5571_v56 }
 0x219   :  { %v5632_v50 = vadd.f32 %v5567_v51, %v5180_v59  ;;  %vm895_vm10 = vcmp.lt.s32.totalorder %v5574_v55, 2  ;;  %vm896_vm11 = vcmp.eq.s32.totalorder %v5574_v55, 0  ;;  %v1170_v48 = vadd.s32 1, %v5610_v24 }
 0x21a   :  { %v2786_v52 = vadd.s32 1, %v3885_v43  ;;  %v4227_v33 = vpop.eup %4226  ;;  %vm899_vm12 = vcmp.eq.s32.totalorder %v5574_v55, 2  ;;  %v2520_v12 = vadd.s32 %v5550_v11, %v5547_v42  ;;  %vm3876_vm13 = vcmp.lt.s32.totalorder %v3875_v37, 0 }
 0x21b   :  { %v2553_v61 = vsel %vm5616_vm7, 0, %v2551_v5  ;;  %v4229_v47 = vpop.eup %4228  ;;  %v900_v59 = vxor.u32 2147483648, %v4227_v33  ;;  %v2535_v0 = vsel %vm3876_vm13, 0, %v3875_v37  ;;  %v1167_v39 = vmul.u32 %v5595_v45, %v1151_v20 }
 0x21c   :  { %vm1169_vm14 = vc.u32 %v5626_v13, %v5609_v35  ;;  %v897_v54 = vxor.u32 2147483648, %v4229_v47  ;;  %v2536_v9 = vsub.s32 32, %v2535_v0  ;;  %v2540_v62 = vsub.s32 4294967266, %v2535_v0 }
 0x21d   :  { %v2783_v40 = vand.u32 8388607, %v2776_v46  ;;  %v901_v6 = vsel %vm899_vm12, %v900_v59, %v4229_v47  ;;  %v2537_v42 = vshll.u32 %v5602_v63, %v2535_v0  ;;  %v1171_v11 = vsel %vm1169_vm14, %v1170_v48, %v5610_v24 }
 0x21e   :  { %vm2787_vm15 = vcmp.gt.s32.totalorder %v2786_v52, 0  ;;  %v898_v26 = vsel %vm896_vm11, %v4227_v33, %v897_v54  ;;  %v2538_v17 = vshrl.u32 %v2520_v12, %v2536_v9  ;;  %v2541_v18 = vadd.s32 127, %v2540_v62 }
 0x21f   :  { %v1172_v45 = vadd.s32 %v1171_v11, %v1167_v39  ;;  %v902_v28 = vsel %vm895_vm10, %v898_v26, %v901_v6  ;;  %v2557_v4 = vadd.s32 3, %v2553_v61  ;;  %v2788_v30 = vsel %vm2787_vm15, %v2786_v52, 0 }
 0x220   :  { %v1008_v49 = vand.u32 2147483647, %v5632_v50  ;;  %v903_v2 = vsel %vm892_vm9, nan, %v902_v28  ;;  %v2539_v63 = vor.u32 %v2538_v17, %v2537_v42  ;;  %v2542_v57 = vshll.u32 %v2541_v18, 23 }
 0x221   :  { %v1173_v16 = vadd.s32 536870912, %v1172_v45  ;;  %3716 = vst [vmem:[#allocation2 + $0x20] sm:$0xff] %v903_v2  ;;  %v2784_v1 = vor.u32 8388608, %v2783_v40  ;;  %v2790_v22 = vand.u32 31, %v2788_v30  ;;  %v5657_v10 = vand.u32 3, %v2557_v4 }
 0x222   :  { %v2543_v3 = vor.u32 4788187, %v2542_v57  ;;  %v1011_v24 = vand.u32 2139095040, %v5632_v50  ;;  %v5662_v8 = vand.u32 8388607, %v1008_v49  ;;  %v2546_v15 = vcvt.s32.f32 %v2539_v63 }
 0x223   :  { %v5655_v53 = vshrl.u32 %v1173_v16, 30  ;;  %v2791_v55 = vsub.s32 32, %v2790_v22  ;;  %v5665_v5 = vadd.s32 %v5609_v35, %v5626_v13  ;;  %v5671_v48 = vshll.u32 %v2784_v1, 8 }
 0x224   :  { %v2544_v44 = vand.u32 2147483647, %v2543_v3  ;;  %v2793_v12 = vshll.u32 %v4343_v21, %v2790_v22  ;;  %v2789_v47 = vshrl.u32 %v2788_v30, 5  ;;  %v2796_v35 = vshll.u32 %v4344_v25, %v2790_v22 }
 0x225   :  { %v1175_v34 = vshll.u32 %v5655_v53, 30  ;;  %v2794_v43 = vshrl.u32 %v4344_v25, %v2791_v55  ;;  %v2797_v37 = vshrl.u32 %v4345_v27, %v2791_v55  ;;  %v2800_v20 = vshrl.u32 %v4346_v29, %v2791_v55 }
 0x226   :  { %v2547_v52 = vmul.f32 %v2546_v15, %v2544_v44  ;;  %v2803_v61 = vshrl.u32 %v4347_v31, %v2791_v55  ;;  %v2799_v13 = vshll.u32 %v4345_v27, %v2790_v22  ;;  %v1012_v59 = vshrl.u32 %v1011_v24, 23 }
 0x227   :  { %v5673_v33 = vsub.s32 %v1172_v45, %v1175_v34  ;;  %v2795_v54 = vor.u32 %v2794_v43, %v2793_v12  ;;  %v2802_v9 = vshll.u32 %v4346_v29, %v2790_v22  ;;  %v2798_v62 = vor.u32 %v2797_v37, %v2796_v35 }
 0x228   :  { %v2548_v0 = vxor.u32 2147483648, %v2547_v52  ;;  %v2801_v40 = vor.u32 %v2800_v20, %v2799_v13  ;;  %v2805_v6 = vshll.u32 %v4347_v31, %v2790_v22  ;;  %v2806_v42 = vshrl.u32 %v4348_v38, %v2791_v55 }
 0x229   :  { %v1178_v39 = vsub.s32 0, %v5673_v33  ;;  %v2804_v17 = vor.u32 %v2803_v61, %v2802_v9  ;;  %v1016_v18 = vor.u32 8388608, %v5662_v8  ;;  %v2792_v28 = vshrl.u32 %v4343_v21, %v2791_v55 }
 0x22a   :  { %v2549_v11 = vsel %vm2466_vm8, %v2548_v0, %v2547_v52  ;;  %v2807_v4 = vor.u32 %v2806_v42, %v2805_v6  ;;  %v3817_v30 = vadd.s32 4294967169, %v1012_v59  ;;  %vm2808_vm0 = vcmp.lt.s32.totalorder %v2789_v47, 1 }
 0x22b   :  { %v3822_v26 = vmin.u32 %v1178_v39, %v5673_v33  ;;  %v2552_v45 = vsel %vm5616_vm7, %v5396_v23, %v2549_v11  ;;  %vm2811_vm1 = vcmp.lt.s32.totalorder %v2789_v47, 4  ;;  %vm1114_vm2 = vcmp.lt.s32.totalorder %v5454_v7, 0  ;;  %v5706_v39 = vpop.f32.mrb[10].mxu0 }
 0x22c   :  { %4230 = vcosq.f32 %v2552_v45  ;;  %vm2809_vm3 = vcmp.lt.s32.totalorder %v2789_v47, 2  ;;  %v2813_v63 = vsel %vm2811_vm1, %v2801_v40, 2102212464  ;;  %v2816_v57 = vsel %vm2808_vm0, %v2795_v54, %v2798_v62 }
 0x22d   :  { %v1180_v2 = vclz %v3822_v26  ;;  %4232 = vsinq.f32 %v2552_v45  ;;  %vm2810_vm4 = vcmp.lt.s32.totalorder %v2789_v47, 3  ;;  %v2817_v1 = vsel %vm2811_vm1, %v2804_v17, 920167782 }
 0x22e   :  { %v2820_v22 = vsel %vm2808_vm0, %v2798_v62, %v2801_v40  ;;  %v2812_v41 = vsel %vm2808_vm0, %v2792_v28, %v2795_v54  ;;  %v2818_v3 = vsel %vm2810_vm4, %v2801_v40, %v2817_v1  ;;  %v2821_v24 = vsel %vm2811_vm1, %v2807_v4, 1326507024 }
 0x22f   :  { %v3823_v16 = vadd.s32 4294967294, %v1180_v2  ;;  %v1018_v55 = vadd.s32 1, %v3817_v30  ;;  %v2814_v8 = vsel %vm2810_vm4, %v2798_v62, %v2813_v63  ;;  %v2819_v44 = vsel %vm2809_vm3, %v2816_v57, %v2818_v3 }
 0x230   :  { %v2822_v15 = vsel %vm2810_vm4, %v2804_v17, %v2821_v24  ;;  %v5695_v37 = vmul.u32.u64.low %v5671_v48, %v2819_v44  ;;  %v5696_v20 = vmul.u32.u64.high %v5671_v48, %v2819_v44, %v5695_v37  ;;  %v1198_v61 = vsub.s32 4, %v5655_v53 }
 0x231   :  { %vm3824_vm5 = vcmp.lt.s32.totalorder %v3823_v16, 0  ;;  %v2823_v43 = vsel %vm2809_vm3, %v2820_v22, %v2822_v15  ;;  %vm1019_vm6 = vcmp.gt.s32.totalorder %v1018_v55, 0  ;;  %vm2556_vm7 = vweird.f32 %v5396_v23 }
 0x232   :  { %v1183_v34 = vsel %vm3824_vm5, 0, %v3823_v16  ;;  %v2815_v35 = vsel %vm2809_vm3, %v2812_v41, %v2814_v8  ;;  %v5703_v13 = vmul.u32.u64.low %v5671_v48, %v2823_v43  ;;  %v5704_v59 = vmul.u32.u64.high %v5671_v48, %v2823_v43, %v5703_v13 }
 0x233   :  { %v1184_v52 = vsub.s32 32, %v1183_v34  ;;  %v1188_v12 = vsub.s32 4294967266, %v1183_v34  ;;  %v1020_v0 = vsel %vm1019_vm6, %v1018_v55, 0  ;;  %v1185_v54 = vshll.u32 %v5673_v33, %v1183_v34 }
 0x234   :  { %v1022_v40 = vand.u32 31, %v1020_v0  ;;  %vm2559_vm8 = vcmp.lt.s32.totalorder %v5657_v10, 2  ;;  %vm2560_vm9 = vcmp.eq.s32.totalorder %v5657_v10, 0  ;;  %vm5714_vm10 = vcmp.le.f32.partialorder %v1112_v36, 0.7853982 }
 0x235   :  { %v1186_v9 = vshrl.u32 %v5665_v5, %v1184_v52  ;;  %v1189_v62 = vadd.s32 127, %v1188_v12  ;;  %v2834_v6 = vadd.s32 1, %v5696_v20  ;;  %vm2563_vm11 = vcmp.eq.s32.totalorder %v5657_v10, 2 }
 0x236   :  { %v4231_v42 = vpop.eup %4230  ;;  %v1199_v5 = vsel %vm1114_vm2, %v1198_v61, %v5655_v53  ;;  %v2831_v45 = vmul.u32 %v5671_v48, %v2815_v35  ;;  %vm2833_vm12 = vc.u32 %v5704_v59, %v5695_v37  ;;  %v1023_v36 = vsub.s32 32, %v1022_v40 }
 0x237   :  { %v1187_v33 = vor.u32 %v1186_v9, %v1185_v54  ;;  %v1190_v11 = vshll.u32 %v1189_v62, 23  ;;  %v4233_v26 = vpop.eup %4232  ;;  %v2564_v17 = vxor.u32 2147483648, %v4231_v42  ;;  %v2835_v30 = vsel %vm2833_vm12, %v2834_v6, %v5696_v20 }
 0x238   :  { %v2561_v28 = vxor.u32 2147483648, %v4233_v26  ;;  %v5727_v2 = vshll.u32 %v1016_v18, 8  ;;  %v1201_v57 = vsel %vm5714_vm10, 0, %v1199_v5  ;;  %v2836_v16 = vadd.s32 %v2835_v30, %v2831_v45 }
 0x239   :  { %v1191_v4 = vor.u32 4788187, %v1190_v11  ;;  %v2565_v63 = vsel %vm2563_vm11, %v2564_v17, %v4233_v26  ;;  %v5733_v53 = vadd.f32 %v5567_v51, %v5261_v32  ;;  %v1194_v22 = vcvt.s32.f32 %v1187_v33 }
 0x23a   :  { %v2562_v48 = vsel %vm2560_vm9, %v4231_v42, %v2561_v28  ;;  %v5737_v41 = vshrl.u32 %v1020_v0, 5  ;;  %v2837_v3 = vadd.s32 536870912, %v2836_v16  ;;  %v1026_v24 = vshrl.u32 %v4344_v25, %v1023_v36 }
 0x23b   :  { %v1192_v1 = vand.u32 2147483647, %v1191_v4  ;;  %v2566_v18 = vsel %vm2559_vm8, %v2562_v48, %v2565_v63  ;;  %v1029_v55 = vshrl.u32 %v4345_v27, %v1023_v36  ;;  %v1025_v44 = vshll.u32 %v4343_v21, %v1022_v40 }
 0x23c   :  { %v2567_v8 = vsel %vm2556_vm7, nan, %v2566_v18  ;;  %v1032_v15 = vshrl.u32 %v4346_v29, %v1023_v36  ;;  %v2838_v34 = vshrl.u32 %v2837_v3, 30  ;;  %v1028_v43 = vshll.u32 %v4344_v25, %v1022_v40 }
 0x23d   :  { %v1195_v32 = vmul.f32 %v1194_v22, %v1192_v1  ;;  %3732 = vst [vmem:[#allocation2 + $0xa0] sm:$0xff] %v2567_v8  ;;  %v1031_v10 = vshll.u32 %v4345_v27, %v1022_v40  ;;  %v1035_v20 = vshrl.u32 %v4347_v31, %v1023_v36  ;;  %v1034_v12 = vshll.u32 %v4346_v29, %v1022_v40 }
 0x23e   :  { %v1037_v61 = vshll.u32 %v4347_v31, %v1022_v40  ;;  %v1038_v23 = vshrl.u32 %v4348_v38, %v1023_v36  ;;  %v1205_v35 = vadd.s32 3, %v1201_v57  ;;  %v2839_v13 = vshll.u32 %v2838_v34, 30 }
 0x23f   :  { %v1196_v52 = vxor.u32 2147483648, %v1195_v32  ;;  %v1027_v0 = vor.u32 %v1026_v24, %v1025_v44  ;;  %v1030_v54 = vor.u32 %v1029_v55, %v1028_v43  ;;  %v1033_v62 = vor.u32 %v1032_v15, %v1031_v10 }
 0x240   :  { %v1036_v6 = vor.u32 %v1035_v20, %v1034_v12  ;;  %v1039_v42 = vor.u32 %v1038_v23, %v1037_v61  ;;  %v5758_v11 = vsub.s32 %v2836_v16, %v2839_v13  ;;  %v1024_v40 = vshrl.u32 %v4343_v21, %v1023_v36 }
 0x241   :  { %v1197_v9 = vsel %vm1114_vm2, %v1196_v52, %v1195_v32  ;;  %v2675_v5 = vand.u32 2139095040, %v5733_v53  ;;  %vm1040_vm13 = vcmp.lt.s32.totalorder %v5737_v41, 1  ;;  %vm1041_vm14 = vcmp.lt.s32.totalorder %v5737_v41, 2 }
 0x242   :  { %v1200_v33 = vsel %vm5714_vm10, %v5454_v7, %v1197_v9  ;;  %vm1042_vm15 = vcmp.lt.s32.totalorder %v5737_v41, 3  ;;  %v2842_v26 = vsub.s32 0, %v5758_v11  ;;  %vm1043_vm0 = vcmp.lt.s32.totalorder %v5737_v41, 4 }
 0x243   :  { %4234 = vcosq.f32 %v1200_v33  ;;  %v1048_v47 = vsel %vm1040_vm13, %v1027_v0, %v1030_v54  ;;  %v1045_v17 = vsel %vm1043_vm0, %v1033_v62, 2102212464  ;;  %v1049_v45 = vsel %vm1043_vm0, %v1036_v6, 920167782 }
 0x244   :  { %4236 = vsinq.f32 %v1200_v33  ;;  %v1052_v36 = vsel %vm1040_vm13, %v1030_v54, %v1033_v62  ;;  %v1053_v28 = vsel %vm1043_vm0, %v1039_v42, 1326507024  ;;  %v3886_v4 = vmin.u32 %v2842_v26, %v5758_v11 }
 0x245   :  { %v2862_v30 = vsub.s32 4, %v2838_v34  ;;  %v1050_v63 = vsel %vm1042_vm15, %v1033_v62, %v1049_v45  ;;  %v1054_v57 = vsel %vm1042_vm15, %v1036_v6, %v1053_v28  ;;  %v1206_v16 = vand.u32 3, %v1205_v35 }
 0x246   :  { %v1051_v48 = vsel %vm1041_vm14, %v1048_v47, %v1050_v63  ;;  %v1055_v1 = vsel %vm1041_vm14, %v1052_v36, %v1054_v57  ;;  %v2676_v22 = vshrl.u32 %v2675_v5, 23  ;;  %vm2778_vm1 = vcmp.lt.s32.totalorder %v5571_v56, 0 }
 0x247   :  { %v2844_v18 = vclz %v3886_v4  ;;  %v1044_v3 = vsel %vm1040_vm13, %v1024_v40, %v1027_v0  ;;  %v1046_v24 = vsel %vm1042_vm15, %v1030_v54, %v1045_v17  ;;  %vm1204_vm2 = vweird.f32 %v5454_v7 }
 0x248   :  { %v5786_v55 = vmul.u32.u64.low %v5727_v2, %v1055_v1  ;;  %v5787_v8 = vmul.u32.u64.high %v5727_v2, %v1055_v1, %v5786_v55  ;;  %v5790_v32 = vmul.u32.u64.low %v5727_v2, %v1051_v48  ;;  %v5791_v44 = vmul.u32.u64.high %v5727_v2, %v1051_v48, %v5790_v32 }
 0x249   :  { %vm5797_vm3 = vcmp.le.f32.partialorder %v2776_v46, 0.7853982  ;;  %v3887_v43 = vadd.s32 4294967294, %v2844_v18  ;;  %v2863_v10 = vsel %vm2778_vm1, %v2862_v30, %v2838_v34  ;;  %v3881_v20 = vadd.s32 4294967169, %v2676_v22 }
 0x24a   :  { %vm1207_vm4 = vcmp.lt.s32.totalorder %v1206_v16, 2  ;;  %vm1208_vm5 = vcmp.eq.s32.totalorder %v1206_v16, 0  ;;  %vm1211_vm6 = vcmp.eq.s32.totalorder %v1206_v16, 2  ;;  %v1047_v52 = vsel %vm1041_vm14, %v1044_v3, %v1046_v24 }
 0x24b   :  { %v2832_v12 = vadd.s32 %v5695_v37, %v5704_v59  ;;  %vm3888_vm7 = vcmp.lt.s32.totalorder %v3887_v43, 0  ;;  %v2672_v46 = vand.u32 2147483647, %v5733_v53  ;;  %v2682_v61 = vadd.s32 1, %v3881_v20 }
 0x24c   :  { %v2847_v35 = vsel %vm3888_vm7, 0, %v3887_v43  ;;  %v2865_v13 = vsel %vm5797_vm3, 0, %v2863_v10  ;;  %vm1065_vm8 = vc.u32 %v5787_v8, %v5790_v32  ;;  %v1066_v34 = vadd.s32 1, %v5791_v44  ;;  %v5835_v43 = vpop.f32.mrb[10].mxu1 }
 0x24d   :  { %v4235_v23 = vpop.eup %4234  ;;  %v2848_v54 = vsub.s32 32, %v2847_v35  ;;  %v2852_v9 = vsub.s32 4294967266, %v2847_v35  ;;  %v1063_v37 = vmul.u32 %v5727_v2, %v1047_v52  ;;  %v2849_v62 = vshll.u32 %v5758_v11, %v2847_v35 }
 0x24e   :  { %v4237_v0 = vpop.eup %4236  ;;  %v1212_v41 = vxor.u32 2147483648, %v4235_v23  ;;  %v1067_v6 = vsel %vm1065_vm8, %v1066_v34, %v5791_v44  ;;  %vm2683_vm9 = vcmp.gt.s32.totalorder %v2682_v61, 0  ;;  %v2869_v47 = vadd.s32 3, %v2865_v13 }
 0x24f   :  { %v1209_v59 = vxor.u32 2147483648, %v4237_v0  ;;  %v2850_v33 = vshrl.u32 %v2832_v12, %v2848_v54  ;;  %v2853_v40 = vadd.s32 127, %v2852_v9  ;;  %v1068_v5 = vadd.s32 %v1067_v6, %v1063_v37 }
 0x250   :  { %v1213_v42 = vsel %vm1211_vm6, %v1212_v41, %v4237_v0  ;;  %v2679_v17 = vand.u32 8388607, %v2672_v46  ;;  %v2684_v45 = vsel %vm2683_vm9, %v2682_v61, 0  ;;  %v5825_v3 = vand.u32 3, %v2869_v47 }
 0x251   :  { %v1210_v26 = vsel %vm1208_vm5, %v4235_v23, %v1209_v59  ;;  %v2851_v36 = vor.u32 %v2850_v33, %v2849_v62  ;;  %v2854_v28 = vshll.u32 %v2853_v40, 23  ;;  %v1069_v11 = vadd.s32 536870912, %v1068_v5 }
 0x252   :  { %v1214_v2 = vsel %vm1207_vm4, %v1210_v26, %v1213_v42  ;;  %v2686_v30 = vand.u32 31, %v2684_v45  ;;  %v2680_v48 = vor.u32 8388608, %v2679_v17  ;;  %v5833_v44 = vadd.f32 %v5567_v51, %v5380_v19 }
 0x253   :  { %v1215_v4 = vsel %vm1204_vm2, nan, %v1214_v2  ;;  %v2855_v63 = vor.u32 4788187, %v2854_v28  ;;  %v5823_v57 = vshrl.u32 %v1069_v11, 30  ;;  %v2858_v18 = vcvt.s32.f32 %v2851_v36 }
 0x254   :  { %3719 = vst [vmem:[#allocation2 + $0x38] sm:$0xff] %v1215_v4  ;;  %v2687_v1 = vsub.s32 32, %v2686_v30  ;;  %v2689_v52 = vshll.u32 %v4343_v21, %v2686_v30  ;;  %v2685_v61 = vshrl.u32 %v2684_v45, 5  ;;  %v2692_v23 = vshll.u32 %v4344_v25, %v2686_v30 }
 0x255   :  { %v2856_v22 = vand.u32 2147483647, %v2855_v63  ;;  %v1071_v16 = vshll.u32 %v5823_v57, 30  ;;  %v2695_v35 = vshll.u32 %v4345_v27, %v2686_v30  ;;  %v5843_v13 = vshll.u32 %v2680_v48, 8 }
 0x256   :  { %v2690_v24 = vshrl.u32 %v4344_v25, %v2687_v1  ;;  %v2693_v55 = vshrl.u32 %v4345_v27, %v2687_v1  ;;  %v2696_v7 = vshrl.u32 %v4346_v29, %v2687_v1  ;;  %v2699_v12 = vshrl.u32 %v4347_v31, %v2687_v1 }
 0x257   :  { %v2859_v10 = vmul.f32 %v2858_v18, %v2856_v22  ;;  %v5837_v20 = vsub.s32 %v1068_v5, %v1071_v16  ;;  %v2698_v41 = vshll.u32 %v4346_v29, %v2686_v30  ;;  %v2701_v37 = vshll.u32 %v4347_v31, %v2686_v30 }
 0x258   :  { %v2691_v0 = vor.u32 %v2690_v24, %v2689_v52  ;;  %v2694_v54 = vor.u32 %v2693_v55, %v2692_v23  ;;  %v2697_v9 = vor.u32 %v2696_v7, %v2695_v35  ;;  %v2702_v59 = vshrl.u32 %v4348_v38, %v2687_v1 }
 0x259   :  { %v2860_v34 = vxor.u32 2147483648, %v2859_v10  ;;  %v1074_v19 = vsub.s32 0, %v5837_v20  ;;  %vm1010_vm10 = vcmp.lt.s32.totalorder %v5632_v50, 0  ;;  %v2700_v42 = vor.u32 %v2699_v12, %v2698_v41 }
 0x25a   :  { %v1323_v33 = vand.u32 2139095040, %v5833_v44  ;;  %v1094_v5 = vsub.s32 4, %v5823_v57  ;;  %v2688_v26 = vshrl.u32 %v4343_v21, %v2687_v1  ;;  %v2703_v47 = vor.u32 %v2702_v59, %v2701_v37 }
 0x25b   :  { %v2861_v62 = vsel %vm2778_vm1, %v2860_v34, %v2859_v10  ;;  %v3818_v6 = vmin.u32 %v1074_v19, %v5837_v20  ;;  %vm2704_vm11 = vcmp.lt.s32.totalorder %v2685_v61, 1  ;;  %vm2707_vm12 = vcmp.lt.s32.totalorder %v2685_v61, 4 }
 0x25c   :  { %v2864_v40 = vsel %vm5797_vm3, %v5571_v56, %v2861_v62  ;;  %vm5861_vm13 = vcmp.le.f32.partialorder %v1008_v49, 0.7853982  ;;  %vm2705_vm14 = vcmp.lt.s32.totalorder %v2685_v61, 2  ;;  %v2709_v2 = vsel %vm2707_vm12, %v2697_v9, 2102212464 }
 0x25d   :  { %4238 = vcosq.f32 %v2864_v40  ;;  %v1076_v17 = vclz %v3818_v6  ;;  %v2712_v15 = vsel %vm2704_vm11, %v2691_v0, %v2694_v54  ;;  %vm2706_vm15 = vcmp.lt.s32.totalorder %v2685_v61, 3 }
 0x25e   :  { %4240 = vsinq.f32 %v2864_v40  ;;  %v2713_v28 = vsel %vm2707_vm12, %v2700_v42, 920167782  ;;  %v2716_v11 = vsel %vm2704_vm11, %v2694_v54, %v2697_v9  ;;  %v2708_v4 = vsel %vm2704_vm11, %v2688_v26, %v2691_v0 }
 0x25f   :  { %v3819_v36 = vadd.s32 4294967294, %v1076_v17  ;;  %v2714_v30 = vsel %vm2706_vm15, %v2697_v9, %v2713_v28  ;;  %v2717_v63 = vsel %vm2707_vm12, %v2703_v47, 1326507024  ;;  %v1324_v48 = vshrl.u32 %v1323_v33, 23 }
 0x260   :  { %v2710_v1 = vsel %vm2706_vm15, %v2694_v54, %v2709_v2  ;;  %v2715_v22 = vsel %vm2705_vm14, %v2712_v15, %v2714_v30  ;;  %v2718_v18 = vsel %vm2706_vm15, %v2700_v42, %v2717_v63  ;;  %vm2872_vm1 = vcmp.eq.s32.totalorder %v5825_v3, 0 }
 0x261   :  { %vm3820_vm0 = vcmp.lt.s32.totalorder %v3819_v36, 0  ;;  %v2719_v16 = vsel %vm2705_vm14, %v2716_v11, %v2718_v18  ;;  %v5869_v24 = vmul.u32.u64.low %v5843_v13, %v2715_v22  ;;  %v5870_v55 = vmul.u32.u64.high %v5843_v13, %v2715_v22, %v5869_v24 }
 0x262   :  { %v1079_v49 = vsel %vm3820_vm0, 0, %v3819_v36  ;;  %vm2871_vm2 = vcmp.lt.s32.totalorder %v5825_v3, 2  ;;  %v1064_v7 = vadd.s32 %v5790_v32, %v5787_v8  ;;  %v3829_v12 = vadd.s32 4294967169, %v1324_v48  ;;  %v5886_v32 = vpop.f32.mrb[11].mxu0 }
 0x263   :  { %v1080_v10 = vsub.s32 32, %v1079_v49  ;;  %v1084_v52 = vsub.s32 4294967266, %v1079_v49  ;;  %vm2868_vm3 = vweird.f32 %v5571_v56  ;;  %v1095_v23 = vsel %vm1010_vm10, %v1094_v5, %v5823_v57 }
 0x264   :  { %v2711_v35 = vsel %vm2705_vm14, %v2708_v4, %v2710_v1  ;;  %v5882_v34 = vmul.u32.u64.low %v5843_v13, %v2719_v16  ;;  %v5883_v19 = vmul.u32.u64.high %v5843_v13, %v2719_v16, %v5882_v34  ;;  %v1081_v0 = vshll.u32 %v5837_v20, %v1079_v49 }
 0x265   :  { %v1082_v41 = vshrl.u32 %v1064_v7, %v1080_v10  ;;  %v1085_v54 = vadd.s32 127, %v1084_v52  ;;  %v1330_v8 = vadd.s32 1, %v3829_v12  ;;  %vm2875_vm4 = vcmp.eq.s32.totalorder %v5825_v3, 2 }
 0x266   :  { %v2730_v9 = vadd.s32 1, %v5870_v55  ;;  %v1320_v37 = vand.u32 2147483647, %v5833_v44  ;;  %v5893_v57 = vadd.f32 %v5567_v51, %v5456_v14  ;;  %v1097_v20 = vsel %vm5861_vm13, 0, %v1095_v23 }
 0x267   :  { %v4239_v61 = vpop.eup %4238  ;;  %v1083_v59 = vor.u32 %v1082_v41, %v1081_v0  ;;  %v1086_v62 = vshll.u32 %v1085_v54, 23  ;;  %vm1331_vm5 = vcmp.gt.s32.totalorder %v1330_v8, 0  ;;  %v2727_v33 = vmul.u32 %v5843_v13, %v2711_v35 }
 0x268   :  { %v4241_v6 = vpop.eup %4240  ;;  %v2876_v42 = vxor.u32 2147483648, %v4239_v61  ;;  %vm2729_vm6 = vc.u32 %v5883_v19, %v5869_v24  ;;  %v1332_v40 = vsel %vm1331_vm5, %v1330_v8, 0  ;;  %v5903_v47 = vadd.f32 %v5567_v51, %v5537_v58 }
 0x269   :  { %v2873_v5 = vxor.u32 2147483648, %v4241_v6  ;;  %v1087_v26 = vor.u32 4788187, %v1086_v62  ;;  %v2731_v14 = vsel %vm2729_vm6, %v2730_v9, %v5870_v55  ;;  %v1327_v15 = vand.u32 8388607, %v1320_v37 }
 0x26a   :  { %v2877_v17 = vsel %vm2875_vm4, %v2876_v42, %v4241_v6  ;;  %v2732_v2 = vadd.s32 %v2731_v14, %v2727_v33  ;;  %v1334_v13 = vand.u32 31, %v1332_v40  ;;  %v1090_v11 = vcvt.s32.f32 %v1083_v59 }
 0x26b   :  { %v2874_v36 = vsel %vm2872_vm1, %v4239_v61, %v2873_v5  ;;  %v1088_v28 = vand.u32 2147483647, %v1087_v26  ;;  %v1101_v4 = vadd.s32 3, %v1097_v20  ;;  %v2987_v51 = vand.u32 2139095040, %v5893_v57 }
 0x26c   :  { %v2878_v30 = vsel %vm2871_vm2, %v2874_v36, %v2877_v17  ;;  %v2733_v63 = vadd.s32 536870912, %v2732_v2  ;;  %v1335_v58 = vsub.s32 32, %v1334_v13  ;;  %v1337_v22 = vshll.u32 %v4343_v21, %v1334_v13 }
 0x26d   :  { %v2879_v48 = vsel %vm2868_vm3, nan, %v2878_v30  ;;  %v1091_v1 = vmul.f32 %v1090_v11, %v1088_v28  ;;  %v1340_v18 = vshll.u32 %v4344_v25, %v1334_v13  ;;  %v1343_v3 = vshll.u32 %v4345_v27, %v1334_v13  ;;  %v5947_v11 = vpop.f32.mrb[11].mxu1 }
 0x26e   :  { %3735 = vst [vmem:[#allocation2 + $0xb8] sm:$0xff] %v2879_v48  ;;  %v2734_v49 = vshrl.u32 %v2733_v63, 30  ;;  %v1338_v16 = vshrl.u32 %v4344_v25, %v1335_v58  ;;  %v1341_v55 = vshrl.u32 %v4345_v27, %v1335_v58  ;;  %v1344_v10 = vshrl.u32 %v4346_v29, %v1335_v58 }
 0x26f   :  { %v1092_v7 = vxor.u32 2147483648, %v1091_v1  ;;  %v1346_v52 = vshll.u32 %v4346_v29, %v1334_v13  ;;  %v1347_v56 = vshrl.u32 %v4347_v31, %v1335_v58  ;;  %v5924_v12 = vand.u32 3, %v1101_v4 }
 0x270   :  { %vm2674_vm7 = vcmp.lt.s32.totalorder %v5733_v53, 0  ;;  %v2735_v23 = vshll.u32 %v2734_v49, 30  ;;  %v1333_v35 = vshrl.u32 %v1332_v40, 5  ;;  %v1339_v34 = vor.u32 %v1338_v16, %v1337_v22 }
 0x271   :  { %v1093_v0 = vsel %vm1010_vm10, %v1092_v7, %v1091_v1  ;;  %v1342_v41 = vor.u32 %v1341_v55, %v1340_v18  ;;  %v1345_v54 = vor.u32 %v1344_v10, %v1343_v3  ;;  %v1348_v8 = vor.u32 %v1347_v56, %v1346_v52 }
 0x272   :  { %v1096_v9 = vsel %vm5861_vm13, %v5632_v50, %v1093_v0  ;;  %v5932_v61 = vsub.s32 %v2732_v2, %v2735_v23  ;;  %v1349_v59 = vshll.u32 %v4347_v31, %v1334_v13  ;;  %v1350_v62 = vshrl.u32 %v4348_v38, %v1335_v58 }
 0x273   :  { %4242 = vcosq.f32 %v1096_v9  ;;  %v1328_v20 = vor.u32 8388608, %v1327_v15  ;;  %v2984_v6 = vand.u32 2147483647, %v5893_v57  ;;  %v2988_v42 = vshrl.u32 %v2987_v51, 23 }
 0x274   :  { %4244 = vsinq.f32 %v1096_v9  ;;  %vm5939_vm8 = vcmp.le.f32.partialorder %v2672_v46, 0.7853982  ;;  %v2738_v45 = vsub.s32 0, %v5932_v61  ;;  %v1336_v40 = vshrl.u32 %v4343_v21, %v1335_v58 }
 0x275   :  { %v1351_v5 = vor.u32 %v1350_v62, %v1349_v59  ;;  %v2758_v26 = vsub.s32 4, %v2734_v49  ;;  %vm1352_vm9 = vcmp.lt.s32.totalorder %v1333_v35, 1  ;;  %vm1354_vm10 = vcmp.lt.s32.totalorder %v1333_v35, 3 }
 0x276   :  { %vm1355_vm11 = vcmp.lt.s32.totalorder %v1333_v35, 4  ;;  %v3882_v14 = vmin.u32 %v2738_v45, %v5932_v61  ;;  %v1360_v2 = vsel %vm1352_vm9, %v1339_v34, %v1342_v41  ;;  %v1364_v46 = vsel %vm1352_vm9, %v1342_v41, %v1345_v54 }
 0x277   :  { %v1357_v17 = vsel %vm1355_vm11, %v1345_v54, 2102212464  ;;  %v1361_v15 = vsel %vm1355_vm11, %v1348_v8, 920167782  ;;  %v1365_v36 = vsel %vm1355_vm11, %v1351_v5, 1326507024  ;;  %v1356_v30 = vsel %vm1352_vm9, %v1336_v40, %v1339_v34 }
 0x278   :  { %v1362_v13 = vsel %vm1354_vm10, %v1345_v54, %v1361_v15  ;;  %v1368_v28 = vshll.u32 %v1328_v20, 8  ;;  %v2740_v4 = vclz %v3882_v14  ;;  %vm1353_vm12 = vcmp.lt.s32.totalorder %v1333_v35, 2 }
 0x279   :  { %v1358_v63 = vsel %vm1354_vm10, %v1342_v41, %v1357_v17  ;;  %v2759_v58 = vsel %vm2674_vm7, %v2758_v26, %v2734_v49  ;;  %v1363_v51 = vsel %vm1353_vm12, %v1360_v2, %v1362_v13  ;;  %v1366_v48 = vsel %vm1354_vm10, %v1348_v8, %v1365_v36 }
 0x27a   :  { %v3893_v1 = vadd.s32 4294967169, %v2988_v42  ;;  %vm1100_vm13 = vweird.f32 %v5632_v50  ;;  %v3883_v22 = vadd.s32 4294967294, %v2740_v4  ;;  %v1367_v18 = vsel %vm1353_vm12, %v1364_v46, %v1366_v48 }
 0x27b   :  { %v5954_v16 = vmul.u32.u64.low %v1368_v28, %v1363_v51  ;;  %v5955_v55 = vmul.u32.u64.high %v1368_v28, %v1363_v51, %v5954_v16  ;;  %vm1103_vm14 = vcmp.lt.s32.totalorder %v5924_v12, 2  ;;  %v1359_v3 = vsel %vm1353_vm12, %v1356_v30, %v1358_v63 }
 0x27c   :  { %v5959_v7 = vmul.u32.u64.low %v1368_v28, %v1367_v18  ;;  %v5960_v10 = vmul.u32.u64.high %v1368_v28, %v1367_v18, %v5959_v7  ;;  %vm1104_vm15 = vcmp.eq.s32.totalorder %v5924_v12, 0  ;;  %vm1107_vm0 = vcmp.eq.s32.totalorder %v5924_v12, 2 }
 0x27d   :  { %vm3884_vm1 = vcmp.lt.s32.totalorder %v3883_v22, 0  ;;  %v2994_v49 = vadd.s32 1, %v3893_v1  ;;  %v4243_v52 = vpop.eup %4242  ;;  %v2728_v56 = vadd.s32 %v5869_v24, %v5883_v19  ;;  %v2761_v35 = vsel %vm5939_vm8, 0, %v2759_v58 }
 0x27e   :  { %v2743_v23 = vsel %vm3884_vm1, 0, %v3883_v22  ;;  %v2991_v34 = vand.u32 8388607, %v2984_v6  ;;  %v4245_v0 = vpop.eup %4244  ;;  %v1108_v41 = vxor.u32 2147483648, %v4243_v52  ;;  %v1375_v9 = vmul.u32 %v1368_v28, %v1359_v3 }
 0x27f   :  { %v2744_v54 = vsub.s32 32, %v2743_v23  ;;  %v2748_v8 = vsub.s32 4294967266, %v2743_v23  ;;  %v1105_v59 = vxor.u32 2147483648, %v4245_v0  ;;  %v2745_v62 = vshll.u32 %v5932_v61, %v2743_v23 }
 0x280   :  { %vm1377_vm2 = vc.u32 %v5960_v10, %v5954_v16  ;;  %v1378_v24 = vadd.s32 1, %v5955_v55  ;;  %v1109_v19 = vsel %vm1107_vm0, %v1108_v41, %v4245_v0  ;;  %vm2995_vm3 = vcmp.gt.s32.totalorder %v2994_v49, 0 }
 0x281   :  { %v2746_v20 = vshrl.u32 %v2728_v56, %v2744_v54  ;;  %v2749_v42 = vadd.s32 127, %v2748_v8  ;;  %v1106_v45 = vsel %vm1104_vm15, %v4243_v52, %v1105_v59  ;;  %v2765_v40 = vadd.s32 3, %v2761_v35 }
 0x282   :  { %v1379_v5 = vsel %vm1377_vm2, %v1378_v24, %v5955_v55  ;;  %v2996_v26 = vsel %vm2995_vm3, %v2994_v49, 0  ;;  %v1110_v61 = vsel %vm1103_vm14, %v1106_v45, %v1109_v19  ;;  %v2992_v4 = vor.u32 8388608, %v2991_v34 }
 0x283   :  { %v2747_v14 = vor.u32 %v2746_v20, %v2745_v62  ;;  %v2750_v17 = vshll.u32 %v2749_v42, 23  ;;  %v1380_v2 = vadd.s32 %v1379_v5, %v1375_v9  ;;  %v1111_v15 = vsel %vm1100_vm13, nan, %v1110_v61 }
 0x284   :  { %v2998_v13 = vand.u32 31, %v2996_v26  ;;  %3718 = vst [vmem:[#allocation2 + $0x30] sm:$0xff] %v1111_v15  ;;  %v5983_v28 = vand.u32 3, %v2765_v40  ;;  %v1219_v12 = vand.u32 2139095040, %v5903_v47  ;;  %v2997_v48 = vshrl.u32 %v2996_v26, 5 }
 0x285   :  { %v2751_v46 = vor.u32 4788187, %v2750_v17  ;;  %v1381_v36 = vadd.s32 536870912, %v1380_v2  ;;  %v2754_v58 = vcvt.s32.f32 %v2747_v14  ;;  %v1216_v41 = vand.u32 2147483647, %v5903_v47 }
 0x286   :  { %v2999_v30 = vsub.s32 32, %v2998_v13  ;;  %v3007_v3 = vshll.u32 %v4345_v27, %v2998_v13  ;;  %v3001_v49 = vshll.u32 %v4343_v21, %v2998_v13  ;;  %v3004_v52 = vshll.u32 %v4344_v25, %v2998_v13 }
 0x287   :  { %v2752_v63 = vand.u32 2147483647, %v2751_v46  ;;  %v5985_v51 = vshrl.u32 %v1381_v36, 30  ;;  %v3010_v56 = vshll.u32 %v4346_v29, %v2998_v13  ;;  %v3013_v59 = vshll.u32 %v4347_v31, %v2998_v13 }
 0x288   :  { %v3002_v1 = vshrl.u32 %v4344_v25, %v2999_v30  ;;  %v3005_v50 = vshrl.u32 %v4345_v27, %v2999_v30  ;;  %v3008_v22 = vshrl.u32 %v4346_v29, %v2999_v30  ;;  %v3011_v7 = vshrl.u32 %v4347_v31, %v2999_v30 }
 0x289   :  { %v2755_v18 = vmul.f32 %v2754_v58, %v2752_v63  ;;  %v1383_v55 = vshll.u32 %v5985_v51, 30  ;;  %v3014_v23 = vshrl.u32 %v4348_v38, %v2999_v30  ;;  %v6005_v19 = vshll.u32 %v2992_v4, 8 }
 0x28a   :  { %v3009_v0 = vor.u32 %v3008_v22, %v3007_v3  ;;  %v3003_v54 = vor.u32 %v3002_v1, %v3001_v49  ;;  %v3006_v8 = vor.u32 %v3005_v50, %v3004_v52  ;;  %v3012_v9 = vor.u32 %v3011_v7, %v3010_v56 }
 0x28b   :  { %v2756_v35 = vxor.u32 2147483648, %v2755_v18  ;;  %v5998_v34 = vsub.s32 %v1380_v2, %v1383_v55  ;;  %v1220_v20 = vshrl.u32 %v1219_v12, 23  ;;  %v3000_v45 = vshrl.u32 %v4343_v21, %v2999_v30 }
 0x28c   :  { %v3015_v40 = vor.u32 %v3014_v23, %v3013_v59  ;;  %vm3019_vm4 = vcmp.lt.s32.totalorder %v2997_v48, 4  ;;  %vm3016_vm5 = vcmp.lt.s32.totalorder %v2997_v48, 1  ;;  %vm3018_vm6 = vcmp.lt.s32.totalorder %v2997_v48, 3 }
 0x28d   :  { %v2757_v62 = vsel %vm2674_vm7, %v2756_v35, %v2755_v18  ;;  %v1386_v24 = vsub.s32 0, %v5998_v34  ;;  %v3021_v26 = vsel %vm3019_vm4, %v3009_v0, 2102212464  ;;  %v3024_v61 = vsel %vm3016_vm5, %v3003_v54, %v3006_v8 }
 0x28e   :  { %v2760_v42 = vsel %vm5939_vm8, %v5733_v53, %v2757_v62  ;;  %v3025_v14 = vsel %vm3019_vm4, %v3012_v9, 920167782  ;;  %vm6016_vm7 = vcmp.le.f32.partialorder %v1320_v37, 0.7853982  ;;  %v3020_v2 = vsel %vm3016_vm5, %v3000_v45, %v3003_v54 }
 0x28f   :  { %4246 = vcosq.f32 %v2760_v42  ;;  %v3830_v5 = vmin.u32 %v1386_v24, %v5998_v34  ;;  %v3022_v15 = vsel %vm3018_vm6, %v3006_v8, %v3021_v26  ;;  %v3028_v13 = vsel %vm3016_vm5, %v3006_v8, %v3009_v0 }
 0x290   :  { %4248 = vsinq.f32 %v2760_v42  ;;  %vm3017_vm8 = vcmp.lt.s32.totalorder %v2997_v48, 2  ;;  %v3026_v46 = vsel %vm3018_vm6, %v3009_v0, %v3025_v14  ;;  %v3029_v36 = vsel %vm3019_vm4, %v3015_v40, 1326507024 }
 0x291   :  { %v1388_v17 = vclz %v3830_v5  ;;  %v3825_v4 = vadd.s32 4294967169, %v1220_v20  ;;  %v1406_v63 = vsub.s32 4, %v5985_v51  ;;  %v3027_v58 = vsel %vm3017_vm8, %v3024_v61, %v3026_v46  ;;  %v6049_v20 = vpop.f32.mrb[12].mxu0  ;;  %v6057_v61 = vld [vmem:[%s7173_s2] ss:$0 sm:$0xff] }
 0x292   :  { %v3030_v12 = vsel %vm3018_vm6, %v3012_v9, %v3029_v36  ;;  %v3023_v1 = vsel %vm3017_vm8, %v3020_v2, %v3022_v15  ;;  %v6023_v37 = vmul.u32.u64.low %v6005_v19, %v3027_v58  ;;  %v6024_v22 = vmul.u32.u64.high %v6005_v19, %v3027_v58, %v6023_v37 }
 0x293   :  { %v3831_v30 = vadd.s32 4294967294, %v1388_v17  ;;  %v3031_v50 = vsel %vm3017_vm8, %v3028_v13, %v3030_v12  ;;  %v1226_v48 = vadd.s32 1, %v3825_v4  ;;  %vm2764_vm10 = vweird.f32 %v5733_v53 }
 0x294   :  { %v6028_v18 = vmul.u32.u64.low %v6005_v19, %v3031_v50  ;;  %v6029_v55 = vmul.u32.u64.high %v6005_v19, %v3031_v50, %v6028_v18  ;;  %vm2771_vm11 = vcmp.eq.s32.totalorder %v5983_v28, 2  ;;  %vm1322_vm12 = vcmp.lt.s32.totalorder %v5833_v44, 0 }
 0x295   :  { %vm3832_vm9 = vcmp.lt.s32.totalorder %v3831_v30, 0  ;;  %v1376_v3 = vadd.s32 %v5954_v16, %v5960_v10  ;;  %v1407_v56 = vsel %vm1322_vm12, %v1406_v63, %v5985_v51  ;;  %vm1227_vm13 = vcmp.gt.s32.totalorder %v1226_v48, 0 }
 0x296   :  { %v1391_v7 = vsel %vm3832_vm9, 0, %v3831_v30  ;;  %v3039_v23 = vmul.u32 %v6005_v19, %v3023_v1  ;;  %v3042_v35 = vadd.s32 1, %v6024_v22  ;;  %v1223_v0 = vand.u32 8388607, %v1216_v41 }
 0x297   :  { %v1392_v49 = vsub.s32 32, %v1391_v7  ;;  %v1396_v52 = vsub.s32 4294967266, %v1391_v7  ;;  %v1228_v54 = vsel %vm1227_vm13, %v1226_v48, 0  ;;  %v1393_v9 = vshll.u32 %v5998_v34, %v1391_v7 }
 0x298   :  { %vm3041_vm14 = vc.u32 %v6029_v55, %v6023_v37  ;;  %v1409_v51 = vsel %vm6016_vm7, 0, %v1407_v56  ;;  %v1230_v19 = vand.u32 31, %v1228_v54  ;;  %vm2768_vm15 = vcmp.eq.s32.totalorder %v5983_v28, 0 }
 0x299   :  { %v4247_v8 = vpop.eup %4246  ;;  %v1394_v16 = vshrl.u32 %v1376_v3, %v1392_v49  ;;  %v1397_v10 = vadd.s32 127, %v1396_v52  ;;  %v3043_v24 = vsel %vm3041_vm14, %v3042_v35, %v6024_v22  ;;  %v6061_v14 = vadd.f32 %v6057_v61, %v5612_v60 }
 0x29a   :  { %v4249_v59 = vpop.eup %4248  ;;  %v2772_v62 = vxor.u32 2147483648, %v4247_v8  ;;  %v3044_v5 = vadd.s32 %v3043_v24, %v3039_v23  ;;  %v1231_v26 = vsub.s32 32, %v1230_v19  ;;  %vm2767_vm0 = vcmp.lt.s32.totalorder %v5983_v28, 2 }
 0x29b   :  { %v2769_v42 = vxor.u32 2147483648, %v4249_v59  ;;  %v1395_v45 = vor.u32 %v1394_v16, %v1393_v9  ;;  %v1398_v40 = vshll.u32 %v1397_v10, 23  ;;  %v1413_v46 = vadd.s32 3, %v1409_v51 }
 0x29c   :  { %v2773_v34 = vsel %vm2771_vm11, %v2772_v62, %v4249_v59  ;;  %v3045_v15 = vadd.s32 536870912, %v3044_v5  ;;  %v1224_v36 = vor.u32 8388608, %v1223_v0  ;;  %v6066_v4 = vadd.f32 %v6057_v61, %v5706_v39 }
 0x29d   :  { %v2770_v17 = vsel %vm2768_vm15, %v4247_v8, %v2769_v42  ;;  %v1399_v2 = vor.u32 4788187, %v1398_v40  ;;  %v1402_v58 = vcvt.s32.f32 %v1395_v45  ;;  %v1229_v60 = vshrl.u32 %v1228_v54, 5 }
 0x29e   :  { %v2774_v13 = vsel %vm2767_vm0, %v2770_v17, %v2773_v34  ;;  %v3046_v12 = vshrl.u32 %v3045_v15, 30  ;;  %v1234_v28 = vshrl.u32 %v4344_v25, %v1231_v26  ;;  %v1237_v1 = vshrl.u32 %v4345_v27, %v1231_v26 }
 0x29f   :  { %v2775_v30 = vsel %vm2764_vm10, nan, %v2774_v13  ;;  %v1400_v63 = vand.u32 2147483647, %v1399_v2  ;;  %v1240_v50 = vshrl.u32 %v4346_v29, %v1231_v26  ;;  %v1239_v48 = vshll.u32 %v4345_v27, %v1230_v19 }
 0x2a0   :  { %3734 = vst [vmem:[#allocation2 + $0xb0] sm:$0xff] %v2775_v30  ;;  %v3047_v18 = vshll.u32 %v3046_v12, 30  ;;  %v1243_v39 = vshrl.u32 %v4347_v31, %v1231_v26  ;;  %vm2986_vm1 = vcmp.lt.s32.totalorder %v5893_v57, 0  ;;  %v1233_v53 = vshll.u32 %v4343_v21, %v1230_v19 }
 0x2a1   :  { %v1403_v22 = vmul.f32 %v1402_v58, %v1400_v63  ;;  %v1236_v3 = vshll.u32 %v4344_v25, %v1230_v19  ;;  %v1242_v7 = vshll.u32 %v4346_v29, %v1230_v19  ;;  %v1246_v49 = vshrl.u32 %v4348_v38, %v1231_v26 }
 0x2a2   :  { %v6080_v56 = vand.u32 3, %v1413_v46  ;;  %v6082_v23 = vsub.s32 %v3044_v5, %v3047_v18  ;;  %v1241_v35 = vor.u32 %v1240_v50, %v1239_v48  ;;  %v1235_v0 = vor.u32 %v1234_v28, %v1233_v53  ;;  %v6103_v46 = vpop.f32.mrb[12].mxu1 }
 0x2a3   :  { %v1404_v52 = vxor.u32 2147483648, %v1403_v22  ;;  %v1238_v54 = vor.u32 %v1237_v1, %v1236_v3  ;;  %v1244_v8 = vor.u32 %v1243_v39, %v1242_v7  ;;  %v1245_v9 = vshll.u32 %v4347_v31, %v1230_v19 }
 0x2a4   :  { %v3050_v10 = vsub.s32 0, %v6082_v23  ;;  %v1232_v59 = vshrl.u32 %v4343_v21, %v1231_v26  ;;  %v1264_v62 = vshll.u32 %v1224_v36, 8  ;;  %v3070_v24 = vsub.s32 4, %v3046_v12 }
 0x2a5   :  { %v1405_v16 = vsel %vm1322_vm12, %v1404_v52, %v1403_v22  ;;  %v1247_v42 = vor.u32 %v1246_v49, %v1245_v9  ;;  %vm1251_vm2 = vcmp.lt.s32.totalorder %v1229_v60, 4  ;;  %vm6094_vm3 = vcmp.le.f32.partialorder %v2984_v6, 0.7853982 }
 0x2a6   :  { %v1408_v51 = vsel %vm6016_vm7, %v5833_v44, %v1405_v16  ;;  %v3894_v45 = vmin.u32 %v3050_v10, %v6082_v23  ;;  %vm1248_vm4 = vcmp.lt.s32.totalorder %v1229_v60, 1  ;;  %v1253_v40 = vsel %vm1251_vm2, %v1241_v35, 2102212464 }
 0x2a7   :  { %4250 = vcosq.f32 %v1408_v51  ;;  %vm1249_vm5 = vcmp.lt.s32.totalorder %v1229_v60, 2  ;;  %v1256_v5 = vsel %vm1248_vm4, %v1235_v0, %v1238_v54  ;;  %v1257_v33 = vsel %vm1251_vm2, %v1244_v8, 920167782 }
 0x2a8   :  { %4252 = vsinq.f32 %v1408_v51  ;;  %v3052_v34 = vclz %v3894_v45  ;;  %vm1250_vm6 = vcmp.lt.s32.totalorder %v1229_v60, 3  ;;  %v1252_v26 = vsel %vm1248_vm4, %v1232_v59, %v1235_v0 }
 0x2a9   :  { %v1260_v17 = vsel %vm1248_vm4, %v1238_v54, %v1241_v35  ;;  %v1254_v2 = vsel %vm1250_vm6, %v1238_v54, %v1253_v40  ;;  %v1258_v15 = vsel %vm1250_vm6, %v1241_v35, %v1257_v33  ;;  %v1261_v6 = vsel %vm1251_vm2, %v1247_v42, 1326507024 }
 0x2aa   :  { %v2883_v13 = vand.u32 2139095040, %v6061_v14  ;;  %v3895_v36 = vadd.s32 4294967294, %v3052_v34  ;;  %v3071_v30 = vsel %vm2986_vm1, %v3070_v24, %v3046_v12  ;;  %v1259_v63 = vsel %vm1249_vm5, %v1256_v5, %v1258_v15 }
 0x2ab   :  { %v1262_v58 = vsel %vm1250_vm6, %v1244_v8, %v1261_v6  ;;  %v6109_v1 = vmul.u32.u64.low %v1264_v62, %v1259_v63  ;;  %v6110_v50 = vmul.u32.u64.high %v1264_v62, %v1259_v63, %v6109_v1  ;;  %v1255_v18 = vsel %vm1249_vm5, %v1252_v26, %v1254_v2 }
 0x2ac   :  { %v1263_v28 = vsel %vm1249_vm5, %v1260_v17, %v1262_v58  ;;  %v2884_v22 = vshrl.u32 %v2883_v13, 23  ;;  %vm3896_vm7 = vcmp.lt.s32.totalorder %v3895_v36, 0  ;;  %vm1415_vm8 = vcmp.lt.s32.totalorder %v6080_v56, 2 }
 0x2ad   :  { %v6114_v48 = vmul.u32.u64.low %v1264_v62, %v1263_v28  ;;  %v6115_v39 = vmul.u32.u64.high %v1264_v62, %v1263_v28, %v6114_v48  ;;  %vm1416_vm9 = vcmp.eq.s32.totalorder %v6080_v56, 0  ;;  %v3055_v12 = vsel %vm3896_vm7, 0, %v3895_v36 }
 0x2ae   :  { %v3889_v53 = vadd.s32 4294967169, %v2884_v22  ;;  %v3040_v3 = vadd.s32 %v6023_v37, %v6029_v55  ;;  %v3056_v7 = vsub.s32 32, %v3055_v12  ;;  %v3060_v49 = vsub.s32 4294967266, %v3055_v12 }
 0x2af   :  { %v2880_v52 = vand.u32 2147483647, %v6061_v14  ;;  %v3073_v60 = vsel %vm6094_vm3, 0, %v3071_v30  ;;  %v1271_v35 = vmul.u32 %v1264_v62, %v1255_v18  ;;  %v1274_v0 = vadd.s32 1, %v6110_v50 }
 0x2b0   :  { %v2890_v54 = vadd.s32 1, %v3889_v53  ;;  %v3057_v9 = vshll.u32 %v6082_v23, %v3055_v12  ;;  %v3058_v16 = vshrl.u32 %v3040_v3, %v3056_v7  ;;  %v3061_v10 = vadd.s32 127, %v3060_v49 }
 0x2b1   :  { %v4251_v8 = vpop.eup %4250  ;;  %vm1273_vm10 = vc.u32 %v6115_v39, %v6109_v1  ;;  %vm1419_vm11 = vcmp.eq.s32.totalorder %v6080_v56, 2  ;;  %v3077_v40 = vadd.s32 3, %v3073_v60  ;;  %v2887_v23 = vand.u32 8388607, %v2880_v52 }
 0x2b2   :  { %v4253_v37 = vpop.eup %4252  ;;  %v1420_v55 = vxor.u32 2147483648, %v4251_v8  ;;  %v1275_v59 = vsel %vm1273_vm10, %v1274_v0, %v6110_v50  ;;  %vm2891_vm12 = vcmp.gt.s32.totalorder %v2890_v54, 0  ;;  %v3059_v62 = vor.u32 %v3058_v16, %v3057_v9 }
 0x2b3   :  { %v1417_v51 = vxor.u32 2147483648, %v4253_v37  ;;  %v3062_v24 = vshll.u32 %v3061_v10, 23  ;;  %v1276_v42 = vadd.s32 %v1275_v59, %v1271_v35  ;;  %v2892_v5 = vsel %vm2891_vm12, %v2890_v54, 0 }
 0x2b4   :  { %v1421_v45 = vsel %vm1419_vm11, %v1420_v55, %v4253_v37  ;;  %v1531_v17 = vand.u32 2139095040, %v6066_v4  ;;  %vm1412_vm13 = vweird.f32 %v5833_v44  ;;  %v2894_v15 = vand.u32 31, %v2892_v5 }
 0x2b5   :  { %v1418_v33 = vsel %vm1416_vm9, %v4251_v8, %v1417_v51  ;;  %v3063_v34 = vor.u32 4788187, %v3062_v24  ;;  %v1277_v26 = vadd.s32 536870912, %v1276_v42  ;;  %v3066_v36 = vcvt.s32.f32 %v3059_v62 }
 0x2b6   :  { %v1422_v2 = vsel %vm1415_vm8, %v1418_v33, %v1421_v45  ;;  %v6140_v63 = vand.u32 3, %v3077_v40  ;;  %v2888_v58 = vor.u32 8388608, %v2887_v23  ;;  %v2895_v28 = vsub.s32 32, %v2894_v15 }
 0x2b7   :  { %v1423_v6 = vsel %vm1412_vm13, nan, %v1422_v2  ;;  %v3064_v13 = vand.u32 2147483647, %v3063_v34  ;;  %v6138_v30 = vshrl.u32 %v1277_v26, 30  ;;  %v1528_v50 = vand.u32 2147483647, %v6066_v4 }
 0x2b8   :  { %3721 = vst [vmem:[#allocation2 + $0x48] sm:$0xff] %v1423_v6  ;;  %v2897_v44 = vshll.u32 %v4343_v21, %v2894_v15  ;;  %v1532_v56 = vshrl.u32 %v1531_v17, 23  ;;  %v2898_v48 = vshrl.u32 %v4344_v25, %v2895_v28  ;;  %v2900_v12 = vshll.u32 %v4344_v25, %v2894_v15 }
 0x2b9   :  { %v3067_v22 = vmul.f32 %v3066_v36, %v3064_v13  ;;  %v1279_v18 = vshll.u32 %v6138_v30, 30  ;;  %v2901_v53 = vshrl.u32 %v4345_v27, %v2895_v28  ;;  %v2904_v3 = vshrl.u32 %v4346_v29, %v2895_v28 }
 0x2ba   :  { %v2903_v60 = vshll.u32 %v4345_v27, %v2894_v15  ;;  %v2907_v35 = vshrl.u32 %v4347_v31, %v2895_v28  ;;  %v2893_v0 = vshrl.u32 %v2892_v5, 5  ;;  %v2899_v54 = vor.u32 %v2898_v48, %v2897_v44 }
 0x2bb   :  { %v3068_v7 = vxor.u32 2147483648, %v3067_v22  ;;  %v6149_v49 = vsub.s32 %v1276_v42, %v1279_v18  ;;  %v2906_v8 = vshll.u32 %v4346_v29, %v2894_v15  ;;  %v6154_v9 = vshll.u32 %v2888_v58, 8 }
 0x2bc   :  { %v2902_v37 = vor.u32 %v2901_v53, %v2900_v12  ;;  %v2905_v55 = vor.u32 %v2904_v3, %v2903_v60  ;;  %vm1218_vm14 = vcmp.lt.s32.totalorder %v5903_v47, 0  ;;  %v2909_v62 = vshll.u32 %v4347_v31, %v2894_v15  ;;  %v6195_v60 = vpop.f32.mrb[13].mxu0 }
 0x2bd   :  { %v3069_v16 = vsel %vm2986_vm1, %v3068_v7, %v3067_v22  ;;  %v1282_v10 = vsub.s32 0, %v6149_v49  ;;  %v2908_v51 = vor.u32 %v2907_v35, %v2906_v8  ;;  %v2910_v24 = vshrl.u32 %v4348_v38, %v2895_v28 }
 0x2be   :  { %v3072_v59 = vsel %vm6094_vm3, %v5893_v57, %v3069_v16  ;;  %v1272_v42 = vadd.s32 %v6109_v1, %v6115_v39  ;;  %v3837_v40 = vadd.s32 4294967169, %v1532_v56  ;;  %v1302_v23 = vsub.s32 4, %v6138_v30 }
 0x2bf   :  { %4254 = vcosq.f32 %v3072_v59  ;;  %v3826_v45 = vmin.u32 %v1282_v10, %v6149_v49  ;;  %v2896_v19 = vshrl.u32 %v4343_v21, %v2895_v28  ;;  %v2911_v5 = vor.u32 %v2910_v24, %v2909_v62 }
 0x2c0   :  { %4256 = vsinq.f32 %v3072_v59  ;;  %vm6172_vm15 = vcmp.le.f32.partialorder %v1216_v41, 0.7853982  ;;  %vm2912_vm0 = vcmp.lt.s32.totalorder %v2893_v0, 1  ;;  %vm2913_vm1 = vcmp.lt.s32.totalorder %v2893_v0, 2 }
 0x2c1   :  { %v1284_v34 = vclz %v3826_v45  ;;  %vm2915_vm2 = vcmp.lt.s32.totalorder %v2893_v0, 4  ;;  %vm2914_vm3 = vcmp.lt.s32.totalorder %v2893_v0, 3  ;;  %v2920_v39 = vsel %vm2912_vm0, %v2899_v54, %v2902_v37 }
 0x2c2   :  { %v2917_v1 = vsel %vm2915_vm2, %v2905_v55, 2102212464  ;;  %v2921_v26 = vsel %vm2915_vm2, %v2908_v51, 920167782  ;;  %vm3083_vm4 = vcmp.eq.s32.totalorder %v6140_v63, 2  ;;  %v2916_v2 = vsel %vm2912_vm0, %v2896_v19, %v2899_v54 }
 0x2c3   :  { %v3827_v17 = vadd.s32 4294967294, %v1284_v34  ;;  %v2922_v15 = vsel %vm2914_vm3, %v2905_v55, %v2921_v26  ;;  %v2924_v6 = vsel %vm2912_vm0, %v2902_v37, %v2905_v55  ;;  %vm3080_vm5 = vcmp.eq.s32.totalorder %v6140_v63, 0 }
 0x2c4   :  { %v2918_v41 = vsel %vm2914_vm3, %v2902_v37, %v2917_v1  ;;  %v2923_v13 = vsel %vm2913_vm1, %v2920_v39, %v2922_v15  ;;  %v2925_v36 = vsel %vm2915_vm2, %v2911_v5, 1326507024  ;;  %v1538_v58 = vadd.s32 1, %v3837_v40 }
 0x2c5   :  { %vm3079_vm6 = vcmp.lt.s32.totalorder %v6140_v63, 2  ;;  %vm3828_vm7 = vcmp.lt.s32.totalorder %v3827_v17, 0  ;;  %v2926_v28 = vsel %vm2914_vm3, %v2908_v51, %v2925_v36  ;;  %vm3076_vm8 = vweird.f32 %v5893_v57 }
 0x2c6   :  { %v6184_v22 = vmul.u32.u64.low %v6154_v9, %v2923_v13  ;;  %v6185_v18 = vmul.u32.u64.high %v6154_v9, %v2923_v13, %v6184_v22  ;;  %v1287_v44 = vsel %vm3828_vm7, 0, %v3827_v17  ;;  %v2927_v56 = vsel %vm2913_vm1, %v2924_v6, %v2926_v28 }
 0x2c7   :  { %v1535_v48 = vand.u32 8388607, %v1528_v50  ;;  %vm1539_vm9 = vcmp.gt.s32.totalorder %v1538_v58, 0  ;;  %v1288_v12 = vsub.s32 32, %v1287_v44  ;;  %v1292_v53 = vsub.s32 4294967266, %v1287_v44 }
 0x2c8   :  { %v1303_v3 = vsel %vm1218_vm14, %v1302_v23, %v6138_v30  ;;  %v1540_v7 = vsel %vm1539_vm9, %v1538_v58, 0  ;;  %v2919_v35 = vsel %vm2913_vm1, %v2916_v2, %v2918_v41  ;;  %v1289_v37 = vshll.u32 %v6149_v49, %v1287_v44 }
 0x2c9   :  { %v6199_v54 = vmul.u32.u64.low %v6154_v9, %v2927_v56  ;;  %v6200_v8 = vmul.u32.u64.high %v6154_v9, %v2927_v56, %v6199_v54  ;;  %v1542_v16 = vand.u32 31, %v1540_v7  ;;  %v4255_v10 = vpop.eup %4254  ;;  %v1290_v55 = vshrl.u32 %v1272_v42, %v1288_v12 }
 0x2ca   :  { %v1293_v59 = vadd.s32 127, %v1292_v53  ;;  %v2938_v51 = vadd.s32 1, %v6185_v18  ;;  %v4257_v62 = vpop.eup %4256  ;;  %v3084_v24 = vxor.u32 2147483648, %v4255_v10  ;;  %v1305_v30 = vsel %vm6172_vm15, 0, %v1303_v3 }
 0x2cb   :  { %v1536_v45 = vor.u32 8388608, %v1535_v48  ;;  %v1543_v0 = vsub.s32 32, %v1542_v16  ;;  %v3081_v40 = vxor.u32 2147483648, %v4257_v62  ;;  %v1291_v23 = vor.u32 %v1290_v55, %v1289_v37 }
 0x2cc   :  { %v1294_v19 = vshll.u32 %v1293_v59, 23  ;;  %v2935_v5 = vmul.u32 %v6154_v9, %v2919_v35  ;;  %v3085_v34 = vsel %vm3083_vm4, %v3084_v24, %v4257_v62  ;;  %vm2937_vm10 = vc.u32 %v6200_v8, %v6184_v22 }
 0x2cd   :  { %v6211_v49 = vshrl.u32 %v1540_v7, 5  ;;  %v1545_v42 = vshll.u32 %v4343_v21, %v1542_v16  ;;  %v3082_v1 = vsel %vm3080_vm5, %v4255_v10, %v3081_v40  ;;  %v2939_v26 = vsel %vm2937_vm10, %v2938_v51, %v6185_v18 }
 0x2ce   :  { %v1295_v39 = vor.u32 4788187, %v1294_v19  ;;  %v1548_v17 = vshll.u32 %v4344_v25, %v1542_v16  ;;  %v3086_v9 = vsel %vm3079_vm6, %v3082_v1, %v3085_v34  ;;  %v2940_v2 = vadd.s32 %v2939_v26, %v2935_v5 }
 0x2cf   :  { %v1546_v15 = vshrl.u32 %v4344_v25, %v1543_v0  ;;  %v1549_v6 = vshrl.u32 %v4345_v27, %v1543_v0  ;;  %v3087_v41 = vsel %vm3076_vm8, nan, %v3086_v9  ;;  %v1298_v36 = vcvt.s32.f32 %v1291_v23 }
 0x2d0   :  { %v1296_v13 = vand.u32 2147483647, %v1295_v39  ;;  %v1552_v58 = vshrl.u32 %v4346_v29, %v1543_v0  ;;  %3737 = vst [vmem:[#allocation2 + $0xc8] sm:$0xff] %v3087_v41  ;;  %v2941_v28 = vadd.s32 536870912, %v2940_v2  ;;  %v1551_v18 = vshll.u32 %v4345_v27, %v1542_v16  ;;  %v6277_v41 = vpop.f32.mrb[13].mxu1 }
 0x2d1   :  { %v1554_v44 = vshll.u32 %v4346_v29, %v1542_v16  ;;  %v1555_v63 = vshrl.u32 %v4347_v31, %v1543_v0  ;;  %v1547_v48 = vor.u32 %v1546_v15, %v1545_v42  ;;  %v1550_v12 = vor.u32 %v1549_v6, %v1548_v17 }
 0x2d2   :  { %v1299_v56 = vmul.f32 %v1298_v36, %v1296_v13  ;;  %v1558_v53 = vshrl.u32 %v4348_v38, %v1543_v0  ;;  %v2942_v3 = vshrl.u32 %v2941_v28, 30  ;;  %v1309_v35 = vadd.s32 3, %v1305_v30 }
 0x2d3   :  { %v1556_v57 = vor.u32 %v1555_v63, %v1554_v44  ;;  %v1553_v54 = vor.u32 %v1552_v58, %v1551_v18  ;;  %v1557_v10 = vshll.u32 %v4347_v31, %v1542_v16  ;;  %vm1560_vm11 = vcmp.lt.s32.totalorder %v6211_v49, 1 }
 0x2d4   :  { %v1300_v7 = vxor.u32 2147483648, %v1299_v56  ;;  %v2943_v37 = vshll.u32 %v2942_v3, 30  ;;  %vm1563_vm12 = vcmp.lt.s32.totalorder %v6211_v49, 4  ;;  %v6232_v55 = vshll.u32 %v1536_v45, 8 }
 0x2d5   :  { %v1559_v51 = vor.u32 %v1558_v53, %v1557_v10  ;;  %v1568_v62 = vsel %vm1560_vm11, %v1547_v48, %v1550_v12  ;;  %v1569_v24 = vsel %vm1563_vm12, %v1556_v57, 920167782  ;;  %v1544_v40 = vshrl.u32 %v4343_v21, %v1543_v0 }
 0x2d6   :  { %v1301_v59 = vsel %vm1218_vm14, %v1300_v7, %v1299_v56  ;;  %v6243_v30 = vsub.s32 %v2940_v2, %v2943_v37  ;;  %vm1562_vm13 = vcmp.lt.s32.totalorder %v6211_v49, 3  ;;  %vm1561_vm14 = vcmp.lt.s32.totalorder %v6211_v49, 2 }
 0x2d7   :  { %v1304_v16 = vsel %vm6172_vm15, %v5903_v47, %v1301_v59  ;;  %v1565_v45 = vsel %vm1563_vm12, %v1553_v54, 2102212464  ;;  %v1570_v23 = vsel %vm1562_vm13, %v1553_v54, %v1569_v24  ;;  %v1572_v0 = vsel %vm1560_vm11, %v1550_v12, %v1553_v54 }
 0x2d8   :  { %4258 = vcosq.f32 %v1304_v16  ;;  %v2946_v19 = vsub.s32 0, %v6243_v30  ;;  %v1571_v33 = vsel %vm1561_vm14, %v1568_v62, %v1570_v23  ;;  %v2966_v5 = vsub.s32 4, %v2942_v3 }
 0x2d9   :  { %4260 = vsinq.f32 %v1304_v16  ;;  %v1573_v34 = vsel %vm1563_vm12, %v1559_v51, 1326507024  ;;  %v6260_v42 = vmul.u32.u64.low %v6232_v55, %v1571_v33  ;;  %v6261_v1 = vmul.u32.u64.high %v6232_v55, %v1571_v33, %v6260_v42 }
 0x2da   :  { %v1310_v39 = vand.u32 3, %v1309_v35  ;;  %v3890_v26 = vmin.u32 %v2946_v19, %v6243_v30  ;;  %v1574_v17 = vsel %vm1562_vm13, %v1556_v57, %v1573_v34  ;;  %v1564_v9 = vsel %vm1560_vm11, %v1544_v40, %v1547_v48 }
 0x2db   :  { %v1566_v2 = vsel %vm1562_vm13, %v1550_v12, %v1565_v45  ;;  %v1575_v15 = vsel %vm1561_vm14, %v1572_v0, %v1574_v17  ;;  %v6275_v6 = vadd.f32 %v6057_v61, %v5835_v43  ;;  %vm2882_vm15 = vcmp.lt.s32.totalorder %v6061_v14, 0 }
 0x2dc   :  { %v2948_v13 = vclz %v3890_v26  ;;  %v2967_v36 = vsel %vm2882_vm15, %v2966_v5, %v2942_v3  ;;  %v6283_v58 = vmul.u32.u64.low %v6232_v55, %v1575_v15  ;;  %v6284_v28 = vmul.u32.u64.high %v6232_v55, %v1575_v15, %v6283_v58 }
 0x2dd   :  { %vm1308_vm0 = vweird.f32 %v5903_v47  ;;  %v1567_v44 = vsel %vm1561_vm14, %v1564_v9, %v1566_v2  ;;  %v3195_v43 = vand.u32 2139095040, %v6275_v6  ;;  %v6292_v63 = vadd.f32 %v6057_v61, %v5886_v32 }
 0x2de   :  { %v3891_v18 = vadd.s32 4294967294, %v2948_v13  ;;  %vm1312_vm1 = vcmp.eq.s32.totalorder %v1310_v39, 0  ;;  %vm1315_vm2 = vcmp.eq.s32.totalorder %v1310_v39, 2  ;;  %vm6296_vm3 = vcmp.le.f32.partialorder %v2880_v52, 0.7853982 }
 0x2df   :  { %v1586_v48 = vadd.s32 1, %v6261_v1  ;;  %v2936_v49 = vadd.s32 %v6184_v22, %v6200_v8  ;;  %v2969_v12 = vsel %vm6296_vm3, 0, %v2967_v36  ;;  %v3196_v53 = vshrl.u32 %v3195_v43, 23 }
 0x2e0   :  { %vm3892_vm4 = vcmp.lt.s32.totalorder %v3891_v18, 0  ;;  %v1583_v57 = vmul.u32 %v6232_v55, %v1567_v44  ;;  %vm1585_vm5 = vc.u32 %v6284_v28, %v6260_v42  ;;  %v3192_v52 = vand.u32 2147483647, %v6275_v6 }
 0x2e1   :  { %v2951_v3 = vsel %vm3892_vm4, 0, %v3891_v18  ;;  %v1427_v22 = vand.u32 2139095040, %v6292_v63  ;;  %v1587_v59 = vsel %vm1585_vm5, %v1586_v48, %v6261_v1  ;;  %v3901_v51 = vadd.s32 4294967169, %v3196_v53 }
 0x2e2   :  { %v4259_v32 = vpop.eup %4258  ;;  %v2952_v54 = vsub.s32 32, %v2951_v3  ;;  %v2956_v10 = vsub.s32 4294967266, %v2951_v3  ;;  %v2953_v37 = vshll.u32 %v6243_v30, %v2951_v3  ;;  %v1588_v16 = vadd.s32 %v1587_v59, %v1583_v57 }
 0x2e3   :  { %v4261_v7 = vpop.eup %4260  ;;  %v1316_v35 = vxor.u32 2147483648, %v4259_v32  ;;  %vm1311_vm6 = vcmp.lt.s32.totalorder %v1310_v39, 2  ;;  %v2973_v45 = vadd.s32 3, %v2969_v12  ;;  %v3202_v23 = vadd.s32 1, %v3901_v51 }
 0x2e4   :  { %v1313_v8 = vxor.u32 2147483648, %v4261_v7  ;;  %v2954_v55 = vshrl.u32 %v2936_v49, %v2952_v54  ;;  %v2957_v24 = vadd.s32 127, %v2956_v10  ;;  %v1589_v5 = vadd.s32 536870912, %v1588_v16 }
 0x2e5   :  { %v1317_v62 = vsel %vm1315_vm2, %v1316_v35, %v4261_v7  ;;  %v3199_v34 = vand.u32 8388607, %v3192_v52  ;;  %vm3203_vm7 = vcmp.gt.s32.totalorder %v3202_v23, 0  ;;  %v1428_v9 = vshrl.u32 %v1427_v22, 23 }
 0x2e6   :  { %v1314_v40 = vsel %vm1312_vm1, %v4259_v32, %v1313_v8  ;;  %v2955_v33 = vor.u32 %v2954_v55, %v2953_v37  ;;  %v2958_v0 = vshll.u32 %v2957_v24, 23  ;;  %v1590_v26 = vshrl.u32 %v1589_v5, 30 }
 0x2e7   :  { %v1318_v19 = vsel %vm1311_vm6, %v1314_v40, %v1317_v62  ;;  %v3204_v17 = vsel %vm3203_vm7, %v3202_v23, 0  ;;  %v6318_v39 = vand.u32 3, %v2973_v45  ;;  %vm1530_vm8 = vcmp.lt.s32.totalorder %v6066_v4, 0 }
 0x2e8   :  { %v1319_v30 = vsel %vm1308_vm0, nan, %v1318_v19  ;;  %v2959_v1 = vor.u32 4788187, %v2958_v0  ;;  %v3206_v2 = vand.u32 31, %v3204_v17  ;;  %v2962_v13 = vcvt.s32.f32 %v2955_v33 }
 0x2e9   :  { %3720 = vst [vmem:[#allocation2 + $0x40] sm:$0xff] %v1319_v30  ;;  %v1591_v36 = vshll.u32 %v1590_v26, 30  ;;  %v6323_v47 = vadd.f32 %v6057_v61, %v5947_v11  ;;  %v1584_v58 = vadd.s32 %v6260_v42, %v6284_v28  ;;  %v3200_v18 = vor.u32 8388608, %v3199_v34 }
 0x2ea   :  { %v2960_v15 = vand.u32 2147483647, %v2959_v1  ;;  %v3207_v44 = vsub.s32 32, %v3206_v2  ;;  %v1424_v43 = vand.u32 2147483647, %v6292_v63  ;;  %v6330_v12 = vshrl.u32 %v3204_v17, 5 }
 0x2eb   :  { %v6328_v49 = vsub.s32 %v1588_v16, %v1591_v36  ;;  %v3833_v53 = vadd.s32 4294967169, %v1428_v9  ;;  %v1614_v32 = vsub.s32 4, %v1590_v26  ;;  %v3209_v3 = vshll.u32 %v4343_v21, %v3206_v2 }
 0x2ec   :  { %v2963_v48 = vmul.f32 %v2962_v13, %v2960_v15  ;;  %v3210_v57 = vshrl.u32 %v4344_v25, %v3207_v44  ;;  %v3213_v11 = vshrl.u32 %v4345_v27, %v3207_v44  ;;  %v3212_v28 = vshll.u32 %v4344_v25, %v3206_v2 }
 0x2ed   :  { %v1594_v42 = vsub.s32 0, %v6328_v49  ;;  %v3216_v35 = vshrl.u32 %v4346_v29, %v3207_v44  ;;  %v3215_v10 = vshll.u32 %v4345_v27, %v3206_v2  ;;  %v3218_v22 = vshll.u32 %v4346_v29, %v3206_v2 }
 0x2ee   :  { %v2964_v7 = vxor.u32 2147483648, %v2963_v48  ;;  %v3211_v54 = vor.u32 %v3210_v57, %v3209_v3  ;;  %v3219_v8 = vshrl.u32 %v4347_v31, %v3207_v44  ;;  %v3214_v51 = vor.u32 %v3213_v11, %v3212_v28 }
 0x2ef   :  { %v3838_v59 = vmin.u32 %v1594_v42, %v6328_v49  ;;  %v3221_v62 = vshll.u32 %v4347_v31, %v3206_v2  ;;  %v3217_v24 = vor.u32 %v3216_v35, %v3215_v10  ;;  %v3222_v40 = vshrl.u32 %v4348_v38, %v3207_v44  ;;  %v6386_v35 = vpop.f32.mrb[14].mxu0 }
 0x2f0   :  { %v2965_v37 = vsel %vm2882_vm15, %v2964_v7, %v2963_v48  ;;  %v3220_v16 = vor.u32 %v3219_v8, %v3218_v22  ;;  %v6349_v23 = vshll.u32 %v3200_v18, 8  ;;  %v1434_v19 = vadd.s32 1, %v3833_v53 }
 0x2f1   :  { %v2968_v55 = vsel %vm6296_vm3, %v6061_v14, %v2965_v37  ;;  %v1596_v45 = vclz %v3838_v59  ;;  %vm6353_vm9 = vcmp.le.f32.partialorder %v1528_v50, 0.7853982  ;;  %v1615_v56 = vsel %vm1530_vm8, %v1614_v32, %v1590_v26 }
 0x2f2   :  { %4262 = vcosq.f32 %v2968_v55  ;;  %v3208_v0 = vshrl.u32 %v4343_v21, %v3207_v44  ;;  %v3223_v5 = vor.u32 %v3222_v40, %v3221_v62  ;;  %vm3224_vm10 = vcmp.lt.s32.totalorder %v6330_v12, 1 }
 0x2f3   :  { %4264 = vsinq.f32 %v2968_v55  ;;  %v3839_v30 = vadd.s32 4294967294, %v1596_v45  ;;  %vm3226_vm11 = vcmp.lt.s32.totalorder %v6330_v12, 3  ;;  %vm3227_vm12 = vcmp.lt.s32.totalorder %v6330_v12, 4 }
 0x2f4   :  { %v3229_v34 = vsel %vm3227_vm12, %v3217_v24, 2102212464  ;;  %v3232_v1 = vsel %vm3224_vm10, %v3211_v54, %v3214_v51  ;;  %v3233_v17 = vsel %vm3227_vm12, %v3220_v16, 920167782  ;;  %v3236_v50 = vsel %vm3224_vm10, %v3214_v51, %v3217_v24 }
 0x2f5   :  { %vm3840_vm13 = vcmp.lt.s32.totalorder %v3839_v30, 0  ;;  %vm3225_vm14 = vcmp.lt.s32.totalorder %v6330_v12, 2  ;;  %v3234_v26 = vsel %vm3226_vm11, %v3217_v24, %v3233_v17  ;;  %v3237_v9 = vsel %vm3227_vm12, %v3223_v5, 1326507024 }
 0x2f6   :  { %v1599_v2 = vsel %vm3840_vm13, 0, %v3839_v30  ;;  %v3228_v15 = vsel %vm3224_vm10, %v3208_v0, %v3211_v54  ;;  %v3235_v13 = vsel %vm3225_vm14, %v3232_v1, %v3234_v26  ;;  %v3238_v36 = vsel %vm3226_vm11, %v3220_v16, %v3237_v9 }
 0x2f7   :  { %vm2975_vm15 = vcmp.lt.s32.totalorder %v6318_v39, 2  ;;  %v1600_v18 = vsub.s32 32, %v1599_v2  ;;  %v1604_v44 = vsub.s32 4294967266, %v1599_v2  ;;  %v3230_v48 = vsel %vm3226_vm11, %v3214_v51, %v3229_v34 }
 0x2f8   :  { %v3239_v53 = vsel %vm3225_vm14, %v3236_v50, %v3238_v36  ;;  %vm2972_vm0 = vweird.f32 %v6061_v14  ;;  %v6381_v57 = vmul.u32.u64.low %v6349_v23, %v3235_v13  ;;  %v6382_v11 = vmul.u32.u64.high %v6349_v23, %v3235_v13, %v6381_v57 }
 0x2f9   :  { %v6377_v32 = vmul.u32.u64.low %v6349_v23, %v3239_v53  ;;  %v6378_v3 = vmul.u32.u64.high %v6349_v23, %v3239_v53, %v6377_v32  ;;  %v1601_v7 = vshll.u32 %v6328_v49, %v1599_v2  ;;  %v1602_v42 = vshrl.u32 %v1584_v58, %v1600_v18 }
 0x2fa   :  { %v1605_v28 = vadd.s32 127, %v1604_v44  ;;  %vm1435_vm1 = vcmp.gt.s32.totalorder %v1434_v19, 0  ;;  %vm2976_vm2 = vcmp.eq.s32.totalorder %v6318_v39, 0  ;;  %v3231_v54 = vsel %vm3225_vm14, %v3228_v15, %v3230_v48 }
 0x2fb   :  { %v1431_v10 = vand.u32 8388607, %v1424_v43  ;;  %v1436_v22 = vsel %vm1435_vm1, %v1434_v19, 0  ;;  %v1603_v37 = vor.u32 %v1602_v42, %v1601_v7  ;;  %v1617_v49 = vsel %vm6353_vm9, 0, %v1615_v56 }
 0x2fc   :  { %v4263_v8 = vpop.eup %4262  ;;  %v1606_v59 = vshll.u32 %v1605_v28, 23  ;;  %v1438_v58 = vand.u32 31, %v1436_v22  ;;  %vm2979_vm3 = vcmp.eq.s32.totalorder %v6318_v39, 2  ;;  %vm3249_vm4 = vc.u32 %v6378_v3, %v6381_v57 }
 0x2fd   :  { %v4265_v51 = vpop.eup %4264  ;;  %v2980_v62 = vxor.u32 2147483648, %v4263_v8  ;;  %v3250_v12 = vadd.s32 1, %v6382_v11  ;;  %v3247_v16 = vmul.u32 %v6349_v23, %v3231_v54  ;;  %v1621_v19 = vadd.s32 3, %v1617_v49 }
 0x2fe   :  { %v2977_v55 = vxor.u32 2147483648, %v4265_v51  ;;  %v1607_v24 = vor.u32 4788187, %v1606_v59  ;;  %v1439_v40 = vsub.s32 32, %v1438_v58  ;;  %v1432_v56 = vor.u32 8388608, %v1431_v10 }
 0x2ff   :  { %v2981_v45 = vsel %vm2979_vm3, %v2980_v62, %v4265_v51  ;;  %v3251_v0 = vsel %vm3249_vm4, %v3250_v12, %v6382_v11  ;;  %v1610_v34 = vcvt.s32.f32 %v1603_v37  ;;  %v1441_v50 = vshll.u32 %v4343_v21, %v1438_v58 }
 0x300   :  { %v2978_v5 = vsel %vm2976_vm2, %v4263_v8, %v2977_v55  ;;  %v1608_v30 = vand.u32 2147483647, %v1607_v24  ;;  %v3252_v1 = vadd.s32 %v3251_v0, %v3247_v16  ;;  %v1442_v26 = vshrl.u32 %v4344_v25, %v1439_v40 }
 0x301   :  { %v2982_v17 = vsel %vm2975_vm15, %v2978_v5, %v2981_v45  ;;  %v1445_v23 = vshrl.u32 %v4345_v27, %v1439_v40  ;;  %v1448_v13 = vshrl.u32 %v4346_v29, %v1439_v40  ;;  %v1437_v36 = vshrl.u32 %v1436_v22, 5 }
 0x302   :  { %v2983_v9 = vsel %vm2972_vm0, nan, %v2982_v17  ;;  %v1611_v2 = vmul.f32 %v1610_v34, %v1608_v30  ;;  %v3253_v15 = vadd.s32 536870912, %v3252_v1  ;;  %v1444_v18 = vshll.u32 %v4344_v25, %v1438_v58 }
 0x303   :  { %3736 = vst [vmem:[#allocation2 + $0xc0] sm:$0xff] %v2983_v9  ;;  %v1447_v39 = vshll.u32 %v4345_v27, %v1438_v58  ;;  %v1451_v44 = vshrl.u32 %v4347_v31, %v1439_v40  ;;  %v1443_v32 = vor.u32 %v1442_v26, %v1441_v50  ;;  %v1450_v11 = vshll.u32 %v4346_v29, %v1438_v58 }
 0x304   :  { %v1612_v48 = vxor.u32 2147483648, %v1611_v2  ;;  %v3254_v53 = vshrl.u32 %v3253_v15, 30  ;;  %vm3194_vm5 = vcmp.lt.s32.totalorder %v6275_v6, 0  ;;  %v1446_v14 = vor.u32 %v1445_v23, %v1444_v18 }
 0x305   :  { %v1449_v7 = vor.u32 %v1448_v13, %v1447_v39  ;;  %v1453_v42 = vshll.u32 %v4347_v31, %v1438_v58  ;;  %v1454_v28 = vshrl.u32 %v4348_v38, %v1439_v40  ;;  %v6420_v10 = vand.u32 3, %v1621_v19 }
 0x306   :  { %v1613_v54 = vsel %vm1530_vm8, %v1612_v48, %v1611_v2  ;;  %v3255_v22 = vshll.u32 %v3254_v53, 30  ;;  %v1452_v8 = vor.u32 %v1451_v44, %v1450_v11  ;;  %v1440_v59 = vshrl.u32 %v4343_v21, %v1439_v40 }
 0x307   :  { %v1616_v37 = vsel %vm6353_vm9, %v6066_v4, %v1613_v54  ;;  %v1455_v49 = vor.u32 %v1454_v28, %v1453_v42  ;;  %v6426_v51 = vshll.u32 %v1432_v56, 8  ;;  %vm1456_vm6 = vcmp.lt.s32.totalorder %v1437_v36, 1 }
 0x308   :  { %4266 = vcosq.f32 %v1616_v37  ;;  %v6428_v58 = vsub.s32 %v3252_v1, %v3255_v22  ;;  %vm1459_vm7 = vcmp.lt.s32.totalorder %v1437_v36, 4  ;;  %vm1457_vm8 = vcmp.lt.s32.totalorder %v1437_v36, 2 }
 0x309   :  { %4268 = vsinq.f32 %v1616_v37  ;;  %v1461_v62 = vsel %vm1459_vm7, %v1449_v7, 2102212464  ;;  %v1464_v12 = vsel %vm1456_vm6, %v1443_v32, %v1446_v14  ;;  %v3278_v24 = vsub.s32 4, %v3254_v53 }
 0x30a   :  { %v3258_v55 = vsub.s32 0, %v6428_v58  ;;  %vm1458_vm10 = vcmp.lt.s32.totalorder %v1437_v36, 3  ;;  %v1465_v33 = vsel %vm1459_vm7, %v1452_v8, 920167782  ;;  %v1460_v16 = vsel %vm1456_vm6, %v1440_v59, %v1443_v32  ;;  %v6458_v36 = vpop.f32.mrb[14].mxu1 }
 0x30b   :  { %v1466_v45 = vsel %vm1458_vm10, %v1449_v7, %v1465_v33  ;;  %v1468_v40 = vsel %vm1456_vm6, %v1446_v14, %v1449_v7  ;;  %v1469_v19 = vsel %vm1459_vm7, %v1455_v49, 1326507024  ;;  %v1462_v56 = vsel %vm1458_vm10, %v1446_v14, %v1461_v62 }
 0x30c   :  { %v3902_v0 = vmin.u32 %v3258_v55, %v6428_v58  ;;  %v1467_v5 = vsel %vm1457_vm8, %v1464_v12, %v1466_v45  ;;  %v1470_v30 = vsel %vm1458_vm10, %v1452_v8, %v1469_v19  ;;  %v3091_v50 = vand.u32 2139095040, %v6323_v47 }
 0x30d   :  { %v1471_v34 = vsel %vm1457_vm8, %v1468_v40, %v1470_v30  ;;  %v6435_v1 = vmul.u32.u64.low %v6426_v51, %v1467_v5  ;;  %v6436_v17 = vmul.u32.u64.high %v6426_v51, %v1467_v5, %v6435_v1  ;;  %v3279_v23 = vsel %vm3194_vm5, %v3278_v24, %v3254_v53 }
 0x30e   :  { %v3260_v26 = vclz %v3902_v0  ;;  %v3088_v9 = vand.u32 2147483647, %v6323_v47  ;;  %v1463_v2 = vsel %vm1457_vm8, %v1460_v16, %v1462_v56  ;;  %v3092_v18 = vshrl.u32 %v3091_v50, 23 }
 0x30f   :  { %v6444_v15 = vmul.u32.u64.low %v6426_v51, %v1471_v34  ;;  %v6445_v13 = vmul.u32.u64.high %v6426_v51, %v1471_v34, %v6444_v15  ;;  %vm1623_vm9 = vcmp.lt.s32.totalorder %v6420_v10, 2  ;;  %vm6450_vm11 = vcmp.le.f32.partialorder %v3192_v52, 0.7853982 }
 0x310   :  { %v3903_v44 = vadd.s32 4294967294, %v3260_v26  ;;  %v6456_v48 = vadd.f32 %v6057_v61, %v6049_v20  ;;  %vm1624_vm12 = vcmp.eq.s32.totalorder %v6420_v10, 0  ;;  %vm1627_vm13 = vcmp.eq.s32.totalorder %v6420_v10, 2 }
 0x311   :  { %v1482_v53 = vadd.s32 1, %v6436_v17  ;;  %v3897_v32 = vadd.s32 4294967169, %v3092_v18  ;;  %v3248_v52 = vadd.s32 %v6381_v57, %v6378_v3  ;;  %v3281_v14 = vsel %vm6450_vm11, 0, %v3279_v23 }
 0x312   :  { %v4267_v11 = vpop.eup %4266  ;;  %vm3904_vm14 = vcmp.lt.s32.totalorder %v3903_v44, 0  ;;  %v1479_v20 = vmul.u32 %v6426_v51, %v1463_v2  ;;  %vm1481_vm15 = vc.u32 %v6445_v13, %v6435_v1  ;;  %v3095_v28 = vand.u32 8388607, %v3088_v9 }
 0x313   :  { %v4269_v61 = vpop.eup %4268  ;;  %v1628_v7 = vxor.u32 2147483648, %v4267_v11  ;;  %v3263_v42 = vsel %vm3904_vm14, 0, %v3903_v44  ;;  %v1739_v37 = vand.u32 2139095040, %v6456_v48  ;;  %v1483_v59 = vsel %vm1481_vm15, %v1482_v53, %v6436_v17 }
 0x314   :  { %v1625_v54 = vxor.u32 2147483648, %v4269_v61  ;;  %v3264_v22 = vsub.s32 32, %v3263_v42  ;;  %v3268_v8 = vsub.s32 4294967266, %v3263_v42  ;;  %v3265_v57 = vshll.u32 %v6428_v58, %v3263_v42 }
 0x315   :  { %v1629_v3 = vsel %vm1627_vm13, %v1628_v7, %v4269_v61  ;;  %v3098_v49 = vadd.s32 1, %v3897_v32  ;;  %v1484_v55 = vadd.s32 %v1483_v59, %v1479_v20  ;;  %vm1620_vm0 = vweird.f32 %v6066_v4 }
 0x316   :  { %v1626_v51 = vsel %vm1624_vm12, %v4267_v11, %v1625_v54  ;;  %v3266_v62 = vshrl.u32 %v3248_v52, %v3264_v22  ;;  %v3269_v12 = vadd.s32 127, %v3268_v8  ;;  %v3285_v33 = vadd.s32 3, %v3281_v14 }
 0x317   :  { %v1630_v24 = vsel %vm1623_vm9, %v1626_v51, %v1629_v3  ;;  %vm3099_vm1 = vcmp.gt.s32.totalorder %v3098_v49, 0  ;;  %v1485_v58 = vadd.s32 536870912, %v1484_v55  ;;  %v3096_v19 = vor.u32 8388608, %v3095_v28 }
 0x318   :  { %v1631_v16 = vsel %vm1620_vm0, nan, %v1630_v24  ;;  %v3267_v45 = vor.u32 %v3266_v62, %v3265_v57  ;;  %v3270_v40 = vshll.u32 %v3269_v12, 23  ;;  %v3100_v0 = vsel %vm3099_vm1, %v3098_v49, 0 }
 0x319   :  { %3723 = vst [vmem:[#allocation2 + $0x58] sm:$0xff] %v1631_v16  ;;  %v1486_v5 = vshrl.u32 %v1485_v58, 30  ;;  %v1740_v30 = vshrl.u32 %v1739_v37, 23  ;;  %v3102_v34 = vand.u32 31, %v3100_v0  ;;  %v6481_v26 = vand.u32 3, %v3285_v33 }
 0x31a   :  { %v3271_v56 = vor.u32 4788187, %v3270_v40  ;;  %v3274_v50 = vcvt.s32.f32 %v3267_v45  ;;  %vm1426_vm2 = vcmp.lt.s32.totalorder %v6292_v63, 0  ;;  %v6485_v10 = vadd.s32 %v6435_v1, %v6445_v13 }
 0x31b   :  { %v1487_v4 = vshll.u32 %v1486_v5, 30  ;;  %v3103_v23 = vsub.s32 32, %v3102_v34  ;;  %v6487_v2 = vshll.u32 %v3096_v19, 8  ;;  %v1736_v15 = vand.u32 2147483647, %v6456_v48 }
 0x31c   :  { %v3272_v17 = vand.u32 2147483647, %v3271_v56  ;;  %v6492_v53 = vshrl.u32 %v3100_v0, 5  ;;  %v3845_v32 = vadd.s32 4294967169, %v1740_v30  ;;  %v1510_v11 = vsub.s32 4, %v1486_v5 }
 0x31d   :  { %v6490_v44 = vsub.s32 %v1484_v55, %v1487_v4  ;;  %v3105_v52 = vshll.u32 %v4343_v21, %v3102_v34  ;;  %v3106_v14 = vshrl.u32 %v4344_v25, %v3103_v23  ;;  %v3109_v20 = vshrl.u32 %v4345_v27, %v3103_v23  ;;  %v6539_v4 = vpop.f32.mrb[15].mxu0 }
 0x31e   :  { %v3275_v18 = vmul.f32 %v3274_v50, %v3272_v17  ;;  %vm6499_vm3 = vcmp.le.f32.partialorder %v1424_v43, 0.7853982  ;;  %v3108_v7 = vshll.u32 %v4344_v25, %v3102_v34  ;;  %v3112_v42 = vshrl.u32 %v4346_v29, %v3103_v23 }
 0x31f   :  { %v1490_v61 = vsub.s32 0, %v6490_v44  ;;  %v3107_v28 = vor.u32 %v3106_v14, %v3105_v52  ;;  %v3111_v54 = vshll.u32 %v4345_v27, %v3102_v34  ;;  %v3114_v22 = vshll.u32 %v4346_v29, %v3102_v34 }
 0x320   :  { %v3276_v1 = vxor.u32 2147483648, %v3275_v18  ;;  %v3115_v8 = vshrl.u32 %v4347_v31, %v3103_v23  ;;  %v3110_v3 = vor.u32 %v3109_v20, %v3108_v7  ;;  %v3117_v57 = vshll.u32 %v4347_v31, %v3102_v34 }
 0x321   :  { %v3834_v43 = vmin.u32 %v1490_v61, %v6490_v44  ;;  %v3113_v49 = vor.u32 %v3112_v42, %v3111_v54  ;;  %v3118_v62 = vshrl.u32 %v4348_v38, %v3103_v23  ;;  %vm3120_vm4 = vcmp.lt.s32.totalorder %v6492_v53, 1 }
 0x322   :  { %v3277_v37 = vsel %vm3194_vm5, %v3276_v1, %v3275_v18  ;;  %v3116_v51 = vor.u32 %v3115_v8, %v3114_v22  ;;  %v1746_v55 = vadd.s32 1, %v3845_v32  ;;  %v1511_v24 = vsel %vm1426_vm2, %v1510_v11, %v1486_v5 }
 0x323   :  { %v3280_v59 = vsel %vm6450_vm11, %v6275_v6, %v3277_v37  ;;  %v1492_v12 = vclz %v3834_v43  ;;  %v3104_v33 = vshrl.u32 %v4343_v21, %v3103_v23  ;;  %v3119_v16 = vor.u32 %v3118_v62, %v3117_v57 }
 0x324   :  { %4270 = vcosq.f32 %v3280_v59  ;;  %vm3122_vm5 = vcmp.lt.s32.totalorder %v6492_v53, 3  ;;  %vm3123_vm6 = vcmp.lt.s32.totalorder %v6492_v53, 4  ;;  %v3128_v39 = vsel %vm3120_vm4, %v3107_v28, %v3110_v3 }
 0x325   :  { %4272 = vsinq.f32 %v3280_v59  ;;  %v3835_v45 = vadd.s32 4294967294, %v1492_v12  ;;  %v3125_v40 = vsel %vm3123_vm6, %v3113_v49, 2102212464  ;;  %v3129_v58 = vsel %vm3123_vm6, %v3116_v51, 920167782 }
 0x326   :  { %v3132_v19 = vsel %vm3120_vm4, %v3110_v3, %v3113_v49  ;;  %v3133_v0 = vsel %vm3123_vm6, %v3119_v16, 1326507024  ;;  %vm3121_vm8 = vcmp.lt.s32.totalorder %v6492_v53, 2  ;;  %v3130_v56 = vsel %vm3122_vm5, %v3113_v49, %v3129_v58  ;;  %v6569_v53 = vld [vmem:[%s7173_s2] ss:$0 sm:$0xff] }
 0x327   :  { %vm3836_vm7 = vcmp.lt.s32.totalorder %v3835_v45, 0  ;;  %v3134_v5 = vsel %vm3122_vm5, %v3116_v51, %v3133_v0  ;;  %vm3288_vm10 = vcmp.eq.s32.totalorder %v6481_v26, 0  ;;  %v1513_v34 = vsel %vm6499_vm3, 0, %v1511_v24 }
 0x328   :  { %v1495_v30 = vsel %vm3836_vm7, 0, %v3835_v45  ;;  %v3131_v17 = vsel %vm3121_vm8, %v3128_v39, %v3130_v56  ;;  %v3135_v50 = vsel %vm3121_vm8, %v3132_v19, %v3134_v5  ;;  %vm3287_vm9 = vcmp.lt.s32.totalorder %v6481_v26, 2 }
 0x329   :  { %v1496_v23 = vsub.s32 32, %v1495_v30  ;;  %v1500_v18 = vsub.s32 4294967266, %v1495_v30  ;;  %v3124_v32 = vsel %vm3120_vm4, %v3104_v33, %v3107_v28  ;;  %v3126_v11 = vsel %vm3122_vm5, %v3110_v3, %v3125_v40 }
 0x32a   :  { %vm3284_vm11 = vweird.f32 %v6275_v6  ;;  %v6548_v52 = vmul.u32.u64.low %v6487_v2, %v3135_v50  ;;  %v6549_v14 = vmul.u32.u64.high %v6487_v2, %v3135_v50, %v6548_v52  ;;  %v1497_v61 = vshll.u32 %v6490_v44, %v1495_v30 }
 0x32b   :  { %v6552_v20 = vmul.u32.u64.low %v6487_v2, %v3131_v17  ;;  %v6553_v1 = vmul.u32.u64.high %v6487_v2, %v3131_v17, %v6552_v20  ;;  %v1498_v7 = vshrl.u32 %v6485_v10, %v1496_v23  ;;  %v1501_v42 = vadd.s32 127, %v1500_v18 }
 0x32c   :  { %vm1747_vm12 = vcmp.gt.s32.totalorder %v1746_v55, 0  ;;  %v1517_v28 = vadd.s32 3, %v1513_v34  ;;  %v3127_v54 = vsel %vm3121_vm8, %v3124_v32, %v3126_v11  ;;  %v1743_v22 = vand.u32 8388607, %v1736_v15 }
 0x32d   :  { %v1748_v8 = vsel %vm1747_vm12, %v1746_v55, 0  ;;  %vm3291_vm13 = vcmp.eq.s32.totalorder %v6481_v26, 2  ;;  %v1499_v43 = vor.u32 %v1498_v7, %v1497_v61  ;;  %v1502_v3 = vshll.u32 %v1501_v42, 23 }
 0x32e   :  { %v4271_v37 = vpop.eup %4270  ;;  %v1750_v57 = vand.u32 31, %v1748_v8  ;;  %vm3145_vm14 = vc.u32 %v6549_v14, %v6552_v20  ;;  %v3146_v10 = vadd.s32 1, %v6553_v1  ;;  %v6573_v49 = vadd.f32 %v6569_v53, %v6103_v46 }
 0x32f   :  { %v4273_v59 = vpop.eup %4272  ;;  %v3292_v44 = vxor.u32 2147483648, %v4271_v37  ;;  %v1503_v62 = vor.u32 4788187, %v1502_v3  ;;  %v3143_v12 = vmul.u32 %v6487_v2, %v3127_v54  ;;  %v6576_v33 = vand.u32 3, %v1517_v28 }
 0x330   :  { %v3289_v51 = vxor.u32 2147483648, %v4273_v59  ;;  %v1751_v55 = vsub.s32 32, %v1750_v57  ;;  %v3147_v16 = vsel %vm3145_vm14, %v3146_v10, %v6553_v1  ;;  %v1744_v45 = vor.u32 8388608, %v1743_v22 }
 0x331   :  { %v3293_v24 = vsel %vm3291_vm13, %v3292_v44, %v4273_v59  ;;  %v1504_v40 = vand.u32 2147483647, %v1503_v62  ;;  %v1506_v58 = vcvt.s32.f32 %v1499_v43  ;;  %v3148_v19 = vadd.s32 %v3147_v16, %v3143_v12 }
 0x332   :  { %v3290_v39 = vsel %vm3288_vm10, %v4271_v37, %v3289_v51  ;;  %v1753_v0 = vshll.u32 %v4343_v21, %v1750_v57  ;;  %v1754_v2 = vshrl.u32 %v4344_v25, %v1751_v55  ;;  %v1757_v56 = vshrl.u32 %v4345_v27, %v1751_v55 }
 0x333   :  { %v3294_v46 = vsel %vm3287_vm9, %v3290_v39, %v3293_v24  ;;  %v1507_v30 = vmul.f32 %v1506_v58, %v1504_v40  ;;  %v3149_v34 = vadd.s32 536870912, %v3148_v19  ;;  %v1760_v17 = vshrl.u32 %v4346_v29, %v1751_v55 }
 0x334   :  { %v3295_v5 = vsel %vm3284_vm11, nan, %v3294_v46  ;;  %v1749_v50 = vshrl.u32 %v1748_v8, 5  ;;  %v1756_v23 = vshll.u32 %v4344_v25, %v1750_v57  ;;  %v1759_v26 = vshll.u32 %v4345_v27, %v1750_v57 }
 0x335   :  { %3739 = vst [vmem:[#allocation2 + $0xd8] sm:$0xff] %v3295_v5  ;;  %v1763_v18 = vshrl.u32 %v4347_v31, %v1751_v55  ;;  %v1508_v32 = vxor.u32 2147483648, %v1507_v30  ;;  %v3150_v11 = vshrl.u32 %v3149_v34, 30  ;;  %v1755_v52 = vor.u32 %v1754_v2, %v1753_v0 }
 0x336   :  { %v1762_v1 = vshll.u32 %v4346_v29, %v1750_v57  ;;  %v1758_v61 = vor.u32 %v1757_v56, %v1756_v23  ;;  %v1761_v6 = vor.u32 %v1760_v17, %v1759_v26  ;;  %v1765_v7 = vshll.u32 %v4347_v31, %v1750_v57  ;;  %v6614_v56 = vpop.f32.mrb[15].mxu1 }
 0x337   :  { %v1766_v42 = vshrl.u32 %v4348_v38, %v1751_v55  ;;  %v1509_v28 = vsel %vm1426_vm2, %v1508_v32, %v1507_v30  ;;  %v3151_v54 = vshll.u32 %v3150_v11, 30  ;;  %v6597_v8 = vshll.u32 %v1744_v45, 8 }
 0x338   :  { %v1764_v22 = vor.u32 %v1763_v18, %v1762_v1  ;;  %v1512_v37 = vsel %vm6499_vm3, %v6292_v63, %v1509_v28  ;;  %v1752_v43 = vshrl.u32 %v4343_v21, %v1751_v55  ;;  %v3403_v59 = vand.u32 2139095040, %v6573_v49 }
 0x339   :  { %v1767_v3 = vor.u32 %v1766_v42, %v1765_v7  ;;  %4274 = vcosq.f32 %v1512_v37  ;;  %v6604_v57 = vsub.s32 %v3148_v19, %v3151_v54  ;;  %vm1768_vm15 = vcmp.lt.s32.totalorder %v1749_v50, 1 }
 0x33a   :  { %vm1771_vm0 = vcmp.lt.s32.totalorder %v1749_v50, 4  ;;  %4276 = vsinq.f32 %v1512_v37  ;;  %vm1769_vm1 = vcmp.lt.s32.totalorder %v1749_v50, 2  ;;  %v1776_v10 = vsel %vm1768_vm15, %v1755_v52, %v1758_v61 }
 0x33b   :  { %v1773_v44 = vsel %vm1771_vm0, %v1761_v6, 2102212464  ;;  %v3154_v51 = vsub.s32 0, %v6604_v57  ;;  %v3174_v62 = vsub.s32 4, %v3150_v11  ;;  %vm1770_vm2 = vcmp.lt.s32.totalorder %v1749_v50, 3 }
 0x33c   :  { %v1777_v13 = vsel %vm1771_vm0, %v1764_v22, 920167782  ;;  %v1772_v12 = vsel %vm1768_vm15, %v1752_v43, %v1755_v52  ;;  %v1780_v55 = vsel %vm1768_vm15, %v1758_v61, %v1761_v6  ;;  %v1781_v16 = vsel %vm1771_vm0, %v1767_v3, 1326507024 }
 0x33d   :  { %v1778_v24 = vsel %vm1770_vm2, %v1761_v6, %v1777_v13  ;;  %v3898_v45 = vmin.u32 %v3154_v51, %v6604_v57  ;;  %v1774_v39 = vsel %vm1770_vm2, %v1758_v61, %v1773_v44  ;;  %v1782_v58 = vsel %vm1770_vm2, %v1764_v22, %v1781_v16 }
 0x33e   :  { %v1779_v40 = vsel %vm1769_vm1, %v1776_v10, %v1778_v24  ;;  %v1783_v19 = vsel %vm1769_vm1, %v1780_v55, %v1782_v58  ;;  %v3404_v2 = vshrl.u32 %v3403_v59, 23  ;;  %vm6618_vm3 = vcmp.le.f32.partialorder %v3088_v9, 0.7853982 }
 0x33f   :  { %v6611_v46 = vmul.u32.u64.low %v6597_v8, %v1779_v40  ;;  %v6612_v0 = vmul.u32.u64.high %v6597_v8, %v1779_v40, %v6611_v46  ;;  %vm3090_vm4 = vcmp.lt.s32.totalorder %v6323_v47, 0  ;;  %v3156_v30 = vclz %v3898_v45 }
 0x340   :  { %vm1516_vm5 = vweird.f32 %v6292_v63  ;;  %v3175_v34 = vsel %vm3090_vm4, %v3174_v62, %v3150_v11  ;;  %v6627_v17 = vmul.u32.u64.low %v6597_v8, %v1783_v19  ;;  %v6628_v23 = vmul.u32.u64.high %v6597_v8, %v1783_v19, %v6627_v17 }
 0x341   :  { %v3909_v26 = vadd.s32 4294967169, %v3404_v2  ;;  %v3899_v18 = vadd.s32 4294967294, %v3156_v30  ;;  %v1775_v32 = vsel %vm1769_vm1, %v1772_v12, %v1774_v39  ;;  %v3400_v9 = vand.u32 2147483647, %v6573_v49 }
 0x342   :  { %v6634_v52 = vadd.f32 %v6569_v53, %v6195_v60  ;;  %vm1519_vm6 = vcmp.lt.s32.totalorder %v6576_v33, 2  ;;  %vm1520_vm7 = vcmp.eq.s32.totalorder %v6576_v33, 0  ;;  %v1794_v11 = vadd.s32 1, %v6612_v0 }
 0x343   :  { %v3410_v1 = vadd.s32 1, %v3909_v26  ;;  %v4275_v61 = vpop.eup %4274  ;;  %vm1523_vm8 = vcmp.eq.s32.totalorder %v6576_v33, 2  ;;  %v3144_v50 = vadd.s32 %v6552_v20, %v6549_v14  ;;  %vm3900_vm10 = vcmp.lt.s32.totalorder %v3899_v18, 0 }
 0x344   :  { %v3177_v6 = vsel %vm6618_vm3, 0, %v3175_v34  ;;  %v4277_v7 = vpop.eup %4276  ;;  %v1524_v60 = vxor.u32 2147483648, %v4275_v61  ;;  %v3159_v42 = vsel %vm3900_vm10, 0, %v3899_v18  ;;  %v1791_v28 = vmul.u32 %v6597_v8, %v1775_v32 }
 0x345   :  { %vm1793_vm9 = vc.u32 %v6628_v23, %v6611_v46  ;;  %v1521_v54 = vxor.u32 2147483648, %v4277_v7  ;;  %v3160_v22 = vsub.s32 32, %v3159_v42  ;;  %v3164_v37 = vsub.s32 4294967266, %v3159_v42 }
 0x346   :  { %v3407_v43 = vand.u32 8388607, %v3400_v9  ;;  %v1525_v3 = vsel %vm1523_vm8, %v1524_v60, %v4277_v7  ;;  %v3161_v14 = vshll.u32 %v6604_v57, %v3159_v42  ;;  %v1795_v20 = vsel %vm1793_vm9, %v1794_v11, %v6612_v0 }
 0x347   :  { %vm3411_vm11 = vcmp.gt.s32.totalorder %v3410_v1, 0  ;;  %v1522_v59 = vsel %vm1520_vm7, %v4275_v61, %v1521_v54  ;;  %v3162_v44 = vshrl.u32 %v3144_v50, %v3160_v22  ;;  %v3165_v10 = vadd.s32 127, %v3164_v37 }
 0x348   :  { %v1796_v8 = vadd.s32 %v1795_v20, %v1791_v28  ;;  %v1526_v51 = vsel %vm1519_vm6, %v1522_v59, %v1525_v3  ;;  %v3181_v62 = vadd.s32 3, %v3177_v6  ;;  %v3412_v13 = vsel %vm3411_vm11, %v3410_v1, 0 }
 0x349   :  { %v1632_v12 = vand.u32 2147483647, %v6634_v52  ;;  %v1527_v24 = vsel %vm1516_vm5, nan, %v1526_v51  ;;  %v3163_v57 = vor.u32 %v3162_v44, %v3161_v14  ;;  %v3166_v55 = vshll.u32 %v3165_v10, 23 }
 0x34a   :  { %v1797_v16 = vadd.s32 536870912, %v1796_v8  ;;  %3722 = vst [vmem:[#allocation2 + $0x50] sm:$0xff] %v1527_v24  ;;  %v3408_v45 = vor.u32 8388608, %v3407_v43  ;;  %v3414_v39 = vand.u32 31, %v3412_v13  ;;  %v6659_v19 = vand.u32 3, %v3181_v62 }
 0x34b   :  { %v3167_v40 = vor.u32 4788187, %v3166_v55  ;;  %v1635_v0 = vand.u32 2139095040, %v6634_v52  ;;  %v6664_v2 = vand.u32 8388607, %v1632_v12  ;;  %v3170_v30 = vcvt.s32.f32 %v3163_v57 }
 0x34c   :  { %v6657_v58 = vshrl.u32 %v1797_v16, 30  ;;  %v3415_v33 = vsub.s32 32, %v3414_v39  ;;  %v6667_v34 = vadd.s32 %v6611_v46, %v6628_v23  ;;  %v6673_v11 = vshll.u32 %v3408_v45, 8 }
 0x34d   :  { %v3168_v63 = vand.u32 2147483647, %v3167_v40  ;;  %v3417_v50 = vshll.u32 %v4343_v21, %v3414_v39  ;;  %v3413_v7 = vshrl.u32 %v3412_v13, 5  ;;  %v3420_v46 = vshll.u32 %v4344_v25, %v3414_v39 }
 0x34e   :  { %v1799_v17 = vshll.u32 %v6657_v58, 30  ;;  %v3418_v26 = vshrl.u32 %v4344_v25, %v3415_v33  ;;  %v3421_v18 = vshrl.u32 %v4345_v27, %v3415_v33  ;;  %v3424_v32 = vshrl.u32 %v4346_v29, %v3415_v33 }
 0x34f   :  { %v3171_v1 = vmul.f32 %v3170_v30, %v3168_v63  ;;  %v3427_v6 = vshrl.u32 %v4347_v31, %v3415_v33  ;;  %v3423_v23 = vshll.u32 %v4345_v27, %v3414_v39  ;;  %v1636_v60 = vshrl.u32 %v1635_v0, 23 }
 0x350   :  { %v6675_v61 = vsub.s32 %v1796_v8, %v1799_v17  ;;  %v3419_v54 = vor.u32 %v3418_v26, %v3417_v50  ;;  %v3426_v22 = vshll.u32 %v4346_v29, %v3414_v39  ;;  %v3422_v37 = vor.u32 %v3421_v18, %v3420_v46 }
 0x351   :  { %v3172_v42 = vxor.u32 2147483648, %v3171_v1  ;;  %v3425_v43 = vor.u32 %v3424_v32, %v3423_v23  ;;  %v3429_v3 = vshll.u32 %v4347_v31, %v3414_v39  ;;  %v3430_v14 = vshrl.u32 %v4348_v38, %v3415_v33 }
 0x352   :  { %v1802_v28 = vsub.s32 0, %v6675_v61  ;;  %v3428_v44 = vor.u32 %v3427_v6, %v3426_v22  ;;  %v1640_v10 = vor.u32 8388608, %v6664_v2  ;;  %v3416_v51 = vshrl.u32 %v4343_v21, %v3415_v33 }
 0x353   :  { %v3173_v20 = vsel %vm3090_vm4, %v3172_v42, %v3171_v1  ;;  %v3431_v62 = vor.u32 %v3430_v14, %v3429_v3  ;;  %v3841_v13 = vadd.s32 4294967169, %v1636_v60  ;;  %vm3432_vm12 = vcmp.lt.s32.totalorder %v3413_v7, 1 }
 0x354   :  { %v3846_v59 = vmin.u32 %v1802_v28, %v6675_v61  ;;  %v3176_v8 = vsel %vm6618_vm3, %v6323_v47, %v3173_v20  ;;  %vm3435_vm13 = vcmp.lt.s32.totalorder %v3413_v7, 4  ;;  %vm1738_vm14 = vcmp.lt.s32.totalorder %v6456_v48, 0 }
 0x355   :  { %4278 = vcosq.f32 %v3176_v8  ;;  %vm3433_vm15 = vcmp.lt.s32.totalorder %v3413_v7, 2  ;;  %v3437_v57 = vsel %vm3435_vm13, %v3425_v43, 2102212464  ;;  %v3440_v55 = vsel %vm3432_vm12, %v3419_v54, %v3422_v37 }
 0x356   :  { %v1804_v24 = vclz %v3846_v59  ;;  %4280 = vsinq.f32 %v3176_v8  ;;  %vm3434_vm0 = vcmp.lt.s32.totalorder %v3413_v7, 3  ;;  %v3441_v45 = vsel %vm3435_vm13, %v3428_v44, 920167782 }
 0x357   :  { %v3444_v39 = vsel %vm3432_vm12, %v3422_v37, %v3425_v43  ;;  %v3436_v5 = vsel %vm3432_vm12, %v3416_v51, %v3419_v54  ;;  %v3442_v40 = vsel %vm3434_vm0, %v3425_v43, %v3441_v45  ;;  %v3445_v0 = vsel %vm3435_vm13, %v3431_v62, 1326507024 }
 0x358   :  { %v3847_v16 = vadd.s32 4294967294, %v1804_v24  ;;  %v1642_v33 = vadd.s32 1, %v3841_v13  ;;  %v3438_v2 = vsel %vm3434_vm0, %v3422_v37, %v3437_v57  ;;  %v3443_v63 = vsel %vm3433_vm15, %v3440_v55, %v3442_v40 }
 0x359   :  { %v3446_v30 = vsel %vm3434_vm0, %v3428_v44, %v3445_v0  ;;  %v6697_v18 = vmul.u32.u64.low %v6673_v11, %v3443_v63  ;;  %v6698_v32 = vmul.u32.u64.high %v6673_v11, %v3443_v63, %v6697_v18  ;;  %v1822_v6 = vsub.s32 4, %v6657_v58 }
 0x35a   :  { %vm3848_vm1 = vcmp.lt.s32.totalorder %v3847_v16, 0  ;;  %v3447_v26 = vsel %vm3433_vm15, %v3444_v39, %v3446_v30  ;;  %vm1643_vm2 = vcmp.gt.s32.totalorder %v1642_v33, 0  ;;  %vm3180_vm3 = vweird.f32 %v6323_v47 }
 0x35b   :  { %v1807_v17 = vsel %vm3848_vm1, 0, %v3847_v16  ;;  %v3439_v46 = vsel %vm3433_vm15, %v3436_v5, %v3438_v2  ;;  %v6705_v23 = vmul.u32.u64.low %v6673_v11, %v3447_v26  ;;  %v6706_v60 = vmul.u32.u64.high %v6673_v11, %v3447_v26, %v6705_v23 }
 0x35c   :  { %v1808_v1 = vsub.s32 32, %v1807_v17  ;;  %v1812_v50 = vsub.s32 4294967266, %v1807_v17  ;;  %v1644_v42 = vsel %vm1643_vm2, %v1642_v33, 0  ;;  %v1809_v28 = vshll.u32 %v6675_v61, %v1807_v17 }
 0x35d   :  { %v1646_v37 = vand.u32 31, %v1644_v42  ;;  %vm3183_vm4 = vcmp.lt.s32.totalorder %v6659_v19, 2  ;;  %vm3184_vm5 = vcmp.eq.s32.totalorder %v6659_v19, 0  ;;  %vm6714_vm6 = vcmp.le.f32.partialorder %v1736_v15, 0.7853982 }
 0x35e   :  { %v1810_v54 = vshrl.u32 %v6667_v34, %v1808_v1  ;;  %v1813_v22 = vadd.s32 127, %v1812_v50  ;;  %v3458_v43 = vadd.s32 1, %v6698_v32  ;;  %vm3187_vm7 = vcmp.eq.s32.totalorder %v6659_v19, 2 }
 0x35f   :  { %v4279_v3 = vpop.eup %4278  ;;  %v1823_v34 = vsel %vm1738_vm14, %v1822_v6, %v6657_v58  ;;  %v3455_v44 = vmul.u32 %v6673_v11, %v3439_v46  ;;  %vm3457_vm8 = vc.u32 %v6706_v60, %v6697_v18  ;;  %v1647_v15 = vsub.s32 32, %v1646_v37 }
 0x360   :  { %v1811_v61 = vor.u32 %v1810_v54, %v1809_v28  ;;  %v1814_v14 = vshll.u32 %v1813_v22, 23  ;;  %v4281_v20 = vpop.eup %4280  ;;  %v3188_v59 = vxor.u32 2147483648, %v4279_v3  ;;  %v3459_v62 = vsel %vm3457_vm8, %v3458_v43, %v6698_v32 }
 0x361   :  { %v3185_v8 = vxor.u32 2147483648, %v4281_v20  ;;  %v6727_v13 = vshll.u32 %v1640_v10, 8  ;;  %v1825_v57 = vsel %vm6714_vm6, 0, %v1823_v34  ;;  %v3460_v55 = vadd.s32 %v3459_v62, %v3455_v44 }
 0x362   :  { %v1815_v51 = vor.u32 4788187, %v1814_v14  ;;  %v3189_v24 = vsel %vm3187_vm7, %v3188_v59, %v4281_v20  ;;  %v6733_v58 = vadd.f32 %v6569_v53, %v6277_v41  ;;  %v1818_v45 = vcvt.s32.f32 %v1811_v61 }
 0x363   :  { %v3186_v11 = vsel %vm3184_vm5, %v4279_v3, %v3185_v8  ;;  %v6737_v39 = vshrl.u32 %v1644_v42, 5  ;;  %v3461_v5 = vadd.s32 536870912, %v3460_v55  ;;  %v1650_v40 = vshrl.u32 %v4344_v25, %v1647_v15 }
 0x364   :  { %v1816_v16 = vand.u32 2147483647, %v1815_v51  ;;  %v3190_v10 = vsel %vm3183_vm4, %v3186_v11, %v3189_v24  ;;  %v1653_v0 = vshrl.u32 %v4345_v27, %v1647_v15  ;;  %v1649_v2 = vshll.u32 %v4343_v21, %v1646_v37 }
 0x365   :  { %v3191_v33 = vsel %vm3180_vm3, nan, %v3190_v10  ;;  %v1656_v63 = vshrl.u32 %v4346_v29, %v1647_v15  ;;  %v3462_v30 = vshrl.u32 %v3461_v5, 30  ;;  %v1652_v17 = vshll.u32 %v4344_v25, %v1646_v37 }
 0x366   :  { %v1819_v41 = vmul.f32 %v1818_v45, %v1816_v16  ;;  %3738 = vst [vmem:[#allocation2 + $0xd0] sm:$0xff] %v3191_v33  ;;  %v1655_v19 = vshll.u32 %v4345_v27, %v1646_v37  ;;  %v1659_v26 = vshrl.u32 %v4347_v31, %v1647_v15  ;;  %v1658_v1 = vshll.u32 %v4346_v29, %v1646_v37 }
 0x367   :  { %v1661_v50 = vshll.u32 %v4347_v31, %v1646_v37  ;;  %v1662_v47 = vshrl.u32 %v4348_v38, %v1647_v15  ;;  %v1829_v6 = vadd.s32 3, %v1825_v57  ;;  %v3463_v46 = vshll.u32 %v3462_v30, 30 }
 0x368   :  { %v1820_v32 = vxor.u32 2147483648, %v1819_v41  ;;  %v1651_v23 = vor.u32 %v1650_v40, %v1649_v2  ;;  %v1654_v42 = vor.u32 %v1653_v0, %v1652_v17  ;;  %v1657_v54 = vor.u32 %v1656_v63, %v1655_v19 }
 0x369   :  { %v1660_v22 = vor.u32 %v1659_v26, %v1658_v1  ;;  %v1663_v43 = vor.u32 %v1662_v47, %v1661_v50  ;;  %v6758_v61 = vsub.s32 %v3460_v55, %v3463_v46  ;;  %v1648_v37 = vshrl.u32 %v4343_v21, %v1647_v15 }
 0x36a   :  { %v1821_v28 = vsel %vm1738_vm14, %v1820_v32, %v1819_v41  ;;  %v3299_v14 = vand.u32 2139095040, %v6733_v58  ;;  %vm1664_vm10 = vcmp.lt.s32.totalorder %v6737_v39, 1  ;;  %vm1665_vm9 = vcmp.lt.s32.totalorder %v6737_v39, 2 }
 0x36b   :  { %v1824_v3 = vsel %vm6714_vm6, %v6456_v48, %v1821_v28  ;;  %vm1666_vm11 = vcmp.lt.s32.totalorder %v6737_v39, 3  ;;  %v3466_v34 = vsub.s32 0, %v6758_v61  ;;  %vm1667_vm12 = vcmp.lt.s32.totalorder %v6737_v39, 4 }
 0x36c   :  { %4282 = vcosq.f32 %v1824_v3  ;;  %v1672_v7 = vsel %vm1664_vm10, %v1651_v23, %v1654_v42  ;;  %v1669_v20 = vsel %vm1667_vm12, %v1657_v54, 2102212464  ;;  %v1673_v59 = vsel %vm1667_vm12, %v1660_v22, 920167782 }
 0x36d   :  { %4284 = vsinq.f32 %v1824_v3  ;;  %v1676_v44 = vsel %vm1664_vm10, %v1654_v42, %v1657_v54  ;;  %v1677_v15 = vsel %vm1667_vm12, %v1663_v43, 1326507024  ;;  %v3910_v8 = vmin.u32 %v3466_v34, %v6758_v61 }
 0x36e   :  { %v3486_v51 = vsub.s32 4, %v3462_v30  ;;  %v1674_v62 = vsel %vm1666_vm11, %v1657_v54, %v1673_v59  ;;  %v1678_v24 = vsel %vm1666_vm11, %v1660_v22, %v1677_v15  ;;  %v1830_v57 = vand.u32 3, %v1829_v6 }
 0x36f   :  { %v1675_v55 = vsel %vm1665_vm9, %v1672_v7, %v1674_v62  ;;  %v1679_v11 = vsel %vm1665_vm9, %v1676_v44, %v1678_v24  ;;  %v3300_v16 = vshrl.u32 %v3299_v14, 23  ;;  %vm3402_vm13 = vcmp.lt.s32.totalorder %v6573_v49, 0 }
 0x370   :  { %v3468_v45 = vclz %v3910_v8  ;;  %v1668_v10 = vsel %vm1664_vm10, %v1648_v37, %v1651_v23  ;;  %v1670_v5 = vsel %vm1666_vm11, %v1654_v42, %v1669_v20  ;;  %vm1828_vm14 = vweird.f32 %v6456_v48 }
 0x371   :  { %v6786_v40 = vmul.u32.u64.low %v6727_v13, %v1679_v11  ;;  %v6787_v0 = vmul.u32.u64.high %v6727_v13, %v1679_v11, %v6786_v40  ;;  %v6790_v33 = vmul.u32.u64.low %v6727_v13, %v1675_v55  ;;  %v6791_v41 = vmul.u32.u64.high %v6727_v13, %v1675_v55, %v6790_v33 }
 0x372   :  { %vm6797_vm15 = vcmp.le.f32.partialorder %v3400_v9, 0.7853982  ;;  %v3911_v63 = vadd.s32 4294967294, %v3468_v45  ;;  %v3487_v17 = vsel %vm3402_vm13, %v3486_v51, %v3462_v30  ;;  %v3905_v19 = vadd.s32 4294967169, %v3300_v16 }
 0x373   :  { %vm1831_vm0 = vcmp.lt.s32.totalorder %v1830_v57, 2  ;;  %vm1832_vm1 = vcmp.eq.s32.totalorder %v1830_v57, 0  ;;  %vm1835_vm2 = vcmp.eq.s32.totalorder %v1830_v57, 2  ;;  %v1671_v26 = vsel %vm1665_vm9, %v1668_v10, %v1670_v5 }
 0x374   :  { %v3456_v32 = vadd.s32 %v6697_v18, %v6706_v60  ;;  %vm3912_vm3 = vcmp.lt.s32.totalorder %v3911_v63, 0  ;;  %v3296_v9 = vand.u32 2147483647, %v6733_v58  ;;  %v3306_v1 = vadd.s32 1, %v3905_v19 }
 0x375   :  { %v3471_v47 = vsel %vm3912_vm3, 0, %v3911_v63  ;;  %v3489_v6 = vsel %vm6797_vm15, 0, %v3487_v17  ;;  %vm1689_vm4 = vc.u32 %v6787_v0, %v6790_v33  ;;  %v1690_v30 = vadd.s32 1, %v6791_v41 }
 0x376   :  { %v4283_v50 = vpop.eup %4282  ;;  %v3472_v23 = vsub.s32 32, %v3471_v47  ;;  %v3476_v42 = vsub.s32 4294967266, %v3471_v47  ;;  %v1687_v18 = vmul.u32 %v6727_v13, %v1671_v26  ;;  %v3473_v28 = vshll.u32 %v6758_v61, %v3471_v47 }
 0x377   :  { %v4285_v46 = vpop.eup %4284  ;;  %v1836_v39 = vxor.u32 2147483648, %v4283_v50  ;;  %v1691_v54 = vsel %vm1689_vm4, %v1690_v30, %v6791_v41  ;;  %vm3307_vm5 = vcmp.gt.s32.totalorder %v3306_v1, 0  ;;  %v3493_v34 = vadd.s32 3, %v3489_v6 }
 0x378   :  { %v1833_v60 = vxor.u32 2147483648, %v4285_v46  ;;  %v3474_v43 = vshrl.u32 %v3456_v32, %v3472_v23  ;;  %v3477_v3 = vadd.s32 127, %v3476_v42  ;;  %v1692_v37 = vadd.s32 %v1691_v54, %v1687_v18 }
 0x379   :  { %v1837_v22 = vsel %vm1835_vm2, %v1836_v39, %v4285_v46  ;;  %v3303_v7 = vand.u32 8388607, %v3296_v9  ;;  %v3308_v20 = vsel %vm3307_vm5, %v3306_v1, 0  ;;  %v6825_v45 = vand.u32 3, %v3493_v34 }
 0x37a   :  { %v1834_v14 = vsel %vm1832_vm1, %v4283_v50, %v1833_v60  ;;  %v3475_v59 = vor.u32 %v3474_v43, %v3473_v28  ;;  %v3478_v44 = vshll.u32 %v3477_v3, 23  ;;  %v1693_v61 = vadd.s32 536870912, %v1692_v37 }
 0x37b   :  { %v1838_v13 = vsel %vm1831_vm0, %v1834_v14, %v1837_v22  ;;  %v3310_v8 = vand.u32 31, %v3308_v20  ;;  %v3304_v24 = vor.u32 8388608, %v3303_v7  ;;  %v6833_v40 = vadd.f32 %v6569_v53, %v6386_v35 }
 0x37c   :  { %v1839_v15 = vsel %vm1828_vm14, nan, %v1838_v13  ;;  %v3479_v51 = vor.u32 4788187, %v3478_v44  ;;  %v6823_v62 = vshrl.u32 %v1693_v61, 30  ;;  %v3482_v16 = vcvt.s32.f32 %v3475_v59 }
 0x37d   :  { %3725 = vst [vmem:[#allocation2 + $0x68] sm:$0xff] %v1839_v15  ;;  %v3311_v55 = vsub.s32 32, %v3310_v8  ;;  %v3313_v17 = vshll.u32 %v4343_v21, %v3310_v8  ;;  %v3309_v26 = vshrl.u32 %v3308_v20, 5  ;;  %v3316_v32 = vshll.u32 %v4344_v25, %v3310_v8 }
 0x37e   :  { %v3480_v11 = vand.u32 2147483647, %v3479_v51  ;;  %v1695_v57 = vshll.u32 %v6823_v62, 30  ;;  %v3319_v1 = vshll.u32 %v4345_v27, %v3310_v8  ;;  %v6841_v50 = vshll.u32 %v3304_v24, 8 }
 0x37f   :  { %v3314_v10 = vshrl.u32 %v4344_v25, %v3311_v55  ;;  %v3317_v5 = vshrl.u32 %v4345_v27, %v3311_v55  ;;  %v3320_v48 = vshrl.u32 %v4346_v29, %v3311_v55  ;;  %v3323_v19 = vshrl.u32 %v4347_v31, %v3311_v55 }
 0x380   :  { %v3483_v41 = vmul.f32 %v3482_v16, %v3480_v11  ;;  %v6835_v63 = vsub.s32 %v1692_v37, %v1695_v57  ;;  %v3322_v35 = vshll.u32 %v4346_v29, %v3310_v8  ;;  %v3325_v23 = vshll.u32 %v4347_v31, %v3310_v8 }
 0x381   :  { %v3315_v30 = vor.u32 %v3314_v10, %v3313_v17  ;;  %v3318_v46 = vor.u32 %v3317_v5, %v3316_v32  ;;  %v3321_v39 = vor.u32 %v3320_v48, %v3319_v1  ;;  %v3326_v42 = vshrl.u32 %v4348_v38, %v3311_v55 }
 0x382   :  { %v3484_v47 = vxor.u32 2147483648, %v3483_v41  ;;  %v1698_v6 = vsub.s32 0, %v6835_v63  ;;  %v3324_v28 = vor.u32 %v3323_v19, %v3322_v35  ;;  %v1947_v54 = vand.u32 2139095040, %v6833_v40 }
 0x383   :  { %v1718_v43 = vsub.s32 4, %v6823_v62  ;;  %v3312_v3 = vshrl.u32 %v4343_v21, %v3311_v55  ;;  %v3327_v37 = vor.u32 %v3326_v42, %v3325_v23  ;;  %vm1634_vm6 = vcmp.lt.s32.totalorder %v6634_v52, 0 }
 0x384   :  { %v3485_v18 = vsel %vm3402_vm13, %v3484_v47, %v3483_v41  ;;  %v3842_v60 = vmin.u32 %v1698_v6, %v6835_v63  ;;  %vm3328_vm7 = vcmp.lt.s32.totalorder %v3309_v26, 1  ;;  %vm3331_vm8 = vcmp.lt.s32.totalorder %v3309_v26, 4 }
 0x385   :  { %v3488_v22 = vsel %vm6797_vm15, %v6573_v49, %v3485_v18  ;;  %vm3329_vm10 = vcmp.lt.s32.totalorder %v3309_v26, 2  ;;  %v3333_v34 = vsel %vm3331_vm8, %v3321_v39, 2102212464  ;;  %v3336_v7 = vsel %vm3328_vm7, %v3315_v30, %v3318_v46 }
 0x386   :  { %4286 = vcosq.f32 %v3488_v22  ;;  %v1700_v14 = vclz %v3842_v60  ;;  %vm3330_vm9 = vcmp.lt.s32.totalorder %v3309_v26, 3  ;;  %v3337_v13 = vsel %vm3331_vm8, %v3324_v28, 920167782 }
 0x387   :  { %4288 = vsinq.f32 %v3488_v22  ;;  %v3340_v2 = vsel %vm3328_vm7, %v3318_v46, %v3321_v39  ;;  %vm6859_vm11 = vcmp.le.f32.partialorder %v1632_v12, 0.7853982  ;;  %v3332_v44 = vsel %vm3328_vm7, %v3312_v3, %v3315_v30 }
 0x388   :  { %v3843_v20 = vadd.s32 4294967294, %v1700_v14  ;;  %v3338_v61 = vsel %vm3330_vm9, %v3321_v39, %v3337_v13  ;;  %v3341_v15 = vsel %vm3331_vm8, %v3327_v37, 1326507024  ;;  %v1948_v8 = vshrl.u32 %v1947_v54, 23 }
 0x389   :  { %v3334_v51 = vsel %vm3330_vm9, %v3318_v46, %v3333_v34  ;;  %v3339_v24 = vsel %vm3329_vm10, %v3336_v7, %v3338_v61  ;;  %v3342_v55 = vsel %vm3330_vm9, %v3324_v28, %v3341_v15  ;;  %vm3495_vm13 = vcmp.lt.s32.totalorder %v6825_v45, 2 }
 0x38a   :  { %vm3844_vm12 = vcmp.lt.s32.totalorder %v3843_v20, 0  ;;  %v3343_v16 = vsel %vm3329_vm10, %v3340_v2, %v3342_v55  ;;  %v6866_v57 = vmul.u32.u64.low %v6841_v50, %v3339_v24  ;;  %v6867_v10 = vmul.u32.u64.high %v6841_v50, %v3339_v24, %v6866_v57 }
 0x38b   :  { %v1703_v11 = vsel %vm3844_vm12, 0, %v3843_v20  ;;  %v1688_v12 = vadd.s32 %v6790_v33, %v6787_v0  ;;  %v3853_v41 = vadd.s32 4294967169, %v1948_v8  ;;  %vm3492_vm14 = vweird.f32 %v6573_v49 }
 0x38c   :  { %v1704_v5 = vsub.s32 32, %v1703_v11  ;;  %v1708_v48 = vsub.s32 4294967266, %v1703_v11  ;;  %vm3496_vm15 = vcmp.eq.s32.totalorder %v6825_v45, 0  ;;  %v3335_v17 = vsel %vm3329_vm10, %v3332_v44, %v3334_v51 }
 0x38d   :  { %v6877_v19 = vmul.u32.u64.low %v6841_v50, %v3343_v16  ;;  %v6878_v32 = vmul.u32.u64.high %v6841_v50, %v3343_v16, %v6877_v19  ;;  %v1705_v1 = vshll.u32 %v6835_v63, %v1703_v11  ;;  %v1954_v30 = vadd.s32 1, %v3853_v41 }
 0x38e   :  { %v1706_v47 = vshrl.u32 %v1688_v12, %v1704_v5  ;;  %v1709_v6 = vadd.s32 127, %v1708_v48  ;;  %vm3499_vm0 = vcmp.eq.s32.totalorder %v6825_v45, 2  ;;  %v1719_v0 = vsel %vm1634_vm6, %v1718_v43, %v6823_v62 }
 0x38f   :  { %v3354_v33 = vadd.s32 1, %v6867_v10  ;;  %v6888_v26 = vadd.f32 %v6569_v53, %v6458_v36  ;;  %v1944_v63 = vand.u32 2147483647, %v6833_v40  ;;  %vm1955_vm1 = vcmp.gt.s32.totalorder %v1954_v30, 0 }
 0x390   :  { %v4287_v35 = vpop.eup %4286  ;;  %v1707_v46 = vor.u32 %v1706_v47, %v1705_v1  ;;  %v1710_v39 = vshll.u32 %v1709_v6, 23  ;;  %v3351_v18 = vmul.u32 %v6841_v50, %v3335_v17  ;;  %vm3353_vm2 = vc.u32 %v6878_v32, %v6866_v57 }
 0x391   :  { %v4289_v23 = vpop.eup %4288  ;;  %v3500_v42 = vxor.u32 2147483648, %v4287_v35  ;;  %v1956_v62 = vsel %vm1955_vm1, %v1954_v30, 0  ;;  %v1721_v36 = vsel %vm6859_vm11, 0, %v1719_v0  ;;  %v3355_v54 = vsel %vm3353_vm2, %v3354_v33, %v6867_v10 }
 0x392   :  { %v3497_v60 = vxor.u32 2147483648, %v4289_v23  ;;  %v1711_v28 = vor.u32 4788187, %v1710_v39  ;;  %v3356_v43 = vadd.s32 %v3355_v54, %v3351_v18  ;;  %v1958_v3 = vand.u32 31, %v1956_v62 }
 0x393   :  { %v3501_v22 = vsel %vm3499_vm0, %v3500_v42, %v4289_v23  ;;  %v6901_v37 = vadd.f32 %v6569_v53, %v6539_v4  ;;  %v1714_v34 = vcvt.s32.f32 %v1707_v46  ;;  %v1951_v7 = vand.u32 8388607, %v1944_v63 }
 0x394   :  { %v3498_v50 = vsel %vm3496_vm15, %v4287_v35, %v3497_v60  ;;  %v1712_v14 = vand.u32 2147483647, %v1711_v28  ;;  %v1725_v13 = vadd.s32 3, %v1721_v36  ;;  %v3357_v2 = vadd.s32 536870912, %v3356_v43 }
 0x395   :  { %v3502_v20 = vsel %vm3495_vm13, %v3498_v50, %v3501_v22  ;;  %v1959_v44 = vsub.s32 32, %v1958_v3  ;;  %v1961_v4 = vshll.u32 %v4343_v21, %v1958_v3  ;;  %v1964_v53 = vshll.u32 %v4344_v25, %v1958_v3 }
 0x396   :  { %v3503_v61 = vsel %vm3492_vm14, nan, %v3502_v20  ;;  %v1715_v15 = vmul.f32 %v1714_v34, %v1712_v14  ;;  %v6913_v8 = vshrl.u32 %v3357_v2, 30  ;;  %v1967_v45 = vshll.u32 %v4345_v27, %v1958_v3 }
 0x397   :  { %3741 = vst [vmem:[#allocation2 + $0xe8] sm:$0xff] %v3503_v61  ;;  %v1962_v51 = vshrl.u32 %v4344_v25, %v1959_v44  ;;  %v1965_v24 = vshrl.u32 %v4345_v27, %v1959_v44  ;;  %v1968_v11 = vshrl.u32 %v4346_v29, %v1959_v44  ;;  %v1970_v49 = vshll.u32 %v4346_v29, %v1958_v3 }
 0x398   :  { %v1716_v55 = vxor.u32 2147483648, %v1715_v15  ;;  %v1971_v16 = vshrl.u32 %v4347_v31, %v1959_v44  ;;  %v3359_v10 = vshll.u32 %v6913_v8, 30  ;;  %v1957_v12 = vshrl.u32 %v1956_v62, 5 }
 0x399   :  { %v1963_v5 = vor.u32 %v1962_v51, %v1961_v4  ;;  %v3611_v48 = vand.u32 2139095040, %v6888_v26  ;;  %v1966_v17 = vor.u32 %v1965_v24, %v1964_v53  ;;  %v1969_v19 = vor.u32 %v1968_v11, %v1967_v45 }
 0x39a   :  { %v1717_v41 = vsel %vm1634_vm6, %v1716_v55, %v1715_v15  ;;  %v1972_v1 = vor.u32 %v1971_v16, %v1970_v49  ;;  %v6928_v6 = vsub.s32 %v3356_v43, %v3359_v10  ;;  %v1973_v30 = vshll.u32 %v4347_v31, %v1958_v3 }
 0x39b   :  { %v1720_v47 = vsel %vm6859_vm11, %v6634_v52, %v1717_v41  ;;  %v1974_v0 = vshrl.u32 %v4348_v38, %v1959_v44  ;;  %v6932_v33 = vand.u32 3, %v1725_v13  ;;  %v1952_v35 = vor.u32 8388608, %v1951_v7 }
 0x39c   :  { %4290 = vcosq.f32 %v1720_v47  ;;  %v3608_v46 = vand.u32 2147483647, %v6888_v26  ;;  %vm3298_vm3 = vcmp.lt.s32.totalorder %v6733_v58, 0  ;;  %v3362_v39 = vsub.s32 0, %v6928_v6 }
 0x39d   :  { %4292 = vsinq.f32 %v1720_v47  ;;  %v1975_v23 = vor.u32 %v1974_v0, %v1973_v30  ;;  %v3612_v59 = vshrl.u32 %v3611_v48, 23  ;;  %v1960_v42 = vshrl.u32 %v4343_v21, %v1959_v44 }
 0x39e   :  { %vm1976_vm4 = vcmp.lt.s32.totalorder %v1957_v12, 1  ;;  %vm1978_vm5 = vcmp.lt.s32.totalorder %v1957_v12, 3  ;;  %vm1979_vm6 = vcmp.lt.s32.totalorder %v1957_v12, 4  ;;  %v3906_v18 = vmin.u32 %v3362_v39, %v6928_v6 }
 0x39f   :  { %v1981_v62 = vsel %vm1979_vm6, %v1969_v19, 2102212464  ;;  %v1984_v60 = vsel %vm1976_vm4, %v1963_v5, %v1966_v17  ;;  %v1985_v28 = vsel %vm1979_vm6, %v1972_v1, 920167782  ;;  %v1988_v54 = vsel %vm1976_vm4, %v1966_v17, %v1969_v19 }
 0x3a0   :  { %v1986_v36 = vsel %vm1978_vm5, %v1969_v19, %v1985_v28  ;;  %v1989_v22 = vsel %vm1979_vm6, %v1975_v23, 1326507024  ;;  %v1992_v43 = vshll.u32 %v1952_v35, 8  ;;  %vm6942_vm7 = vcmp.le.f32.partialorder %v3296_v9, 0.7853982 }
 0x3a1   :  { %v3364_v50 = vclz %v3906_v18  ;;  %vm1977_vm8 = vcmp.lt.s32.totalorder %v1957_v12, 2  ;;  %v1980_v14 = vsel %vm1976_vm4, %v1960_v42, %v1963_v5  ;;  %v1982_v34 = vsel %vm1978_vm5, %v1966_v17, %v1981_v62 }
 0x3a2   :  { %v3382_v7 = vsub.s32 4, %v6913_v8  ;;  %v1987_v20 = vsel %vm1977_vm8, %v1984_v60, %v1986_v36  ;;  %v1990_v13 = vsel %vm1978_vm5, %v1972_v1, %v1989_v22  ;;  %v3917_v2 = vadd.s32 4294967169, %v3612_v59 }
 0x3a3   :  { %vm1724_vm10 = vweird.f32 %v6634_v52  ;;  %v3907_v44 = vadd.s32 4294967294, %v3364_v50  ;;  %v1991_v61 = vsel %vm1977_vm8, %v1988_v54, %v1990_v13  ;;  %vm1727_vm9 = vcmp.lt.s32.totalorder %v6932_v33, 2 }
 0x3a4   :  { %v6950_v15 = vmul.u32.u64.low %v1992_v43, %v1987_v20  ;;  %v6951_v9 = vmul.u32.u64.high %v1992_v43, %v1987_v20, %v6950_v15  ;;  %v1983_v4 = vsel %vm1977_vm8, %v1980_v14, %v1982_v34  ;;  %vm1728_vm11 = vcmp.eq.s32.totalorder %v6932_v33, 0 }
 0x3a5   :  { %v6955_v53 = vmul.u32.u64.low %v1992_v43, %v1991_v61  ;;  %v6956_v51 = vmul.u32.u64.high %v1992_v43, %v1991_v61, %v6955_v53  ;;  %vm1731_vm12 = vcmp.eq.s32.totalorder %v6932_v33, 2  ;;  %vm3908_vm13 = vcmp.lt.s32.totalorder %v3907_v44, 0 }
 0x3a6   :  { %v3618_v24 = vadd.s32 1, %v3917_v2  ;;  %v4291_v45 = vpop.eup %4290  ;;  %v3352_v55 = vadd.s32 %v6866_v57, %v6878_v32  ;;  %v3367_v11 = vsel %vm3908_vm13, 0, %v3907_v44  ;;  %v3383_v49 = vsel %vm3298_vm3, %v3382_v7, %v6913_v8 }
 0x3a7   :  { %v3615_v16 = vand.u32 8388607, %v3608_v46  ;;  %v4293_v10 = vpop.eup %4292  ;;  %v1732_v12 = vxor.u32 2147483648, %v4291_v45  ;;  %v3368_v5 = vsub.s32 32, %v3367_v11  ;;  %v3372_v48 = vsub.s32 4294967266, %v3367_v11 }
 0x3a8   :  { %v1999_v41 = vmul.u32 %v1992_v43, %v1983_v4  ;;  %v1729_v17 = vxor.u32 2147483648, %v4293_v10  ;;  %v3369_v19 = vshll.u32 %v6928_v6, %v3367_v11  ;;  %vm2001_vm14 = vc.u32 %v6956_v51, %v6950_v15 }
 0x3a9   :  { %v2002_v57 = vadd.s32 1, %v6951_v9  ;;  %v1733_v32 = vsel %vm1731_vm12, %v1732_v12, %v4293_v10  ;;  %v3370_v8 = vshrl.u32 %v3352_v55, %v3368_v5  ;;  %v3373_v1 = vadd.s32 127, %v3372_v48 }
 0x3aa   :  { %vm3619_vm15 = vcmp.gt.s32.totalorder %v3618_v24, 0  ;;  %v1730_v47 = vsel %vm1728_vm11, %v4291_v45, %v1729_v17  ;;  %v3385_v30 = vsel %vm6942_vm7, 0, %v3383_v49  ;;  %v3616_v36 = vor.u32 8388608, %v3615_v16 }
 0x3ab   :  { %v2003_v0 = vsel %vm2001_vm14, %v2002_v57, %v6951_v9  ;;  %v3620_v6 = vsel %vm3619_vm15, %v3618_v24, 0  ;;  %v1734_v35 = vsel %vm1727_vm9, %v1730_v47, %v1733_v32  ;;  %v3371_v39 = vor.u32 %v3370_v8, %v3369_v19 }
 0x3ac   :  { %v3374_v23 = vshll.u32 %v3373_v1, 23  ;;  %v2004_v59 = vadd.s32 %v2003_v0, %v1999_v41  ;;  %v1735_v42 = vsel %vm1724_vm10, nan, %v1734_v35  ;;  %v3622_v18 = vand.u32 31, %v3620_v6 }
 0x3ad   :  { %3724 = vst [vmem:[#allocation2 + $0x60] sm:$0xff] %v1735_v42  ;;  %v3389_v28 = vadd.s32 3, %v3385_v30  ;;  %v3378_v43 = vcvt.s32.f32 %v3371_v39  ;;  %v1843_v33 = vand.u32 2139095040, %v6901_v37  ;;  %v3621_v14 = vshrl.u32 %v3620_v6, 5 }
 0x3ae   :  { %v3375_v62 = vor.u32 4788187, %v3374_v23  ;;  %v2005_v60 = vadd.s32 536870912, %v2004_v59  ;;  %v3623_v54 = vsub.s32 32, %v3622_v18  ;;  %v3631_v2 = vshll.u32 %v4345_v27, %v3622_v18 }
 0x3af   :  { %v3625_v61 = vshll.u32 %v4343_v21, %v3622_v18  ;;  %v3628_v9 = vshll.u32 %v4344_v25, %v3622_v18  ;;  %v3634_v4 = vshll.u32 %v4346_v29, %v3622_v18  ;;  %v6995_v45 = vand.u32 3, %v3389_v28 }
 0x3b0   :  { %v3376_v22 = vand.u32 2147483647, %v3375_v62  ;;  %v6982_v50 = vshrl.u32 %v2005_v60, 30  ;;  %v3626_v34 = vshrl.u32 %v4344_v25, %v3623_v54  ;;  %v3629_v7 = vshrl.u32 %v4345_v27, %v3623_v54 }
 0x3b1   :  { %v3632_v52 = vshrl.u32 %v4346_v29, %v3623_v54  ;;  %v3635_v44 = vshrl.u32 %v4347_v31, %v3623_v54  ;;  %v3638_v53 = vshrl.u32 %v4348_v38, %v3623_v54  ;;  %v3637_v12 = vshll.u32 %v4347_v31, %v3622_v18 }
 0x3b2   :  { %v3379_v20 = vmul.f32 %v3378_v43, %v3376_v22  ;;  %v2007_v13 = vshll.u32 %v6982_v50, 30  ;;  %v3627_v49 = vor.u32 %v3626_v34, %v3625_v61  ;;  %v3630_v16 = vor.u32 %v3629_v7, %v3628_v9 }
 0x3b3   :  { %v3633_v11 = vor.u32 %v3632_v52, %v3631_v2  ;;  %v3636_v10 = vor.u32 %v3635_v44, %v3634_v4  ;;  %v3656_v41 = vshll.u32 %v3616_v36, 8  ;;  %v1844_v17 = vshrl.u32 %v1843_v33, 23 }
 0x3b4   :  { %v3380_v24 = vxor.u32 2147483648, %v3379_v20  ;;  %v6997_v55 = vsub.s32 %v2004_v59, %v2007_v13  ;;  %v3624_v57 = vshrl.u32 %v4343_v21, %v3623_v54  ;;  %v3639_v32 = vor.u32 %v3638_v53, %v3637_v12 }
 0x3b5   :  { %vm3643_vm0 = vcmp.lt.s32.totalorder %v3621_v14, 4  ;;  %vm3640_vm1 = vcmp.lt.s32.totalorder %v3621_v14, 1  ;;  %vm3642_vm2 = vcmp.lt.s32.totalorder %v3621_v14, 3  ;;  %v3849_v59 = vadd.s32 4294967169, %v1844_v17 }
 0x3b6   :  { %v3381_v5 = vsel %vm3298_vm3, %v3380_v24, %v3379_v20  ;;  %v2010_v48 = vsub.s32 0, %v6997_v55  ;;  %v3645_v1 = vsel %vm3643_vm0, %v3633_v11, 2102212464  ;;  %v3648_v47 = vsel %vm3640_vm1, %v3627_v49, %v3630_v16 }
 0x3b7   :  { %v3384_v19 = vsel %vm6942_vm7, %v6733_v58, %v3381_v5  ;;  %v3649_v30 = vsel %vm3643_vm0, %v3636_v10, 920167782  ;;  %v3644_v6 = vsel %vm3640_vm1, %v3624_v57, %v3627_v49  ;;  %v3646_v35 = vsel %vm3642_vm2, %v3630_v16, %v3645_v1 }
 0x3b8   :  { %4294 = vcosq.f32 %v3384_v19  ;;  %v3854_v8 = vmin.u32 %v2010_v48, %v6997_v55  ;;  %v3652_v39 = vsel %vm3640_vm1, %v3630_v16, %v3633_v11  ;;  %vm3641_vm3 = vcmp.lt.s32.totalorder %v3621_v14, 2 }
 0x3b9   :  { %4296 = vsinq.f32 %v3384_v19  ;;  %v3650_v3 = vsel %vm3642_vm2, %v3633_v11, %v3649_v30  ;;  %v3653_v23 = vsel %vm3643_vm0, %v3639_v32, 1326507024  ;;  %v1840_v60 = vand.u32 2147483647, %v6901_v37 }
 0x3ba   :  { %v2012_v0 = vclz %v3854_v8  ;;  %v3651_v18 = vsel %vm3641_vm3, %v3648_v47, %v3650_v3  ;;  %v3654_v62 = vsel %vm3642_vm2, %v3636_v10, %v3653_v23  ;;  %v3647_v28 = vsel %vm3641_vm3, %v3644_v6, %v3646_v35 }
 0x3bb   :  { %v3655_v36 = vsel %vm3641_vm3, %v3652_v39, %v3654_v62  ;;  %v7009_v54 = vmul.u32.u64.low %v3656_v41, %v3651_v18  ;;  %v7010_v22 = vmul.u32.u64.high %v3656_v41, %v3651_v18, %v7009_v54  ;;  %v1850_v34 = vadd.s32 1, %v3849_v59 }
 0x3bc   :  { %v3855_v42 = vadd.s32 4294967294, %v2012_v0  ;;  %v7013_v43 = vmul.u32.u64.low %v3656_v41, %v3655_v36  ;;  %v7014_v33 = vmul.u32.u64.high %v3656_v41, %v3655_v36, %v7013_v43  ;;  %vm3395_vm5 = vcmp.eq.s32.totalorder %v6995_v45, 2 }
 0x3bd   :  { %vm1946_vm6 = vcmp.lt.s32.totalorder %v6833_v40, 0  ;;  %v2030_v7 = vsub.s32 4, %v6982_v50  ;;  %v2000_v52 = vadd.s32 %v6950_v15, %v6956_v51  ;;  %vm1851_vm7 = vcmp.gt.s32.totalorder %v1850_v34, 0 }
 0x3be   :  { %vm3856_vm4 = vcmp.lt.s32.totalorder %v3855_v42, 0  ;;  %v3663_v2 = vmul.u32 %v3656_v41, %v3647_v28  ;;  %v3666_v44 = vadd.s32 1, %v7010_v22  ;;  %v1847_v61 = vand.u32 8388607, %v1840_v60 }
 0x3bf   :  { %v2015_v14 = vsel %vm3856_vm4, 0, %v3855_v42  ;;  %v1852_v9 = vsel %vm1851_vm7, %v1850_v34, 0  ;;  %vm3665_vm8 = vc.u32 %v7014_v33, %v7009_v54  ;;  %v2031_v51 = vsel %vm1946_vm6, %v2030_v7, %v6982_v50 }
 0x3c0   :  { %v2016_v20 = vsub.s32 32, %v2015_v14  ;;  %v2020_v13 = vsub.s32 4294967266, %v2015_v14  ;;  %v2017_v53 = vshll.u32 %v6997_v55, %v2015_v14  ;;  %v3667_v16 = vsel %vm3665_vm8, %v3666_v44, %v7010_v22  ;;  %v4318_v14 = vld [vmem:[%s7173_s2] ss:$0 sm:$0xff]  ;;  %s4349_s2 = smov [#allocation2]  }
 0x3c1   :  { %v1854_v10 = vand.u32 31, %v1852_v9  ;;  %v3668_v41 = vadd.s32 %v3667_v16, %v3663_v2  ;;  %vm3392_vm10 = vcmp.eq.s32.totalorder %v6995_v45, 0  ;;  %vm7036_vm9 = vcmp.le.f32.partialorder %v1944_v63, 0.7853982  ;;  %s3749_s19 = sshll.u32 %s4349_s2, 4  ;;  %s3750_s19 = int_to_ptr.vmem [resolvable:$true] %s3749_s19 }
 0x3c2   :  { %v4295_v4 = vpop.eup %4294  ;;  %v2018_v24 = vshrl.u32 %v2000_v52, %v2016_v20  ;;  %v2021_v11 = vadd.s32 127, %v2020_v13  ;;  %vm3391_vm11 = vcmp.lt.s32.totalorder %v6995_v45, 2  ;;  %vm3388_vm12 = vweird.f32 %v6733_v58  ;;  %s4319_s20 = scalar_lea.vmem %s3750_s19, 4096  ;;  %p4324_p1 = scmp.lt.s32.totalorder %s3750_s19, %s3750_s19 }
 0x3c3   :  { %v4297_v49 = vpop.eup %4296  ;;  %v3396_v15 = vxor.u32 2147483648, %v4295_v4  ;;  %v1855_v19 = vsub.s32 32, %v1854_v10  ;;  %v3669_v32 = vadd.s32 536870912, %v3668_v41  ;;  %v2033_v1 = vsel %vm7036_vm9, 0, %v2031_v51  ;;  %p4320_p0 = scmp.ne.s32.totalorder %s3750_s19, %s4319_s20  ;;  %p4325_p2 = scmp.lt.s32.totalorder %s4319_s20, %s4319_s20 }
 0x3c4   :  { %v3393_v12 = vxor.u32 2147483648, %v4297_v49  ;;  %v2019_v5 = vor.u32 %v2018_v24, %v2017_v53  ;;  %v2022_v48 = vshll.u32 %v2021_v11, 23  ;;  %v1848_v47 = vor.u32 8388608, %v1847_v61 }
 0x3c5   :  { %v3397_v55 = vsel %vm3395_vm5, %v3396_v15, %v4297_v49  ;;  %v7044_v63 = vshrl.u32 %v3669_v32, 30  ;;  %v1853_v35 = vshrl.u32 %v1852_v9, 5  ;;  %v1858_v39 = vshrl.u32 %v4344_v25, %v1855_v19  ;;  %p4326_p3 = por %p4325_p2, %p4324_p1 }
 0x3c6   :  { %v3394_v50 = vsel %vm3392_vm10, %v4295_v4, %v3393_v12  ;;  %v2023_v57 = vor.u32 4788187, %v2022_v48  ;;  %v2026_v6 = vcvt.s32.f32 %v2019_v5  ;;  %v1861_v45 = vshrl.u32 %v4345_v27, %v1855_v19 }
 0x3c7   :  { %v3398_v8 = vsel %vm3391_vm11, %v3394_v50, %v3397_v55  ;;  %v1864_v3 = vshrl.u32 %v4346_v29, %v1855_v19  ;;  %v3671_v58 = vshll.u32 %v7044_v63, 30  ;;  %v1863_v59 = vshll.u32 %v4345_v27, %v1854_v10  ;;  %p4327_p4 = pnand %p4326_p3, %p4320_p0 }
 0x3c8   :  { %v3399_v30 = vsel %vm3388_vm12, nan, %v3398_v8  ;;  %v2024_v0 = vand.u32 2147483647, %v2023_v57  ;;  %v1867_v42 = vshrl.u32 %v4347_v31, %v1855_v19  ;;  %v1857_v18 = vshll.u32 %v4343_v21, %v1854_v10 }
 0x3c9   :  { %3740 = vst [vmem:[#allocation2 + $0xe0] sm:$0xff] %v3399_v30  ;;  %v1860_v62 = vshll.u32 %v4344_v25, %v1854_v10  ;;  %v1866_v28 = vshll.u32 %v4346_v29, %v1854_v10  ;;  %v1870_v36 = vshrl.u32 %v4348_v38, %v1855_v19  ;;  %v7056_v43 = vsub.s32 %v3668_v41, %v3671_v58 }
 0x3ca   :  { %v2027_v23 = vmul.f32 %v2026_v6, %v2024_v0  ;;  %v1865_v34 = vor.u32 %v1864_v3, %v1863_v59  ;;  %v7062_v7 = vadd.f32 %v4318_v14, %v6614_v56  ;;  %v1859_v52 = vor.u32 %v1858_v39, %v1857_v18 }
 0x3cb   :  { %v1862_v20 = vor.u32 %v1861_v45, %v1860_v62  ;;  %v1868_v13 = vor.u32 %v1867_v42, %v1866_v28  ;;  %v1869_v2 = vshll.u32 %v4347_v31, %v1854_v10  ;;  %v2037_v61 = vadd.s32 3, %v2033_v1 }
 0x3cc   :  { %v2028_v22 = vxor.u32 2147483648, %v2027_v23  ;;  %v3674_v9 = vsub.s32 0, %v7056_v43  ;;  %v1888_v4 = vshll.u32 %v1848_v47, 8  ;;  %v1856_v24 = vshrl.u32 %v4343_v21, %v1855_v19 }
 0x3cd   :  { %v1871_v56 = vor.u32 %v1870_v36, %v1869_v2  ;;  %vm1875_vm13 = vcmp.lt.s32.totalorder %v1853_v35, 4  ;;  %vm1872_vm14 = vcmp.lt.s32.totalorder %v1853_v35, 1  ;;  %vm1873_vm15 = vcmp.lt.s32.totalorder %v1853_v35, 2 }
 0x3ce   :  { %v2029_v44 = vsel %vm1946_vm6, %v2028_v22, %v2027_v23  ;;  %v3918_v11 = vmin.u32 %v3674_v9, %v7056_v43  ;;  %v1877_v49 = vsel %vm1875_vm13, %v1865_v34, 2102212464  ;;  %v1880_v15 = vsel %vm1872_vm14, %v1859_v52, %v1862_v20 }
 0x3cf   :  { %v2032_v53 = vsel %vm7036_vm9, %v6833_v40, %v2029_v44  ;;  %v1881_v51 = vsel %vm1875_vm13, %v1868_v13, 920167782  ;;  %vm1874_vm0 = vcmp.lt.s32.totalorder %v1853_v35, 3  ;;  %v1876_v10 = vsel %vm1872_vm14, %v1856_v24, %v1859_v52 }
 0x3d0   :  { %4298 = vcosq.f32 %v2032_v53  ;;  %v3676_v16 = vclz %v3918_v11  ;;  %v1884_v12 = vsel %vm1872_vm14, %v1862_v20, %v1865_v34  ;;  %v1878_v5 = vsel %vm1874_vm0, %v1862_v20, %v1877_v49 }
 0x3d1   :  { %4300 = vsinq.f32 %v2032_v53  ;;  %v1882_v48 = vsel %vm1874_vm0, %v1865_v34, %v1881_v51  ;;  %v1885_v41 = vsel %vm1875_vm13, %v1871_v56, 1326507024  ;;  %v3507_v55 = vand.u32 2139095040, %v7062_v7 }
 0x3d2   :  { %v2038_v17 = vand.u32 3, %v2037_v61  ;;  %v3919_v19 = vadd.s32 4294967294, %v3676_v16  ;;  %v1883_v50 = vsel %vm1873_vm15, %v1880_v15, %v1882_v48  ;;  %v1886_v57 = vsel %vm1874_vm0, %v1868_v13, %v1885_v41 }
 0x3d3   :  { %v1887_v32 = vsel %vm1873_vm15, %v1884_v12, %v1886_v57  ;;  %v7076_v8 = vmul.u32.u64.low %v1888_v4, %v1883_v50  ;;  %v7077_v1 = vmul.u32.u64.high %v1888_v4, %v1883_v50, %v7076_v8  ;;  %v3508_v47 = vshrl.u32 %v3507_v55, 23 }
 0x3d4   :  { %vm3920_vm1 = vcmp.lt.s32.totalorder %v3919_v19, 0  ;;  %v1879_v30 = vsel %vm1873_vm15, %v1876_v10, %v1878_v5  ;;  %v7081_v0 = vmul.u32.u64.low %v1888_v4, %v1887_v32  ;;  %v7082_v6 = vmul.u32.u64.high %v1888_v4, %v1887_v32, %v7081_v0 }
 0x3d5   :  { %v3679_v39 = vsel %vm3920_vm1, 0, %v3919_v19  ;;  %v3913_v45 = vadd.s32 4294967169, %v3508_v47  ;;  %vm3610_vm2 = vcmp.lt.s32.totalorder %v6888_v26, 0  ;;  %v3664_v3 = vadd.s32 %v7009_v54, %v7014_v33 }
 0x3d6   :  { %v3680_v23 = vsub.s32 32, %v3679_v39  ;;  %v3684_v58 = vsub.s32 4294967266, %v3679_v39  ;;  %vm2043_vm3 = vcmp.eq.s32.totalorder %v2038_v17, 2  ;;  %v1895_v59 = vmul.u32 %v1888_v4, %v1879_v30 }
 0x3d7   :  { %v1898_v42 = vadd.s32 1, %v7077_v1  ;;  %v3514_v18 = vadd.s32 1, %v3913_v45  ;;  %v3681_v35 = vshll.u32 %v7056_v43, %v3679_v39  ;;  %vm1897_vm4 = vc.u32 %v7082_v6, %v7076_v8 }
 0x3d8   :  { %v3682_v28 = vshrl.u32 %v3664_v3, %v3680_v23  ;;  %v3685_v36 = vadd.s32 127, %v3684_v58  ;;  %v3694_v14 = vsub.s32 4, %v7044_v63  ;;  %vm2040_vm6 = vcmp.eq.s32.totalorder %v2038_v17, 0 }
 0x3d9   :  { %v1899_v54 = vsel %vm1897_vm4, %v1898_v42, %v7077_v1  ;;  %vm3515_vm5 = vcmp.gt.s32.totalorder %v3514_v18, 0  ;;  %v3504_v43 = vand.u32 2147483647, %v7062_v7  ;;  %vm2039_vm7 = vcmp.lt.s32.totalorder %v2038_v17, 2 }
 0x3da   :  { %v4299_v62 = vpop.eup %4298  ;;  %v3683_v52 = vor.u32 %v3682_v28, %v3681_v35  ;;  %v3686_v20 = vshll.u32 %v3685_v36, 23  ;;  %v1900_v13 = vadd.s32 %v1899_v54, %v1895_v59  ;;  %v3516_v44 = vsel %vm3515_vm5, %v3514_v18, 0 }
 0x3db   :  { %v4301_v22 = vpop.eup %4300  ;;  %v2044_v34 = vxor.u32 2147483648, %v4299_v62  ;;  %vm2036_vm8 = vweird.f32 %v6833_v40  ;;  %v3695_v24 = vsel %vm3610_vm2, %v3694_v14, %v7044_v63  ;;  %v3518_v56 = vand.u32 31, %v3516_v44 }
 0x3dc   :  { %v2041_v33 = vxor.u32 2147483648, %v4301_v22  ;;  %v3687_v9 = vor.u32 4788187, %v3686_v20  ;;  %v1901_v4 = vadd.s32 536870912, %v1900_v13  ;;  %v3690_v15 = vcvt.s32.f32 %v3683_v52 }
 0x3dd   :  { %v2045_v2 = vsel %vm2043_vm3, %v2044_v34, %v4301_v22  ;;  %vm7103_vm10 = vcmp.le.f32.partialorder %v3608_v46, 0.7853982  ;;  %v3511_v40 = vand.u32 8388607, %v3504_v43  ;;  %v3519_v10 = vsub.s32 32, %v3518_v56 }
 0x3de   :  { %v2042_v61 = vsel %vm2040_vm6, %v4299_v62, %v2041_v33  ;;  %v3688_v49 = vand.u32 2147483647, %v3687_v9  ;;  %v7099_v51 = vshrl.u32 %v1901_v4, 30  ;;  %v3697_v63 = vsel %vm7103_vm10, 0, %v3695_v24 }
 0x3df   :  { %v2046_v53 = vsel %vm2039_vm7, %v2042_v61, %v2045_v2  ;;  %v3521_v48 = vshll.u32 %v4343_v21, %v3518_v56  ;;  %v3522_v41 = vshrl.u32 %v4344_v25, %v3519_v10  ;;  %v3524_v55 = vshll.u32 %v4344_v25, %v3518_v56 }
 0x3e0   :  { %v2047_v11 = vsel %vm2036_vm8, nan, %v2046_v53  ;;  %v3691_v12 = vmul.f32 %v3690_v15, %v3688_v49  ;;  %v1903_v5 = vshll.u32 %v7099_v51, 30  ;;  %v3525_v46 = vshrl.u32 %v4345_v27, %v3519_v10 }
 0x3e1   :  { %3727 = vst [vmem:[#allocation2 + $0x78] sm:$0xff] %v2047_v11  ;;  %v3528_v17 = vshrl.u32 %v4346_v29, %v3519_v10  ;;  %v3527_v57 = vshll.u32 %v4345_v27, %v3518_v56  ;;  %v3531_v32 = vshrl.u32 %v4347_v31, %v3519_v10  ;;  %v3512_v1 = vor.u32 8388608, %v3511_v40 }
 0x3e2   :  { %v3692_v19 = vxor.u32 2147483648, %v3691_v12  ;;  %v1904_v50 = vsub.s32 %v1900_v13, %v1903_v5  ;;  %v3517_v47 = vshrl.u32 %v3516_v44, 5  ;;  %v3523_v30 = vor.u32 %v3522_v41, %v3521_v48 }
 0x3e3   :  { %v3530_v0 = vshll.u32 %v4346_v29, %v3518_v56  ;;  %v3526_v25 = vor.u32 %v3525_v46, %v3524_v55  ;;  %v3529_v3 = vor.u32 %v3528_v17, %v3527_v57  ;;  %v3533_v27 = vshll.u32 %v4347_v31, %v3518_v56 }
 0x3e4   :  { %v3693_v39 = vsel %vm3610_vm2, %v3692_v19, %v3691_v12  ;;  %v1906_v45 = vsub.s32 0, %v1904_v50  ;;  %v3534_v59 = vshrl.u32 %v4348_v38, %v3519_v10  ;;  %v3701_v18 = vadd.s32 3, %v3697_v63 }
 0x3e5   :  { %v3696_v23 = vsel %vm7103_vm10, %v6888_v26, %v3693_v39  ;;  %v3532_v58 = vor.u32 %v3531_v32, %v3530_v0  ;;  %v3552_v62 = vshll.u32 %v3512_v1, 8  ;;  %v3520_v28 = vshrl.u32 %v4343_v21, %v3519_v10 }
 0x3e6   :  { %4302 = vcosq.f32 %v3696_v23  ;;  %v3850_v42 = vmin.u32 %v1906_v45, %v1904_v50  ;;  %v3535_v29 = vor.u32 %v3534_v59, %v3533_v27  ;;  %vm3536_vm9 = vcmp.lt.s32.totalorder %v3517_v47, 1 }
 0x3e7   :  { %4304 = vsinq.f32 %v3696_v23  ;;  %vm3539_vm11 = vcmp.lt.s32.totalorder %v3517_v47, 4  ;;  %vm3538_vm12 = vcmp.lt.s32.totalorder %v3517_v47, 3  ;;  %v3544_v22 = vsel %vm3536_vm9, %v3523_v30, %v3526_v25 }
 0x3e8   :  { %v1908_v35 = vclz %v3850_v42  ;;  %v3541_v36 = vsel %vm3539_vm11, %v3529_v3, 2102212464  ;;  %v3545_v34 = vsel %vm3539_vm11, %v3532_v58, 920167782  ;;  %vm3537_vm13 = vcmp.lt.s32.totalorder %v3517_v47, 2 }
 0x3e9   :  { %v3546_v31 = vsel %vm3538_vm12, %v3529_v3, %v3545_v34  ;;  %v3548_v54 = vsel %vm3536_vm9, %v3526_v25, %v3529_v3  ;;  %v3540_v38 = vsel %vm3536_vm9, %v3520_v28, %v3523_v30  ;;  %v3542_v33 = vsel %vm3538_vm12, %v3526_v25, %v3541_v36 }
 0x3ea   :  { %v3851_v14 = vadd.s32 4294967294, %v1908_v35  ;;  %v3547_v52 = vsel %vm3537_vm13, %v3544_v22, %v3546_v31  ;;  %v3549_v20 = vsel %vm3539_vm11, %v3535_v29, 1326507024  ;;  %v3702_v9 = vand.u32 3, %v3701_v18 }
 0x3eb   :  { %v3550_v13 = vsel %vm3538_vm12, %v3532_v58, %v3549_v20  ;;  %v7129_v2 = vmul.u32.u64.low %v3552_v62, %v3547_v52  ;;  %v7130_v44 = vmul.u32.u64.high %v3552_v62, %v3547_v52, %v7129_v2  ;;  %v1896_v4 = vadd.s32 %v7076_v8, %v7082_v6 }
 0x3ec   :  { %vm3852_vm14 = vcmp.lt.s32.totalorder %v3851_v14, 0  ;;  %v3551_v61 = vsel %vm3537_vm13, %v3548_v54, %v3550_v13  ;;  %v3543_v56 = vsel %vm3537_vm13, %v3540_v38, %v3542_v33  ;;  %vm3707_vm15 = vcmp.eq.s32.totalorder %v3702_v9, 2 }
 0x3ed   :  { %v1911_v21 = vsel %vm3852_vm14, 0, %v3851_v14  ;;  %v7137_v11 = vmul.u32.u64.low %v3552_v62, %v3551_v61  ;;  %v7138_v49 = vmul.u32.u64.high %v3552_v62, %v3551_v61, %v7137_v11  ;;  %v3562_v12 = vadd.s32 1, %v7130_v44 }
 0x3ee   :  { %v1912_v53 = vsub.s32 32, %v1911_v21  ;;  %v1916_v24 = vsub.s32 4294967266, %v1911_v21  ;;  %v1913_v16 = vshll.u32 %v1904_v50, %v1911_v21  ;;  %vm3704_vm0 = vcmp.eq.s32.totalorder %v3702_v9, 0 }
 0x3ef   :  { %v3559_v6 = vmul.u32 %v3552_v62, %v3543_v56  ;;  %vm3561_vm1 = vc.u32 %v7138_v49, %v7129_v2  ;;  %vm3703_vm2 = vcmp.lt.s32.totalorder %v3702_v9, 2  ;;  %vm3700_vm3 = vweird.f32 %v6888_v26 }
 0x3f0   :  { %v4303_v15 = vpop.eup %4302  ;;  %v1914_v40 = vshrl.u32 %v1896_v4, %v1912_v53  ;;  %v1917_v10 = vadd.s32 127, %v1916_v24  ;;  %v3563_v19 = vsel %vm3561_vm1, %v3562_v12, %v7130_v44  ;;  %v1926_v39 = vsub.s32 4, %v7099_v51 }
 0x3f1   :  { %v4305_v63 = vpop.eup %4304  ;;  %v3708_v5 = vxor.u32 2147483648, %v4303_v15  ;;  %v3564_v57 = vadd.s32 %v3563_v19, %v3559_v6  ;;  %vm1842_vm4 = vcmp.lt.s32.totalorder %v6901_v37, 0  ;;  %vm1841_vm5 = vcmp.le.f32.partialorder %v1840_v60, 0.7853982 }
 0x3f2   :  { %v3705_v48 = vxor.u32 2147483648, %v4305_v63  ;;  %v1915_v41 = vor.u32 %v1914_v40, %v1913_v16  ;;  %v1918_v55 = vshll.u32 %v1917_v10, 23  ;;  %v1927_v26 = vsel %vm1842_vm4, %v1926_v39, %v7099_v51 }
 0x3f3   :  { %v3709_v8 = vsel %vm3707_vm15, %v3708_v5, %v4305_v63  ;;  %v3565_v30 = vadd.s32 536870912, %v3564_v57  ;;  %v1929_v59 = vsel %vm1841_vm5, 0, %v1927_v26  ;;  %v3560_v51 = vadd.s32 %v7129_v2, %v7138_v49 }
 0x3f4   :  { %v3706_v46 = vsel %vm3704_vm0, %v4303_v15, %v3705_v48  ;;  %v1919_v17 = vor.u32 4788187, %v1918_v55  ;;  %v1922_v47 = vcvt.s32.f32 %v1915_v41  ;;  %v1933_v29 = vadd.s32 3, %v1929_v59 }
 0x3f5   :  { %v3710_v50 = vsel %vm3703_vm2, %v3706_v46, %v3709_v8  ;;  %v3566_v45 = vshrl.u32 %v3565_v30, 30  ;;  %vm1932_vm9 = vweird.f32 %v6901_v37  ;;  %vm3506_vm11 = vcmp.lt.s32.totalorder %v7062_v7, 0 }
 0x3f6   :  { %v3711_v32 = vsel %vm3700_vm3, nan, %v3710_v50  ;;  %v1920_v1 = vand.u32 2147483647, %v1919_v17  ;;  %v1934_v28 = vand.u32 3, %v1933_v29  ;;  %vm3505_vm12 = vcmp.le.f32.partialorder %v3504_v43, 0.7853982 }
 0x3f7   :  { %3743 = vst [vmem:[#allocation2 + $0xf8] sm:$0xff] %v3711_v32  ;;  %v3567_v3 = vshll.u32 %v3566_v45, 30  ;;  %v3590_v56 = vsub.s32 4, %v3566_v45  ;;  %vm3596_vm0 = vweird.f32 %v7062_v7 }
 0x3f8   :  { %v1923_v0 = vmul.f32 %v1922_v47, %v1920_v1  ;;  %vm1936_vm7 = vcmp.eq.s32.totalorder %v1934_v28, 0  ;;  %vm1939_vm8 = vcmp.eq.s32.totalorder %v1934_v28, 2  ;;  %vm1935_vm10 = vcmp.lt.s32.totalorder %v1934_v28, 2 }
 0x3f9   :  { %v3568_v27 = vsub.s32 %v3564_v57, %v3567_v3  ;;  %v3591_v15 = vsel %vm3506_vm11, %v3590_v56, %v3566_v45 }
 0x3fa   :  { %v1924_v25 = vxor.u32 2147483648, %v1923_v0  ;;  %v3593_v16 = vsel %vm3505_vm12, 0, %v3591_v15 }
 0x3fb   :  { %v3570_v42 = vsub.s32 0, %v3568_v27  ;;  %v3597_v40 = vadd.s32 3, %v3593_v16 }
 0x3fc   :  { %v1925_v23 = vsel %vm1842_vm4, %v1924_v25, %v1923_v0 }
 0x3fd   :  { %v1928_v58 = vsel %vm1841_vm5, %v6901_v37, %v1925_v23  ;;  %v3914_v18 = vmin.u32 %v3570_v42, %v3568_v27  ;;  %v3598_v10 = vand.u32 3, %v3597_v40 }
 0x3fe   :  { %4306 = vcosq.f32 %v1928_v58 }
 0x3ff   :  { %4308 = vsinq.f32 %v1928_v58  ;;  %v3572_v62 = vclz %v3914_v18  ;;  %vm3603_vm13 = vcmp.eq.s32.totalorder %v3598_v10, 2  ;;  %vm3600_vm14 = vcmp.eq.s32.totalorder %v3598_v10, 0 }
 0x400   :  { %vm3599_vm15 = vcmp.lt.s32.totalorder %v3598_v10, 2 }
 0x401   :  { %v3915_v35 = vadd.s32 4294967294, %v3572_v62 }
 0x403   :  { %vm3916_vm6 = vcmp.lt.s32.totalorder %v3915_v35, 0 }
 0x404   :  { %v3575_v22 = vsel %vm3916_vm6, 0, %v3915_v35 }
 0x405   :  { %v3576_v14 = vsub.s32 32, %v3575_v22  ;;  %v3580_v31 = vsub.s32 4294967266, %v3575_v22  ;;  %v3577_v33 = vshll.u32 %v3568_v27, %v3575_v22 }
 0x407   :  { %v3578_v52 = vshrl.u32 %v3560_v51, %v3576_v14  ;;  %v3581_v20 = vadd.s32 127, %v3580_v31 }
 0x408   :  { %v4307_v36 = vpop.eup %4306 }
 0x409   :  { %v4309_v34 = vpop.eup %4308  ;;  %v1940_v60 = vxor.u32 2147483648, %v4307_v36  ;;  %v3579_v21 = vor.u32 %v3578_v52, %v3577_v33  ;;  %v3582_v61 = vshll.u32 %v3581_v20, 23 }
 0x40a   :  { %v1937_v54 = vxor.u32 2147483648, %v4309_v34 }
 0x40b   :  { %v1941_v38 = vsel %vm1939_vm8, %v1940_v60, %v4309_v34  ;;  %v3583_v4 = vor.u32 4788187, %v3582_v61  ;;  %v3586_v53 = vcvt.s32.f32 %v3579_v21 }
 0x40c   :  { %v1938_v13 = vsel %vm1936_vm7, %v4307_v36, %v1937_v54 }
 0x40d   :  { %v1942_v44 = vsel %vm1935_vm10, %v1938_v13, %v1941_v38  ;;  %v3584_v2 = vand.u32 2147483647, %v3583_v4 }
 0x40e   :  { %v1943_v9 = vsel %vm1932_vm9, nan, %v1942_v44 }
 0x40f   :  { %3726 = vst [vmem:[#allocation2 + $0x70] sm:$0xff] %v1943_v9  ;;  %v3587_v24 = vmul.f32 %v3586_v53, %v3584_v2 }
 0x411   :  { %v3588_v11 = vxor.u32 2147483648, %v3587_v24 }
 0x413   :  { %v3589_v49 = vsel %vm3506_vm11, %v3588_v11, %v3587_v24 }
 0x414   :  { %v3592_v37 = vsel %vm3505_vm12, %v7062_v7, %v3589_v49 }
 0x415   :  { %4310 = vcosq.f32 %v3592_v37 }
 0x416   :  { %4312 = vsinq.f32 %v3592_v37 }
 0x41f   :  { %v4311_v12 = vpop.eup %4310 }
 0x420   :  { %v4313_v63 = vpop.eup %4312  ;;  %v3604_v5 = vxor.u32 2147483648, %v4311_v12 }
 0x421   :  { %v3601_v48 = vxor.u32 2147483648, %v4313_v63 }
 0x422   :  { %v3605_v41 = vsel %vm3603_vm13, %v3604_v5, %v4313_v63 }
 0x423   :  { %v3602_v43 = vsel %vm3600_vm14, %v4311_v12, %v3601_v48 }
 0x424   :  { %v3606_v55 = vsel %vm3599_vm15, %v3602_v43, %v3605_v41 }
 0x425   :  { %v3607_v8 = vsel %vm3596_vm0, nan, %v3606_v55 }
 0x426   :  { %3742 = vst [vmem:[#allocation2 + $0xf0] sm:$0xff] %v3607_v8 }
 0x427   :  { %4330 = shalt.err (!%p4327_p4)
}
 0x428   :  { %s4331_s23 = scalar_lea.hbm %s7174_s3, 4096 }
 0x429   :  { %p4332_p5 = scmp.ne.s32.totalorder %s7174_s3, %s4331_s23  ;;  %p4335_p6 = scmp.lt.u32.totalorder %s4331_s23, %s7174_s3 }
 0x42b   :  { %p4337_p7 = pnand %p4335_p6, %p4332_p5 }
 0x42d   :  { %4340 = shalt.err (!%p4337_p7)
}
 0x42e   :  { %s4350_s28 = smov 128   ;;  %s4351_s29 = smov 8  }
 0x42f   :  { %3755 = dma.vmem_to_hbm [thread:$0]  %s3750_s19, 4096, %s7174_s3, [#allocation3], %s4350_s28, %s4350_s28, %s4351_s29  }
 0x430   :  { %4341 = dma.done.wait [#allocation3], 4096  }
 0x431   :  { %4342 = vsyncadd [#allocation3], 4294963200 }
 0x432   :  { %3759 = vsyncpa [#allocation3], 1 }

</bundles_post_ra>
